<compile_context>
chip_gen: v7x
topology: tpu7x:2x2x1
jax: 0.10.0
libtpu: 0.0.40
codegen_flags: <defaults>
</compile_context>

<pallas_src>
import jax
import jax.numpy as jnp
from jax import lax
from jax.experimental import pallas as pl
from jax.experimental.pallas import tpu as pltpu


# ----------------------------- Pallas kernels ------------------------------

def _conv1x1_kernel(x_ref, w_ref, o_ref):
    # NCHW-native 1x1 conv: per-image matmul  W (Cout,Cin) @ x (Cin,HW) -> (Cout,HW).
    # x_ref: (Bt, Cin, HW)   w_ref: (Cout, Cin)   o_ref: (Bt, Cout, HW)
    w = w_ref[...]
    for b in range(x_ref.shape[0]):           # static unroll (Bt is small)
        o_ref[b] = jnp.dot(w, x_ref[b],
                           preferred_element_type=jnp.float32).astype(o_ref.dtype)


def _pool_story_kernel(x_ref, wc_ref, bc_ref, ws_ref, bs_ref, code_ref, story_ref):
    # Fused: F.avg_pool2d(k=8) + emb_cnn_code Linear + mean over video_len
    #        + story_transform Linear, for one story (T frames) per grid step.
    # x_ref:  (1, T, C, HW)  NCHW-native Mixed_7c block
    # wc_ref: (nef, C)   bc_ref: (1, nef)   -> cnn_code = pooled @ wc.T + bc
    # ws_ref: (nef, nef) bs_ref: (1, nef)   -> story    = mean_T(cnn_code) @ ws.T + bs
    pooled = jnp.mean(x_ref[0], axis=-1)                                      # (T, C)
    code = lax.dot_general(pooled, wc_ref[...], (((1,), (1,)), ((), ())),
                           preferred_element_type=jnp.float32) + bc_ref[...]  # (T, nef)
    code_ref[...] = code[None].astype(code_ref.dtype)
    m = jnp.mean(code, axis=0, keepdims=True)                                 # (1, nef)
    story = lax.dot_general(m, ws_ref[...], (((1,), (1,)), ((), ())),
                            preferred_element_type=jnp.float32) + bs_ref[...] # (1, nef)
    story_ref[...] = story[None].astype(story_ref.dtype)


# ------------------------------ wrappers ------------------------------------

def emb_features_conv1x1(feat_nchw, w_oi, *, images_per_step=2):
    """1x1 conv (bias=False), NCHW in / NCHW out with no transposes.

    feat_nchw: (N, Cin, H, W); w_oi: (Cout, Cin).
    """
    N, Cin, H, W = feat_nchw.shape
    Cout = w_oi.shape[0]
    HW = H * W
    bt = images_per_step if N % images_per_step == 0 else 1
    x = feat_nchw.reshape(N, Cin, HW)                      # free reshape (contiguous)
    # Per-step VMEM (double-buffered in/out + weight) at bt=2:
    #   2*(2*768*289*4 + 2*256*289*4) + 768*256*4  ~= 5.5 MB  -> fits v5e/v6e/v7x defaults.
    out = pl.pallas_call(
        _conv1x1_kernel,
        out_shape=jax.ShapeDtypeStruct((N, Cout, HW), feat_nchw.dtype),
        grid=(N // bt,),
        in_specs=[pl.BlockSpec((bt, Cin, HW), lambda i: (i, 0, 0)),
                  pl.BlockSpec((Cout, Cin), lambda i: (0, 0))],
        out_specs=pl.BlockSpec((bt, Cout, HW), lambda i: (i, 0, 0)),
        compiler_params=pltpu.CompilerParams(dimension_semantics=("parallel",)),
    )(x, w_oi)
    return out.reshape(N, Cout, H, W)                      # already NCHW like PyTorch


def cnn_encoder_head(feat_6e, feat_7c, video_len,
                     emb_features_w, emb_cnn_code_w, emb_cnn_code_b,
                     story_w, story_b):
    """Implements the post-backbone part of CNN_ENCODER.forward."""
    N, C7, H7, W7 = feat_7c.shape
    nef = emb_features_w.shape[0]
    T = video_len
    B = N // T
    HW7 = H7 * W7

    # features = self.emb_features(x)   with x = Mixed_6e output (N, 768, 17, 17)
    features = emb_features_conv1x1(feat_6e, emb_features_w)          # (N, nef, 17, 17)

    # Fused:
    #   x = F.avg_pool2d(Mixed_7c_out, 8).view(N, -1)
    #   cnn_code = self.emb_cnn_code(x)
    #   story_features = self.story_transform(mean(cnn_code.view(-1, T, nef), dim=1))
    x7 = feat_7c.reshape(B, T, C7, HW7)                               # free reshape
    code, story = pl.pallas_call(
        _pool_story_kernel,
        out_shape=(jax.ShapeDtypeStruct((B, T, nef), feat_7c.dtype),
                   jax.ShapeDtypeStruct((B, 1, nef), feat_7c.dtype)),
        grid=(B,),
        in_specs=[pl.BlockSpec((1, T, C7, HW7), lambda i: (i, 0, 0, 0)),
                  pl.BlockSpec((nef, C7), lambda i: (0, 0)),
                  pl.BlockSpec((1, nef), lambda i: (0, 0)),
                  pl.BlockSpec((nef, nef), lambda i: (0, 0)),
                  pl.BlockSpec((1, nef), lambda i: (0, 0))],
        out_specs=(pl.BlockSpec((1, T, nef), lambda i: (i, 0, 0)),
                   pl.BlockSpec((1, 1, nef), lambda i: (i, 0, 0))),
        compiler_params=pltpu.CompilerParams(dimension_semantics=("parallel",)),
    )(x7, emb_cnn_code_w, emb_cnn_code_b.reshape(1, nef),
      story_w, story_b.reshape(1, nef))

    cnn_code = code.reshape(N, nef)
    story_features = story.reshape(B, nef)
    return features, cnn_code, story_features


# --------------------------- pure-JAX reference ------------------------------

def _reference(feat_6e, feat_7c, video_len, wf, wc, bc, ws, bs):
    hi = jax.lax.Precision.HIGHEST
    nef = wf.shape[0]
    features = jnp.einsum('nchw,oc->nohw', feat_6e, wf, precision=hi)
    pooled = jnp.mean(feat_7c, axis=(2, 3))                           # (N, 2048)
    cnn_code = jnp.dot(pooled, wc.T, precision=hi) + bc
    story = jnp.dot(jnp.mean(cnn_code.reshape(-1, video_len, nef), axis=1),
                    ws.T, precision=hi) + bs
    return features, cnn_code, story


if __name__ == "__main__":
    # Small, deterministic config.  Eval mode (cfg.TRAIN.FLAG == False) => nef = 256.
    B, T = 2, 4               # batch of stories, video_len frames each
    N = B * T                 # frames flattened, as done by x.reshape(-1, C, H, W)
    nef = 256

    key = jax.random.PRNGKey(0)
    k1, k2, k3, k4, k5, k6, k7 = jax.random.split(key, 7)

    # TODO(synk): Inception v3 backbone (Conv2d_1a_3x3 .. Mixed_7c) is a frozen
    # pretrained network with no clean single-kernel Pallas equivalent; the two
    # intermediate activation maps it would produce are synthesized here and fed
    # to the Pallas head kernels (channel/spatial dims match the real backbone).
    feat_6e = jax.random.normal(k1, (N, 768, 17, 17), jnp.float32)   # Mixed_6e output
    feat_7c = jax.random.normal(k2, (N, 2048, 8, 8), jnp.float32)    # Mixed_7c output

    # Deterministic parameter init (uniform(-0.1, 0.1), as in init_trainable_weights).
    initrange = 0.1
    emb_features_w = jax.random.uniform(k3, (nef, 768, 1, 1), jnp.float32,
                                        -initrange, initrange).reshape(nef, 768)
    emb_cnn_code_w = jax.random.uniform(k4, (nef, 2048), jnp.float32, -initrange, initrange)
    emb_cnn_code_b = jax.random.uniform(k5, (nef,), jnp.float32, -initrange, initrange)
    story_w = jax.random.uniform(k6, (nef, nef), jnp.float32, -initrange, initrange)
    story_b = jax.random.uniform(k7, (nef,), jnp.float32, -initrange, initrange)

    features, cnn_code, story_features = cnn_encoder_head(
        feat_6e, feat_7c, T,
        emb_features_w, emb_cnn_code_w, emb_cnn_code_b, story_w, story_b)
    jax.block_until_ready((features, cnn_code, story_features))

    # Shape checks (match the PyTorch module's return values).
    assert features.shape == (N, nef, 17, 17)
    assert cnn_code.shape == (N, nef)
    assert story_features.shape == (B, nef)

    # Numerical check against pure-JAX reference.
    rf, rc, rs = _reference(feat_6e, feat_7c, T,
                            emb_features_w, emb_cnn_code_w, emb_cnn_code_b,
                            story_w, story_b)
    assert jnp.allclose(features, rf, rtol=1e-3, atol=1e-3)
    assert jnp.allclose(cnn_code, rc, rtol=1e-3, atol=1e-3)
    assert jnp.allclose(story_features, rs, rtol=1e-3, atol=1e-3)

    print("KERNEL_OK")
</pallas_src>

<mosaic_0001>
module attributes {stable_mosaic.version = 11 : i64} {
  func.func @_conv1x1_kernel(%arg0: i32, %arg1: memref<2x768x289xf32, #tpu.memory_space<vmem>>, %arg2: memref<256x768xf32, #tpu.memory_space<vmem>>, %arg3: memref<2x256x289xf32, #tpu.memory_space<vmem>>) attributes {dimension_semantics = [#tpu.dimension_semantics<parallel>], iteration_bounds = array<i64: 4>, scalar_prefetch = 0 : i64, scratch_operands = 0 : i64, tpu.core_type = #tpu.core_type<tc>, window_params = [{transform_indices = @transform_0, window_bounds = array<i64: 2, 768, 289>}, {pipeline_mode = #tpu.pipeline_mode<synchronous>, transform_indices = @transform_1, window_bounds = array<i64: 256, 768>}, {transform_indices = @transform_2, window_bounds = array<i64: 2, 256, 289>}]} {
    %c0 = arith.constant 0 : index
    %c0_0 = arith.constant 0 : index
    %0 = vector.load %arg2[%c0, %c0_0] : memref<256x768xf32, #tpu.memory_space<vmem>>, vector<256x768xf32>
    %c0_1 = arith.constant 0 : index
    %c0_2 = arith.constant 0 : index
    %c0_3 = arith.constant 0 : index
    %1 = vector.load %arg1[%c0_1, %c0_2, %c0_3] : memref<2x768x289xf32, #tpu.memory_space<vmem>>, vector<1x768x289xf32>
    %2 = vector.shape_cast %1 : vector<1x768x289xf32> to vector<768x289xf32>
    %cst = arith.constant dense<0.000000e+00> : vector<256x289xf32>
    %3 = tpu.matmul %0, %2, %cst {dimension_numbers = #tpu.dot_dimension_numbers<[1], [0], [0], [1], [0, 0, 1, 1], [], []>} : vector<256x768xf32>, vector<768x289xf32>, vector<256x289xf32> -> vector<256x289xf32>
    %c0_4 = arith.constant 0 : index
    %c0_5 = arith.constant 0 : index
    %c0_6 = arith.constant 0 : index
    %4 = vector.load %arg3[%c0_4, %c0_5, %c0_6] : memref<2x256x289xf32, #tpu.memory_space<vmem>>, vector<1x256x289xf32>
    %5 = vector.shape_cast %4 : vector<1x256x289xf32> to vector<256x289xf32>
    %6 = vector.shape_cast %3 : vector<256x289xf32> to vector<1x256x289xf32>
    tpu.vector_store %arg3[%c0_4, %c0_5, %c0_6], %6 {strides = array<i32>} : memref<2x256x289xf32, #tpu.memory_space<vmem>>, vector<1x256x289xf32>,
    %c1 = arith.constant 1 : index
    %c0_7 = arith.constant 0 : index
    %c0_8 = arith.constant 0 : index
    %7 = vector.load %arg1[%c1, %c0_7, %c0_8] : memref<2x768x289xf32, #tpu.memory_space<vmem>>, vector<1x768x289xf32>
    %8 = vector.shape_cast %7 : vector<1x768x289xf32> to vector<768x289xf32>
    %cst_9 = arith.constant dense<0.000000e+00> : vector<256x289xf32>
    %9 = tpu.matmul %0, %8, %cst_9 {dimension_numbers = #tpu.dot_dimension_numbers<[1], [0], [0], [1], [0, 0, 1, 1], [], []>} : vector<256x768xf32>, vector<768x289xf32>, vector<256x289xf32> -> vector<256x289xf32>
    %c1_10 = arith.constant 1 : index
    %c0_11 = arith.constant 0 : index
    %c0_12 = arith.constant 0 : index
    %10 = vector.load %arg3[%c1_10, %c0_11, %c0_12] : memref<2x256x289xf32, #tpu.memory_space<vmem>>, vector<1x256x289xf32>
    %11 = vector.shape_cast %10 : vector<1x256x289xf32> to vector<256x289xf32>
    %12 = vector.shape_cast %9 : vector<256x289xf32> to vector<1x256x289xf32>
    tpu.vector_store %arg3[%c1_10, %c0_11, %c0_12], %12 {strides = array<i32>} : memref<2x256x289xf32, #tpu.memory_space<vmem>>, vector<1x256x289xf32>,
    return
  }
  func.func @transform_0(%arg0: i32) -> (i32, i32, i32) {
    %c0_i32 = arith.constant 0 : i32
    %c0_i32_0 = arith.constant 0 : i32
    %c0_i32_1 = arith.constant 0 : i32
    return %arg0, %c0_i32, %c0_i32_0 : i32, i32, i32
  }
  func.func @transform_1(%arg0: i32) -> (i32, i32) {
    %c0_i32 = arith.constant 0 : i32
    %c0_i32_0 = arith.constant 0 : i32
    %c0_i32_1 = arith.constant 0 : i32
    return %c0_i32, %c0_i32_0 : i32, i32
  }
  func.func @transform_2(%arg0: i32) -> (i32, i32, i32) {
    %c0_i32 = arith.constant 0 : i32
    %c0_i32_0 = arith.constant 0 : i32
    %c0_i32_1 = arith.constant 0 : i32
    return %arg0, %c0_i32, %c0_i32_0 : i32, i32, i32
  }
}

</mosaic_0001>

<bundles_post_ra>
// kernel: tpu_custom_call.1
= control target key start
LH: loop header
LB: loop body
LE: loop exit
PB: predicated region body
PF: predicated region fallthrough
CT: control target
= control target key end

     0   :  { %s5871_s9 = smov 0   ;;  %s7976_s0 = inlined_call_operand.vmem [shape: f32[8,768,289], index: 0, kind: input, shape index: {}]   ;;  %s7977_s1 = inlined_call_operand.vmem [shape: f32[256,768], index: 1, kind: input, shape index: {}]   ;;  %s7978_s2 = inlined_call_operand.vmem [shape: f32[8,256,289], index: 2, kind: output, shape index: {}]  }
   0x1 LB: > { %s4065_s10 = sadd.s32 4294967295, %s5853_s9   ;;  %p4069_p0 = scmp.ge.s32.totalorder %s5853_s9, 1  ;;  %s5853_s9 = sphi %s5871_s9, %s12_s9  }
   0x2   : > { %p114_p1 = scmp.lt.s32.totalorder %s5853_s9, 5 }
   0x4   : > { %p115_p2 = pnand %p4069_p0, %p114_p1 }
   0x5   : > { %s4070_s11 = sshll.u32 (!%p115_p2), %s4065_s10, 1  ;;  %v153_v0 = vld [vmem:[%s7977_s1 + $0x8] sm:$0xff] (!%p115_p2)  ;;  %v5855_v1 = vmov (!%p115_p2), 0.0|0.0   ;;  %vm2080_vm0 = vcmask (!%p115_p2), 269312  }
   0x6   : > { %118 = sbr.rel (%p115_p2) target bundleno = 1062 (0x426), region = 28  ;;  %4652 = vmatprep.subr.bf16.mxu1 (!%p115_p2), %v5855_v1  ;;  %p139_p3 = scmp.lt.s32.totalorder (!%p115_p2), %s4070_s11, 7  ;;  %1467 = vmatprep.mubr.f32.mxu1 (!%p115_p2), %v153_v0 }
   0x7   : > { %696 = vmatprep.mubr.f32.mxu0 (!%p115_p2), %v153_v0 }
   0xd   : > { %s7980_s11 = smov (!%p139_p3, %s4070_s11), 7 }
   0xe   : > { %s5644_s14 = smul.u32 2304, %s7980_s11 }
   0xf   : > { %s5645_s4 = smul.u32 768, %s7980_s11 }
  0x10   : > { %s5889_s17 = scalar_lea.vmem %s7976_s0, %s5644_s14 }
  0x11   : > { %v345_v2 = vld [vmem:[%s5889_s17 + $0x8] sm:$0xff]  ;;  %v348_v3 = vld [vmem:[%s5889_s17 + $0x20] sm:$0xff]  ;;  %v346_v4 = vld [vmem:[%s5889_s17 + $0x10] sm:$0xff]  ;;  %s7156_s10 = scalar_lea.vmem %s7978_s2, %s5645_s4 }
  0x12   : > { %v4460_v5 = vpack.c.bf16 %v348_v3, %v345_v2  ;;  %v349_v6 = vld [vmem:[%s5889_s17 + $0x28] sm:$0xff]  ;;  %v344_v7 = vld [vmem:[%s5889_s17] sm:$0xff]  ;;  %v347_v8 = vld [vmem:[%s5889_s17 + $0x18] sm:$0xff] }
  0x13   : > { %v4653_v9 = vpack.c.bf16 %v349_v6, %v346_v4  ;;  %v4462_v10 = vpack.c.bf16 %v347_v8, %v344_v7  ;;  %v351_v11 = vld [vmem:[%s5889_s17 + $0x38] sm:$0xff]  ;;  %v354_v12 = vld [vmem:[%s5889_s17 + $0x50] sm:$0xff]  ;;  %v352_v13 = vld [vmem:[%s5889_s17 + $0x40] sm:$0xff] }
  0x14   : > { %4461 = vmatprep.subr.bf16.mxu0 %v4460_v5  ;;  %v4464_v14 = vpack.c.bf16 %v354_v12, %v351_v11  ;;  %v355_v15 = vld [vmem:[%s5889_s17 + $0x58] sm:$0xff]  ;;  %v350_v16 = vld [vmem:[%s5889_s17 + $0x30] sm:$0xff]  ;;  %v353_v17 = vld [vmem:[%s5889_s17 + $0x48] sm:$0xff] }
  0x15   : > { %4654 = vmatpush1.bf16.msra.mxu1 %v4653_v9  ;;  %4463 = vmatpush1.bf16.msra.mxu0 %v4462_v10  ;;  %v4656_v18 = vpack.c.bf16 %v355_v15, %v352_v13  ;;  %v4466_v19 = vpack.c.bf16 %v353_v17, %v350_v16  ;;  %v357_v20 = vld [vmem:[%s5889_s17 + $0x68] sm:$0xff]  ;;  %v360_v21 = vld [vmem:[%s5889_s17 + $0x80] sm:$0xff]  ;;  %v358_v22 = vld [vmem:[%s5889_s17 + $0x70] sm:$0xff] }
  0x16   : > { %4655 = vmatprep.subr.bf16.mxu1 %v5855_v1  ;;  %4465 = vmatprep.subr.bf16.mxu0 %v4464_v14  ;;  %v4468_v23 = vpack.c.bf16 %v360_v21, %v357_v20  ;;  %v361_v24 = vld [vmem:[%s5889_s17 + $0x88] sm:$0xff]  ;;  %v356_v25 = vld [vmem:[%s5889_s17 + $0x60] sm:$0xff]  ;;  %v359_v26 = vld [vmem:[%s5889_s17 + $0x78] sm:$0xff] }
  0x17   : > { %v363_v27 = vld [vmem:[%s5889_s17 + $0x98] sm:$0xff]  ;;  %v366_v28 = vld [vmem:[%s5889_s17 + $0xb0] sm:$0xff]  ;;  %v4659_v29 = vpack.c.bf16 %v361_v24, %v358_v22  ;;  %v4470_v30 = vpack.c.bf16 %v359_v26, %v356_v25  ;;  %v364_v31 = vld [vmem:[%s5889_s17 + $0xa0] sm:$0xff] }
  0x18   : > { %v4472_v32 = vpack.c.bf16 %v366_v28, %v363_v27  ;;  %v367_v33 = vld [vmem:[%s5889_s17 + $0xb8] sm:$0xff]  ;;  %v362_v34 = vld [vmem:[%s5889_s17 + $0x90] sm:$0xff]  ;;  %v365_v35 = vld [vmem:[%s5889_s17 + $0xa8] sm:$0xff] }
  0x19   : > { %4657 = vmatpush1.bf16.msra.mxu1 %v4656_v18  ;;  %4467 = vmatpush1.bf16.msra.mxu0 %v4466_v19  ;;  %v369_v36 = vld [vmem:[%s5889_s17 + $0xc8] sm:$0xff]  ;;  %v372_v37 = vld [vmem:[%s5889_s17 + $0xe0] sm:$0xff]  ;;  %v4662_v38 = vpack.c.bf16 %v367_v33, %v364_v31  ;;  %v4474_v39 = vpack.c.bf16 %v365_v35, %v362_v34  ;;  %v370_v40 = vld [vmem:[%s5889_s17 + $0xd0] sm:$0xff] }
  0x1a   : > { %4658 = vmatprep.subr.bf16.mxu1 %v5855_v1  ;;  %4469 = vmatprep.subr.bf16.mxu0 %v4468_v23  ;;  %v4476_v41 = vpack.c.bf16 %v372_v37, %v369_v36  ;;  %v373_v42 = vld [vmem:[%s5889_s17 + $0xe8] sm:$0xff]  ;;  %v368_v43 = vld [vmem:[%s5889_s17 + $0xc0] sm:$0xff]  ;;  %v371_v44 = vld [vmem:[%s5889_s17 + $0xd8] sm:$0xff] }
  0x1b   : > { %v375_v45 = vld [vmem:[%s5889_s17 + $0xf8] sm:$0xff]  ;;  %v378_v46 = vld [vmem:[%s5889_s17 + $0x110] sm:$0xff]  ;;  %v4665_v47 = vpack.c.bf16 %v373_v42, %v370_v40  ;;  %v4478_v48 = vpack.c.bf16 %v371_v44, %v368_v43  ;;  %v376_v49 = vld [vmem:[%s5889_s17 + $0x100] sm:$0xff] }
  0x1c   : > { %v4480_v50 = vpack.c.bf16 %v378_v46, %v375_v45  ;;  %v379_v51 = vld [vmem:[%s5889_s17 + $0x118] sm:$0xff]  ;;  %v374_v52 = vld [vmem:[%s5889_s17 + $0xf0] sm:$0xff]  ;;  %v377_v53 = vld [vmem:[%s5889_s17 + $0x108] sm:$0xff] }
  0x1d   : > { %4660 = vmatpush1.bf16.msra.mxu1 %v4659_v29  ;;  %4471 = vmatpush1.bf16.msra.mxu0 %v4470_v30  ;;  %v381_v54 = vld [vmem:[%s5889_s17 + $0x128] sm:$0xff]  ;;  %v384_v55 = vld [vmem:[%s5889_s17 + $0x140] sm:$0xff]  ;;  %v4668_v56 = vpack.c.bf16 %v379_v51, %v376_v49  ;;  %v4482_v57 = vpack.c.bf16 %v377_v53, %v374_v52  ;;  %v382_v58 = vld [vmem:[%s5889_s17 + $0x130] sm:$0xff] }
  0x1e   : > { %4661 = vmatprep.subr.bf16.mxu1 %v5855_v1  ;;  %4473 = vmatprep.subr.bf16.mxu0 %v4472_v32  ;;  %v4484_v59 = vpack.c.bf16 %v384_v55, %v381_v54  ;;  %v385_v60 = vld [vmem:[%s5889_s17 + $0x148] sm:$0xff]  ;;  %v380_v61 = vld [vmem:[%s5889_s17 + $0x120] sm:$0xff]  ;;  %v383_v62 = vld [vmem:[%s5889_s17 + $0x138] sm:$0xff] }
  0x1f   : > { %v387_v63 = vld [vmem:[%s5889_s17 + $0x158] sm:$0xff]  ;;  %v390_v0 = vld [vmem:[%s5889_s17 + $0x170] sm:$0xff]  ;;  %v4671_v2 = vpack.c.bf16 %v385_v60, %v382_v58  ;;  %v4486_v3 = vpack.c.bf16 %v383_v62, %v380_v61  ;;  %v388_v4 = vld [vmem:[%s5889_s17 + $0x160] sm:$0xff] }
  0x20   : > { %v4488_v5 = vpack.c.bf16 %v390_v0, %v387_v63  ;;  %v391_v6 = vld [vmem:[%s5889_s17 + $0x178] sm:$0xff]  ;;  %v386_v7 = vld [vmem:[%s5889_s17 + $0x150] sm:$0xff]  ;;  %v389_v8 = vld [vmem:[%s5889_s17 + $0x168] sm:$0xff] }
  0x21   : > { %4663 = vmatpush1.bf16.msra.mxu1 %v4662_v38  ;;  %4475 = vmatpush1.bf16.msra.mxu0 %v4474_v39  ;;  %v393_v9 = vld [vmem:[%s5889_s17 + $0x188] sm:$0xff]  ;;  %v396_v10 = vld [vmem:[%s5889_s17 + $0x1a0] sm:$0xff]  ;;  %v4674_v11 = vpack.c.bf16 %v391_v6, %v388_v4  ;;  %v4490_v12 = vpack.c.bf16 %v389_v8, %v386_v7  ;;  %v394_v13 = vld [vmem:[%s5889_s17 + $0x190] sm:$0xff] }
  0x22   : > { %4664 = vmatprep.subr.bf16.mxu1 %v5855_v1  ;;  %4477 = vmatprep.subr.bf16.mxu0 %v4476_v41  ;;  %v4492_v14 = vpack.c.bf16 %v396_v10, %v393_v9  ;;  %v397_v15 = vld [vmem:[%s5889_s17 + $0x1a8] sm:$0xff]  ;;  %v392_v16 = vld [vmem:[%s5889_s17 + $0x180] sm:$0xff]  ;;  %v395_v17 = vld [vmem:[%s5889_s17 + $0x198] sm:$0xff] }
  0x23   : > { %v399_v18 = vld [vmem:[%s5889_s17 + $0x1b8] sm:$0xff]  ;;  %v402_v19 = vld [vmem:[%s5889_s17 + $0x1d0] sm:$0xff]  ;;  %v4677_v20 = vpack.c.bf16 %v397_v15, %v394_v13  ;;  %v4494_v21 = vpack.c.bf16 %v395_v17, %v392_v16  ;;  %v400_v22 = vld [vmem:[%s5889_s17 + $0x1c0] sm:$0xff] }
  0x24   : > { %v4496_v23 = vpack.c.bf16 %v402_v19, %v399_v18  ;;  %v403_v24 = vld [vmem:[%s5889_s17 + $0x1d8] sm:$0xff]  ;;  %v398_v25 = vld [vmem:[%s5889_s17 + $0x1b0] sm:$0xff]  ;;  %v401_v26 = vld [vmem:[%s5889_s17 + $0x1c8] sm:$0xff] }
  0x25   : > { %4666 = vmatpush1.bf16.msra.mxu1 %v4665_v47  ;;  %4479 = vmatpush1.bf16.msra.mxu0 %v4478_v48  ;;  %v405_v27 = vld [vmem:[%s5889_s17 + $0x1e8] sm:$0xff]  ;;  %v408_v28 = vld [vmem:[%s5889_s17 + $0x200] sm:$0xff]  ;;  %v4680_v29 = vpack.c.bf16 %v403_v24, %v400_v22  ;;  %v4498_v30 = vpack.c.bf16 %v401_v26, %v398_v25  ;;  %v406_v31 = vld [vmem:[%s5889_s17 + $0x1f0] sm:$0xff] }
  0x26   : > { %4667 = vmatprep.subr.bf16.mxu1 %v5855_v1  ;;  %4481 = vmatprep.subr.bf16.mxu0 %v4480_v50  ;;  %v4500_v32 = vpack.c.bf16 %v408_v28, %v405_v27  ;;  %v409_v33 = vld [vmem:[%s5889_s17 + $0x208] sm:$0xff]  ;;  %v404_v34 = vld [vmem:[%s5889_s17 + $0x1e0] sm:$0xff]  ;;  %v407_v35 = vld [vmem:[%s5889_s17 + $0x1f8] sm:$0xff] }
  0x27   : > { %v411_v36 = vld [vmem:[%s5889_s17 + $0x218] sm:$0xff]  ;;  %v414_v37 = vld [vmem:[%s5889_s17 + $0x230] sm:$0xff]  ;;  %v4683_v38 = vpack.c.bf16 %v409_v33, %v406_v31  ;;  %v4502_v39 = vpack.c.bf16 %v407_v35, %v404_v34  ;;  %v412_v40 = vld [vmem:[%s5889_s17 + $0x220] sm:$0xff] }
  0x28   : > { %v4504_v41 = vpack.c.bf16 %v414_v37, %v411_v36  ;;  %v415_v42 = vld [vmem:[%s5889_s17 + $0x238] sm:$0xff]  ;;  %v410_v43 = vld [vmem:[%s5889_s17 + $0x210] sm:$0xff]  ;;  %v413_v44 = vld [vmem:[%s5889_s17 + $0x228] sm:$0xff] }
  0x29   : > { %4669 = vmatpush1.bf16.msra.mxu1 %v4668_v56  ;;  %4483 = vmatpush1.bf16.msra.mxu0 %v4482_v57  ;;  %v417_v45 = vld [vmem:[%s5889_s17 + $0x248] sm:$0xff]  ;;  %v420_v46 = vld [vmem:[%s5889_s17 + $0x260] sm:$0xff]  ;;  %v4686_v47 = vpack.c.bf16 %v415_v42, %v412_v40  ;;  %v4506_v48 = vpack.c.bf16 %v413_v44, %v410_v43  ;;  %v418_v49 = vld [vmem:[%s5889_s17 + $0x250] sm:$0xff] }
  0x2a   : > { %4670 = vmatprep.subr.bf16.mxu1 %v5855_v1  ;;  %4485 = vmatprep.subr.bf16.mxu0 %v4484_v59  ;;  %v4508_v50 = vpack.c.bf16 %v420_v46, %v417_v45  ;;  %v421_v51 = vld [vmem:[%s5889_s17 + $0x268] sm:$0xff]  ;;  %v416_v52 = vld [vmem:[%s5889_s17 + $0x240] sm:$0xff]  ;;  %v419_v53 = vld [vmem:[%s5889_s17 + $0x258] sm:$0xff] }
  0x2b   : > { %v423_v54 = vld [vmem:[%s5889_s17 + $0x278] sm:$0xff]  ;;  %v426_v55 = vld [vmem:[%s5889_s17 + $0x290] sm:$0xff]  ;;  %v4689_v56 = vpack.c.bf16 %v421_v51, %v418_v49  ;;  %v4510_v57 = vpack.c.bf16 %v419_v53, %v416_v52  ;;  %v424_v58 = vld [vmem:[%s5889_s17 + $0x280] sm:$0xff] }
  0x2c   : > { %v4512_v59 = vpack.c.bf16 %v426_v55, %v423_v54  ;;  %v427_v60 = vld [vmem:[%s5889_s17 + $0x298] sm:$0xff]  ;;  %v422_v61 = vld [vmem:[%s5889_s17 + $0x270] sm:$0xff]  ;;  %v425_v62 = vld [vmem:[%s5889_s17 + $0x288] sm:$0xff] }
  0x2d   : > { %4672 = vmatpush1.bf16.msra.mxu1 %v4671_v2  ;;  %4487 = vmatpush1.bf16.msra.mxu0 %v4486_v3  ;;  %v429_v63 = vld [vmem:[%s5889_s17 + $0x2a8] sm:$0xff]  ;;  %v432_v0 = vld [vmem:[%s5889_s17 + $0x2c0] sm:$0xff]  ;;  %v4692_v2 = vpack.c.bf16 %v427_v60, %v424_v58  ;;  %v4514_v3 = vpack.c.bf16 %v425_v62, %v422_v61  ;;  %v430_v4 = vld [vmem:[%s5889_s17 + $0x2b0] sm:$0xff] }
  0x2e   : > { %4673 = vmatprep.subr.bf16.mxu1 %v5855_v1  ;;  %4489 = vmatprep.subr.bf16.mxu0 %v4488_v5  ;;  %v4516_v5 = vpack.c.bf16 %v432_v0, %v429_v63  ;;  %v433_v6 = vld [vmem:[%s5889_s17 + $0x2c8] sm:$0xff]  ;;  %v428_v7 = vld [vmem:[%s5889_s17 + $0x2a0] sm:$0xff]  ;;  %v431_v8 = vld [vmem:[%s5889_s17 + $0x2b8] sm:$0xff] }
  0x2f   : > { %v435_v9 = vld [vmem:[%s5889_s17 + $0x2d8] sm:$0xff]  ;;  %v438_v10 = vld [vmem:[%s5889_s17 + $0x2f0] sm:$0xff]  ;;  %v436_v13 = vld [vmem:[%s5889_s17 + $0x2e0] sm:$0xff] }
  0x30   : > { %v439_v15 = vld [vmem:[%s5889_s17 + $0x2f8] sm:$0xff]  ;;  %v434_v16 = vld [vmem:[%s5889_s17 + $0x2d0] sm:$0xff]  ;;  %v437_v17 = vld [vmem:[%s5889_s17 + $0x2e8] sm:$0xff] }
  0x31   : > { %4675 = vmatpush1.bf16.msra.mxu1 %v4674_v11  ;;  %4491 = vmatpush1.bf16.msra.mxu0 %v4490_v12  ;;  %v4695_v11 = vpack.c.bf16 %v433_v6, %v430_v4  ;;  %v4518_v12 = vpack.c.bf16 %v431_v8, %v428_v7  ;;  %v441_v18 = vld [vmem:[%s5889_s17 + $0x308] sm:$0xff]  ;;  %v444_v19 = vld [vmem:[%s5889_s17 + $0x320] sm:$0xff]  ;;  %v443_v24 = vld [vmem:[%s5889_s17 + $0x318] sm:$0xff] }
  0x32   : > { %4676 = vmatprep.subr.bf16.mxu1 %v5855_v1  ;;  %4493 = vmatprep.subr.bf16.mxu0 %v4492_v14  ;;  %v4520_v14 = vpack.c.bf16 %v438_v10, %v435_v9  ;;  %v4524_v22 = vpack.c.bf16 %v444_v19, %v441_v18  ;;  %v442_v25 = vld [vmem:[%s5889_s17 + $0x310] sm:$0xff]  ;;  %v445_v26 = vld [vmem:[%s5889_s17 + $0x328] sm:$0xff]  ;;  %v447_v27 = vld [vmem:[%s5889_s17 + $0x338] sm:$0xff] }
  0x33   : > { %v450_v28 = vld [vmem:[%s5889_s17 + $0x350] sm:$0xff]  ;;  %v159_v31 = vld [vmem:[%s7977_s1 + $0x38] sm:$0xff]  ;;  %v449_v35 = vld [vmem:[%s5889_s17 + $0x348] sm:$0xff] }
  0x34   : > { %v446_v33 = vld [vmem:[%s5889_s17 + $0x330] sm:$0xff]  ;;  %v4528_v34 = vpack.c.bf16 %v450_v28, %v447_v27  ;;  %v448_v36 = vld [vmem:[%s5889_s17 + $0x340] sm:$0xff]  ;;  %v451_v37 = vld [vmem:[%s5889_s17 + $0x358] sm:$0xff] }
  0x35   : > { %4678 = vmatpush1.bf16.msra.mxu1 %v4677_v20  ;;  %4495 = vmatpush1.bf16.msra.mxu0 %v4494_v21  ;;  %v4698_v20 = vpack.c.bf16 %v439_v15, %v436_v13  ;;  %v4522_v21 = vpack.c.bf16 %v437_v17, %v434_v16  ;;  %v158_v40 = vld [vmem:[%s7977_s1 + $0x30] sm:$0xff]  ;;  %v4530_v42 = vpack.c.bf16 %v449_v35, %v446_v33  ;;  %v452_v44 = vld [vmem:[%s5889_s17 + $0x360] sm:$0xff]  ;;  %v455_v46 = vld [vmem:[%s5889_s17 + $0x378] sm:$0xff] }
  0x36   : > { %4679 = vmatprep.subr.bf16.mxu1 %v5855_v1  ;;  %4497 = vmatprep.subr.bf16.mxu0 %v4496_v23  ;;  %v440_v23 = vld [vmem:[%s5889_s17 + $0x300] sm:$0xff]  ;;  %v4704_v43 = vpack.c.bf16 %v451_v37, %v448_v36  ;;  %v459_v49 = vld [vmem:[%s5889_s17 + $0x398] sm:$0xff]  ;;  %v4534_v53 = vpack.c.bf16 %v455_v46, %v452_v44  ;;  %v458_v55 = vld [vmem:[%s5889_s17 + $0x390] sm:$0xff] }
  0x37   : > { %v164_v51 = vld [vmem:[%s7977_s1 + $0x60] sm:$0xff]  ;;  %v171_v52 = vld [vmem:[%s7977_s1 + $0x98] sm:$0xff]  ;;  %v465_v60 = vld [vmem:[%s5889_s17 + $0x3c8] sm:$0xff] }
  0x38   : > { %v460_v58 = vld [vmem:[%s5889_s17 + $0x3a0] sm:$0xff]  ;;  %v170_v62 = vld [vmem:[%s7977_s1 + $0x90] sm:$0xff]  ;;  %v177_v63 = vld [vmem:[%s7977_s1 + $0xc8] sm:$0xff] }
  0x39   : > { %4681 = vmatpush1.bf16.msra.mxu1 %v4680_v29  ;;  %4499 = vmatpush1.bf16.msra.mxu0 %v4498_v30  ;;  %v152_v29 = vld [vmem:[%s7977_s1] sm:$0xff]  ;;  %v4526_v30 = vpack.c.bf16 %v443_v24, %v440_v23  ;;  %v466_v6 = vld [vmem:[%s5889_s17 + $0x3d0] sm:$0xff]  ;;  %v469_v7 = vld [vmem:[%s5889_s17 + $0x3e8] sm:$0xff] }
  0x3a   : > { %4682 = vmatprep.subr.bf16.mxu1 %v5855_v1  ;;  %4501 = vmatprep.subr.bf16.mxu0 %v4500_v32  ;;  %v4701_v32 = vpack.c.bf16 %v445_v26, %v442_v25  ;;  %v468_v61 = vld [vmem:[%s5889_s17 + $0x3e0] sm:$0xff]  ;;  %v471_v8 = vld [vmem:[%s5889_s17 + $0x3f8] sm:$0xff]  ;;  %v474_v9 = vld [vmem:[%s5889_s17 + $0x410] sm:$0xff]  ;;  %v4713_v13 = vpack.c.bf16 %v469_v7, %v466_v6 }
  0x3b   : > { %v4540_v4 = vpack.c.bf16 %v468_v61, %v465_v60  ;;  %v176_v10 = vld [vmem:[%s7977_s1 + $0xc0] sm:$0xff]  ;;  %v4544_v15 = vpack.c.bf16 %v474_v9, %v471_v8  ;;  %v473_v16 = vld [vmem:[%s5889_s17 + $0x408] sm:$0xff]  ;;  %v475_v18 = vld [vmem:[%s5889_s17 + $0x418] sm:$0xff] }
  0x3c   : > { %v472_v17 = vld [vmem:[%s5889_s17 + $0x400] sm:$0xff]  ;;  %v477_v19 = vld [vmem:[%s5889_s17 + $0x428] sm:$0xff]  ;;  %v479_v27 = vld [vmem:[%s5889_s17 + $0x438] sm:$0xff] }
  0x3d   : > { %4684 = vmatpush1.bf16.msra.mxu1 %v4683_v38  ;;  %4503 = vmatpush1.bf16.msra.mxu0 %v4502_v39  ;;  %v453_v38 = vld [vmem:[%s5889_s17 + $0x368] sm:$0xff]  ;;  %v456_v39 = vld [vmem:[%s5889_s17 + $0x380] sm:$0xff]  ;;  %v4716_v24 = vpack.c.bf16 %v475_v18, %v472_v17  ;;  %v478_v28 = vld [vmem:[%s5889_s17 + $0x430] sm:$0xff] }
  0x3e   : > { %4685 = vmatprep.subr.bf16.mxu1 %v5855_v1  ;;  %4505 = vmatprep.subr.bf16.mxu0 %v4504_v41  ;;  %v165_v41 = vld [vmem:[%s7977_s1 + $0x68] sm:$0xff]  ;;  %v4532_v45 = vpack.c.bf16 %v456_v39, %v453_v38  ;;  %v476_v25 = vld [vmem:[%s5889_s17 + $0x420] sm:$0xff]  ;;  %v195_v33 = vld [vmem:[%s7977_s1 + $0x158] sm:$0xff] }
  0x3f   : > { %v482_v36 = vld [vmem:[%s5889_s17 + $0x450] sm:$0xff]  ;;  %v485_v38 = vld [vmem:[%s5889_s17 + $0x468] sm:$0xff]  ;;  %v484_v39 = vld [vmem:[%s5889_s17 + $0x460] sm:$0xff] }
  0x40   : > { %v201_v44 = vld [vmem:[%s7977_s1 + $0x188] sm:$0xff]  ;;  %v496_v61 = vld [vmem:[%s5889_s17 + $0x4c0] sm:$0xff]  ;;  %v503_v8 = vld [vmem:[%s5889_s17 + $0x4f8] sm:$0xff] }
  0x41   : > { %4687 = vmatpush1.bf16.msra.mxu1 %v4686_v47  ;;  %4507 = vmatpush1.bf16.msra.mxu0 %v4506_v48  ;;  %v454_v47 = vld [vmem:[%s5889_s17 + $0x370] sm:$0xff]  ;;  %v457_v48 = vld [vmem:[%s5889_s17 + $0x388] sm:$0xff]  ;;  %v500_v6 = vld [vmem:[%s5889_s17 + $0x4e0] sm:$0xff] }
  0x42   : > { %4688 = vmatprep.subr.bf16.mxu1 %v5855_v1  ;;  %4509 = vmatprep.subr.bf16.mxu0 %v4508_v50  ;;  %v462_v50 = vld [vmem:[%s5889_s17 + $0x3b0] sm:$0xff]  ;;  %v4707_v54 = vpack.c.bf16 %v457_v48, %v454_v47  ;;  %v488_v47 = vld [vmem:[%s5889_s17 + $0x480] sm:$0xff]  ;;  %v497_v60 = vld [vmem:[%s5889_s17 + $0x4c8] sm:$0xff] }
  0x43   : > { %v502_v9 = vld [vmem:[%s5889_s17 + $0x4f0] sm:$0xff] }
  0x44   : > { %v506_v17 = vld [vmem:[%s5889_s17 + $0x510] sm:$0xff] }
  0x45   : > { %4690 = vmatpush1.bf16.msra.mxu1 %v4689_v56  ;;  %4511 = vmatpush1.bf16.msra.mxu0 %v4510_v57  ;;  %v4536_v56 = vpack.c.bf16 %v462_v50, %v459_v49  ;;  %v461_v57 = vld [vmem:[%s5889_s17 + $0x3a8] sm:$0xff]  ;;  %v491_v49 = vld [vmem:[%s5889_s17 + $0x498] sm:$0xff]  ;;  %v490_v50 = vld [vmem:[%s5889_s17 + $0x490] sm:$0xff] }
  0x46   : > { %4691 = vmatprep.subr.bf16.mxu1 %v5855_v1  ;;  %4513 = vmatprep.subr.bf16.mxu0 %v4512_v59  ;;  %v463_v59 = vld [vmem:[%s5889_s17 + $0x3b8] sm:$0xff]  ;;  %v4538_v0 = vpack.c.bf16 %v461_v57, %v458_v55 }
  0x47   : > { %v207_v55 = vld [vmem:[%s7977_s1 + $0x1b8] sm:$0xff] }
  0x49   : > { %4693 = vmatpush1.bf16.msra.mxu1 %v4692_v2  ;;  %4515 = vmatpush1.bf16.msra.mxu0 %v4514_v3  ;;  %v4710_v2 = vpack.c.bf16 %v463_v59, %v460_v58  ;;  %v464_v3 = vld [vmem:[%s5889_s17 + $0x3c0] sm:$0xff]  ;;  %v494_v58 = vld [vmem:[%s5889_s17 + $0x4b0] sm:$0xff] }
  0x4a   : > { %4694 = vmatprep.subr.bf16.mxu1 %v5855_v1  ;;  %4517 = vmatprep.subr.bf16.mxu0 %v4516_v5  ;;  %v467_v5 = vld [vmem:[%s5889_s17 + $0x3d8] sm:$0xff] }
  0x4d   : > { %4696 = vmatpush1.bf16.msra.mxu1 %v4695_v11  ;;  %4519 = vmatpush1.bf16.msra.mxu0 %v4518_v12  ;;  %v183_v11 = vld [vmem:[%s7977_s1 + $0xf8] sm:$0xff]  ;;  %v4542_v12 = vpack.c.bf16 %v467_v5, %v464_v3  ;;  %v213_v3 = vld [vmem:[%s7977_s1 + $0x1e8] sm:$0xff] }
  0x4e   : > { %4697 = vmatprep.subr.bf16.mxu1 %v5855_v1  ;;  %4521 = vmatprep.subr.bf16.mxu0 %v4520_v14  ;;  %v470_v14 = vld [vmem:[%s5889_s17 + $0x3f0] sm:$0xff] }
  0x4f   : > { %v4546_v23 = vpack.c.bf16 %v473_v16, %v470_v14  ;;  %v219_v14 = vld [vmem:[%s7977_s1 + $0x218] sm:$0xff] }
  0x51   : > { %4699 = vmatpush1.bf16.msra.mxu1 %v4698_v20  ;;  %4523 = vmatpush1.bf16.msra.mxu0 %v4522_v21  ;;  %v480_v20 = vld [vmem:[%s5889_s17 + $0x440] sm:$0xff]  ;;  %v182_v21 = vld [vmem:[%s7977_s1 + $0xf0] sm:$0xff] }
  0x52   : > { %4525 = vmatprep.subr.bf16.mxu0 %v4524_v22  ;;  %4700 = vmatprep.subr.bf16.mxu1 %v5855_v1  ;;  %v189_v22 = vld [vmem:[%s7977_s1 + $0x128] sm:$0xff]  ;;  %v4548_v26 = vpack.c.bf16 %v480_v20, %v477_v19  ;;  %v508_v20 = vld [vmem:[%s5889_s17 + $0x520] sm:$0xff] }
  0x53   : > { %v509_v19 = vld [vmem:[%s5889_s17 + $0x528] sm:$0xff] }
  0x54   : > { %1468 = vmatmul.mubr.f32.vlgmr.msra.gmra.mrb[0].mxu1 %v152_v29  ;;  %697 = vmatmul.mubr.f32.vlgmr.msra.gmra.mrb[0].mxu0 %v152_v29  ;;  %v481_v29 = vld [vmem:[%s5889_s17 + $0x448] sm:$0xff] }
  0x55   : > { %4527 = vmatpush1.bf16.msra.mxu0 %v4526_v30  ;;  %1472 = vmatprep.mubr.f32.mxu1 %v159_v31  ;;  %v483_v30 = vld [vmem:[%s5889_s17 + $0x458] sm:$0xff]  ;;  %v4719_v35 = vpack.c.bf16 %v481_v29, %v478_v28  ;;  %v512_v28 = vld [vmem:[%s5889_s17 + $0x540] sm:$0xff] }
  0x56   : > { %4702 = vmatpush1.bf16.msra.mxu1 %v4701_v32  ;;  %702 = vmatprep.mubr.f32.mxu0 %v159_v31  ;;  %v486_v31 = vld [vmem:[%s5889_s17 + $0x470] sm:$0xff]  ;;  %v188_v32 = vld [vmem:[%s7977_s1 + $0x120] sm:$0xff] }
  0x57   : > { %4529 = vmatprep.subr.bf16.mxu0 %v4528_v34  ;;  %4703 = vmatprep.subr.bf16.mxu1 %v5855_v1  ;;  %v4550_v34 = vpack.c.bf16 %v479_v27, %v476_v25  ;;  %v4552_v37 = vpack.c.bf16 %v486_v31, %v483_v30  ;;  %v225_v25 = vld [vmem:[%s7977_s1 + $0x248] sm:$0xff]  ;;  %v515_v30 = vld [vmem:[%s5889_s17 + $0x558] sm:$0xff]  ;;  %v514_v31 = vld [vmem:[%s5889_s17 + $0x550] sm:$0xff] }
  0x58   : > { %1473 = vmatmul.mubr.f32.gmra.mrb[2].mxu1 %v158_v40  ;;  %703 = vmatmul.mubr.f32.gmra.mrb[2].mxu0 %v158_v40  ;;  %v487_v40 = vld [vmem:[%s5889_s17 + $0x478] sm:$0xff] }
  0x59   : > { %1477 = vmatprep.mubr.f32.mxu1 %v165_v41  ;;  %708 = vmatprep.mubr.f32.mxu0 %v165_v41  ;;  %v489_v41 = vld [vmem:[%s5889_s17 + $0x488] sm:$0xff]  ;;  %v4722_v46 = vpack.c.bf16 %v487_v40, %v484_v39  ;;  %v518_v39 = vld [vmem:[%s5889_s17 + $0x570] sm:$0xff] }
  0x5a   : > { %4531 = vmatpush1.bf16.msra.mxu0 %v4530_v42  ;;  %4705 = vmatpush1.bf16.msra.mxu1 %v4704_v43  ;;  %v492_v42 = vld [vmem:[%s5889_s17 + $0x4a0] sm:$0xff]  ;;  %v194_v43 = vld [vmem:[%s7977_s1 + $0x150] sm:$0xff] }
  0x5b   : > { %4533 = vmatprep.subr.bf16.mxu0 %v4532_v45  ;;  %4706 = vmatprep.subr.bf16.mxu1 %v5855_v1  ;;  %v4554_v45 = vpack.c.bf16 %v485_v38, %v482_v36  ;;  %v4556_v48 = vpack.c.bf16 %v492_v42, %v489_v41  ;;  %v231_v36 = vld [vmem:[%s7977_s1 + $0x278] sm:$0xff]  ;;  %v521_v41 = vld [vmem:[%s5889_s17 + $0x588] sm:$0xff]  ;;  %v520_v42 = vld [vmem:[%s5889_s17 + $0x580] sm:$0xff] }
  0x5c   : > { %1478 = vmatmul.mubr.f32.gmra.mrb[4].mxu1 %v164_v51  ;;  %709 = vmatmul.mubr.f32.gmra.mrb[4].mxu0 %v164_v51  ;;  %v493_v51 = vld [vmem:[%s5889_s17 + $0x4a8] sm:$0xff] }
  0x5d   : > { %1482 = vmatprep.mubr.f32.mxu1 %v171_v52  ;;  %714 = vmatprep.mubr.f32.mxu0 %v171_v52  ;;  %v495_v52 = vld [vmem:[%s5889_s17 + $0x4b8] sm:$0xff]  ;;  %v4725_v57 = vpack.c.bf16 %v493_v51, %v490_v50  ;;  %v524_v50 = vld [vmem:[%s5889_s17 + $0x5a0] sm:$0xff] }
  0x5e   : > { %4535 = vmatpush1.bf16.msra.mxu0 %v4534_v53  ;;  %4708 = vmatpush1.bf16.msra.mxu1 %v4707_v54  ;;  %v498_v53 = vld [vmem:[%s5889_s17 + $0x4d0] sm:$0xff]  ;;  %v200_v54 = vld [vmem:[%s7977_s1 + $0x180] sm:$0xff] }
  0x5f   : > { %4537 = vmatprep.subr.bf16.mxu0 %v4536_v56  ;;  %4709 = vmatprep.subr.bf16.mxu1 %v5855_v1  ;;  %v4558_v56 = vpack.c.bf16 %v491_v49, %v488_v47  ;;  %v4560_v59 = vpack.c.bf16 %v498_v53, %v495_v52  ;;  %v237_v47 = vld [vmem:[%s7977_s1 + $0x2a8] sm:$0xff]  ;;  %v527_v52 = vld [vmem:[%s5889_s17 + $0x5b8] sm:$0xff]  ;;  %v526_v53 = vld [vmem:[%s5889_s17 + $0x5b0] sm:$0xff] }
  0x60   : > { %1483 = vmatmul.mubr.f32.gmra.mrb[6].mxu1 %v170_v62  ;;  %715 = vmatmul.mubr.f32.gmra.mrb[6].mxu0 %v170_v62  ;;  %v499_v62 = vld [vmem:[%s5889_s17 + $0x4d8] sm:$0xff] }
  0x61   : > { %1487 = vmatprep.mubr.f32.mxu1 %v177_v63  ;;  %720 = vmatprep.mubr.f32.mxu0 %v177_v63  ;;  %v501_v63 = vld [vmem:[%s5889_s17 + $0x4e8] sm:$0xff]  ;;  %v4728_v5 = vpack.c.bf16 %v499_v62, %v496_v61  ;;  %v530_v61 = vld [vmem:[%s5889_s17 + $0x5d0] sm:$0xff] }
  0x62   : > { %4539 = vmatpush1.bf16.msra.mxu0 %v4538_v0  ;;  %4711 = vmatpush1.bf16.msra.mxu1 %v4710_v2  ;;  %v504_v0 = vld [vmem:[%s5889_s17 + $0x500] sm:$0xff]  ;;  %v206_v2 = vld [vmem:[%s7977_s1 + $0x1b0] sm:$0xff] }
  0x63   : > { %4541 = vmatprep.subr.bf16.mxu0 %v4540_v4  ;;  %4712 = vmatprep.subr.bf16.mxu1 %v5855_v1  ;;  %v4562_v4 = vpack.c.bf16 %v497_v60, %v494_v58  ;;  %v4564_v7 = vpack.c.bf16 %v504_v0, %v501_v63  ;;  %v243_v58 = vld [vmem:[%s7977_s1 + $0x2d8] sm:$0xff]  ;;  %v533_v63 = vld [vmem:[%s5889_s17 + $0x5e8] sm:$0xff]  ;;  %v532_v0 = vld [vmem:[%s5889_s17 + $0x5e0] sm:$0xff] }
  0x64   : > { %1488 = vmatmul.mubr.f32.gmra.mrb[8].mxu1 %v176_v10  ;;  %721 = vmatmul.mubr.f32.gmra.mrb[8].mxu0 %v176_v10  ;;  %v505_v10 = vld [vmem:[%s5889_s17 + $0x508] sm:$0xff] }
  0x65   : > { %1492 = vmatprep.mubr.f32.mxu1 %v183_v11  ;;  %726 = vmatprep.mubr.f32.mxu0 %v183_v11  ;;  %v507_v11 = vld [vmem:[%s5889_s17 + $0x518] sm:$0xff]  ;;  %v4731_v16 = vpack.c.bf16 %v505_v10, %v502_v9  ;;  %v248_v10 = vld [vmem:[%s7977_s1 + $0x300] sm:$0xff] }
  0x66   : > { %4543 = vmatpush1.bf16.msra.mxu0 %v4542_v12  ;;  %4714 = vmatpush1.bf16.msra.mxu1 %v4713_v13  ;;  %v510_v12 = vld [vmem:[%s5889_s17 + $0x530] sm:$0xff]  ;;  %v212_v13 = vld [vmem:[%s7977_s1 + $0x1e0] sm:$0xff] }
  0x67   : > { %4545 = vmatprep.subr.bf16.mxu0 %v4544_v15  ;;  %4715 = vmatprep.subr.bf16.mxu1 %v5855_v1  ;;  %v4566_v15 = vpack.c.bf16 %v503_v8, %v500_v6  ;;  %v4568_v18 = vpack.c.bf16 %v510_v12, %v507_v11  ;;  %v249_v6 = vld [vmem:[%s7977_s1 + $0x308] sm:$0xff]  ;;  %v255_v11 = vld [vmem:[%s7977_s1 + $0x338] sm:$0xff]  ;;  %v254_v12 = vld [vmem:[%s7977_s1 + $0x330] sm:$0xff] }
  0x68   : > { %1493 = vmatmul.mubr.f32.gmra.mrb[10].mxu1 %v182_v21  ;;  %727 = vmatmul.mubr.f32.gmra.mrb[10].mxu0 %v182_v21  ;;  %v511_v21 = vld [vmem:[%s5889_s17 + $0x538] sm:$0xff] }
  0x69   : > { %1497 = vmatprep.mubr.f32.mxu1 %v189_v22  ;;  %732 = vmatprep.mubr.f32.mxu0 %v189_v22  ;;  %v513_v22 = vld [vmem:[%s5889_s17 + $0x548] sm:$0xff]  ;;  %v4734_v27 = vpack.c.bf16 %v511_v21, %v508_v20  ;;  %v278_v20 = vld [vmem:[%s7977_s1 + $0x3f0] sm:$0xff] }
  0x6a   : > { %4547 = vmatpush1.bf16.msra.mxu0 %v4546_v23  ;;  %4717 = vmatpush1.bf16.msra.mxu1 %v4716_v24  ;;  %v516_v23 = vld [vmem:[%s5889_s17 + $0x560] sm:$0xff]  ;;  %v218_v24 = vld [vmem:[%s7977_s1 + $0x210] sm:$0xff]  ;;  %v285_v21 = vld [vmem:[%s7977_s1 + $0x428] sm:$0xff] }
  0x6b   : > { %4549 = vmatprep.subr.bf16.mxu0 %v4548_v26  ;;  %4718 = vmatprep.subr.bf16.mxu1 %v5855_v1  ;;  %v4570_v26 = vpack.c.bf16 %v509_v19, %v506_v17  ;;  %v4572_v29 = vpack.c.bf16 %v516_v23, %v513_v22  ;;  %v273_v17 = vld [vmem:[%s7977_s1 + $0x3c8] sm:$0xff]  ;;  %v279_v19 = vld [vmem:[%s7977_s1 + $0x3f8] sm:$0xff]  ;;  %v284_v22 = vld [vmem:[%s7977_s1 + $0x420] sm:$0xff] }
  0x6c   : > { %1498 = vmatmul.mubr.f32.gmra.mrb[12].mxu1 %v188_v32  ;;  %733 = vmatmul.mubr.f32.gmra.mrb[12].mxu0 %v188_v32  ;;  %v517_v32 = vld [vmem:[%s5889_s17 + $0x568] sm:$0xff]  ;;  %v291_v23 = vld [vmem:[%s7977_s1 + $0x458] sm:$0xff] }
  0x6d   : > { %1502 = vmatprep.mubr.f32.mxu1 %v195_v33  ;;  %738 = vmatprep.mubr.f32.mxu0 %v195_v33  ;;  %v519_v33 = vld [vmem:[%s5889_s17 + $0x578] sm:$0xff]  ;;  %v4737_v38 = vpack.c.bf16 %v517_v32, %v514_v31  ;;  %v314_v32 = vld [vmem:[%s7977_s1 + $0x510] sm:$0xff] }
  0x6e   : > { %4551 = vmatpush1.bf16.msra.mxu0 %v4550_v34  ;;  %4720 = vmatpush1.bf16.msra.mxu1 %v4719_v35  ;;  %v522_v34 = vld [vmem:[%s5889_s17 + $0x590] sm:$0xff]  ;;  %v224_v35 = vld [vmem:[%s7977_s1 + $0x240] sm:$0xff]  ;;  %v315_v31 = vld [vmem:[%s7977_s1 + $0x518] sm:$0xff] }
  0x6f   : > { %4553 = vmatprep.subr.bf16.mxu0 %v4552_v37  ;;  %4721 = vmatprep.subr.bf16.mxu1 %v5855_v1  ;;  %v4574_v37 = vpack.c.bf16 %v515_v30, %v512_v28  ;;  %v4576_v40 = vpack.c.bf16 %v522_v34, %v519_v33  ;;  %v302_v28 = vld [vmem:[%s7977_s1 + $0x4b0] sm:$0xff]  ;;  %v308_v30 = vld [vmem:[%s7977_s1 + $0x4e0] sm:$0xff]  ;;  %v321_v33 = vld [vmem:[%s7977_s1 + $0x548] sm:$0xff] }
  0x70   : > { %1503 = vmatmul.mubr.f32.gmra.mrb[14].mxu1 %v194_v43  ;;  %739 = vmatmul.mubr.f32.gmra.mrb[14].mxu0 %v194_v43  ;;  %v523_v43 = vld [vmem:[%s5889_s17 + $0x598] sm:$0xff]  ;;  %v320_v34 = vld [vmem:[%s7977_s1 + $0x540] sm:$0xff] }
  0x71   : > { %1507 = vmatprep.mubr.f32.mxu1 %v201_v44  ;;  %744 = vmatprep.mubr.f32.mxu0 %v201_v44  ;;  %v525_v44 = vld [vmem:[%s5889_s17 + $0x5a8] sm:$0xff]  ;;  %v4740_v49 = vpack.c.bf16 %v523_v43, %v520_v42  ;;  %v536_v42 = vld [vmem:[%s5889_s17 + $0x600] sm:$0xff]  ;;  %v539_v43 = vld [vmem:[%s5889_s17 + $0x618] sm:$0xff] }
  0x72   : > { %4555 = vmatpush1.bf16.msra.mxu0 %v4554_v45  ;;  %4723 = vmatpush1.bf16.msra.mxu1 %v4722_v46  ;;  %v528_v45 = vld [vmem:[%s5889_s17 + $0x5c0] sm:$0xff]  ;;  %v230_v46 = vld [vmem:[%s7977_s1 + $0x270] sm:$0xff] }
  0x73   : > { %4557 = vmatprep.subr.bf16.mxu0 %v4556_v48  ;;  %4724 = vmatprep.subr.bf16.mxu1 %v5855_v1  ;;  %v4578_v48 = vpack.c.bf16 %v521_v41, %v518_v39  ;;  %v4580_v51 = vpack.c.bf16 %v528_v45, %v525_v44  ;;  %v339_v39 = vld [vmem:[%s7977_s1 + $0x5d8] sm:$0xff]  ;;  %v538_v44 = vld [vmem:[%s5889_s17 + $0x610] sm:$0xff]  ;;  %v541_v45 = vld [vmem:[%s5889_s17 + $0x628] sm:$0xff] }
  0x74   : > { %1508 = vmatmul.mubr.f32.gmra.mrb[16].mxu1 %v200_v54  ;;  %745 = vmatmul.mubr.f32.gmra.mrb[16].mxu0 %v200_v54  ;;  %v529_v54 = vld [vmem:[%s5889_s17 + $0x5c8] sm:$0xff]  ;;  %v155_v41 = vld [vmem:[%s7977_s1 + $0x18] sm:$0xff] }
  0x75   : > { %1512 = vmatprep.mubr.f32.mxu1 %v207_v55  ;;  %750 = vmatprep.mubr.f32.mxu0 %v207_v55  ;;  %v531_v55 = vld [vmem:[%s5889_s17 + $0x5d8] sm:$0xff]  ;;  %v4743_v60 = vpack.c.bf16 %v529_v54, %v526_v53  ;;  %v545_v54 = vld [vmem:[%s5889_s17 + $0x648] sm:$0xff] }
  0x76   : > { %4559 = vmatpush1.bf16.msra.mxu0 %v4558_v56  ;;  %4726 = vmatpush1.bf16.msra.mxu1 %v4725_v57  ;;  %v534_v56 = vld [vmem:[%s5889_s17 + $0x5f0] sm:$0xff]  ;;  %v236_v57 = vld [vmem:[%s7977_s1 + $0x2a0] sm:$0xff] }
  0x77   : > { %4561 = vmatprep.subr.bf16.mxu0 %v4560_v59  ;;  %4727 = vmatprep.subr.bf16.mxu1 %v5855_v1  ;;  %v4582_v59 = vpack.c.bf16 %v527_v52, %v524_v50  ;;  %v4584_v62 = vpack.c.bf16 %v534_v56, %v531_v55  ;;  %v161_v50 = vld [vmem:[%s7977_s1 + $0x48] sm:$0xff]  ;;  %v542_v52 = vld [vmem:[%s5889_s17 + $0x630] sm:$0xff]  ;;  %v544_v55 = vld [vmem:[%s5889_s17 + $0x640] sm:$0xff] }
  0x78   : > { %1513 = vmatmul.mubr.f32.gmra.mrb[18].mxu1 %v206_v2  ;;  %751 = vmatmul.mubr.f32.gmra.mrb[18].mxu0 %v206_v2  ;;  %v535_v2 = vld [vmem:[%s5889_s17 + $0x5f8] sm:$0xff] }
  0x79   : > { %1517 = vmatprep.mubr.f32.mxu1 %v213_v3  ;;  %756 = vmatprep.mubr.f32.mxu0 %v213_v3  ;;  %v537_v3 = vld [vmem:[%s5889_s17 + $0x608] sm:$0xff]  ;;  %v4746_v8 = vpack.c.bf16 %v535_v2, %v532_v0  ;;  %v547_v56 = vld [vmem:[%s5889_s17 + $0x658] sm:$0xff] }
  0x7a   : > { %4563 = vmatpush1.bf16.msra.mxu0 %v4562_v4  ;;  %4729 = vmatpush1.bf16.msra.mxu1 %v4728_v5  ;;  %v540_v4 = vld [vmem:[%s5889_s17 + $0x620] sm:$0xff]  ;;  %v242_v5 = vld [vmem:[%s7977_s1 + $0x2d0] sm:$0xff]  ;;  %v551_v2 = vld [vmem:[%s5889_s17 + $0x678] sm:$0xff] }
  0x7b   : > { %4565 = vmatprep.subr.bf16.mxu0 %v4564_v7  ;;  %4730 = vmatprep.subr.bf16.mxu1 %v5855_v1  ;;  %v4586_v7 = vpack.c.bf16 %v533_v63, %v530_v61  ;;  %v4588_v9 = vpack.c.bf16 %v540_v4, %v537_v3  ;;  %v4594_v61 = vpack.c.bf16 %v545_v54, %v542_v52  ;;  %v548_v63 = vld [vmem:[%s5889_s17 + $0x660] sm:$0xff]  ;;  %v550_v3 = vld [vmem:[%s5889_s17 + $0x670] sm:$0xff]  ;;  %v553_v4 = vld [vmem:[%s5889_s17 + $0x688] sm:$0xff] }
  0x7c   : > { %1518 = vmatmul.mubr.f32.gmra.mrb[20].mxu1 %v212_v13  ;;  %757 = vmatmul.mubr.f32.gmra.mrb[20].mxu0 %v212_v13  ;;  %v261_v13 = vld [vmem:[%s7977_s1 + $0x368] sm:$0xff] }
  0x7d   : > { %1522 = vmatprep.mubr.f32.mxu1 %v219_v14  ;;  %762 = vmatprep.mubr.f32.mxu0 %v219_v14  ;;  %v260_v14 = vld [vmem:[%s7977_s1 + $0x360] sm:$0xff]  ;;  %v197_v52 = vld [vmem:[%s7977_s1 + $0x168] sm:$0xff] }
  0x7e   : > { %4567 = vmatpush1.bf16.msra.mxu0 %v4566_v15  ;;  %4732 = vmatpush1.bf16.msra.mxu1 %v4731_v16  ;;  %v267_v15 = vld [vmem:[%s7977_s1 + $0x398] sm:$0xff]  ;;  %v266_v16 = vld [vmem:[%s7977_s1 + $0x390] sm:$0xff] }
  0x7f   : > { %4569 = vmatprep.subr.bf16.mxu0 %v4568_v18  ;;  %4733 = vmatprep.subr.bf16.mxu1 %v5855_v1  ;;  %v272_v18 = vld [vmem:[%s7977_s1 + $0x3c0] sm:$0xff] }
  0x80   : > { %1523 = vmatmul.mubr.f32.gmra.mrb[22].mxu1 %v218_v24  ;;  %763 = vmatmul.mubr.f32.gmra.mrb[22].mxu0 %v218_v24  ;;  %v290_v24 = vld [vmem:[%s7977_s1 + $0x450] sm:$0xff] }
  0x81   : > { %1527 = vmatprep.mubr.f32.mxu1 %v225_v25  ;;  %768 = vmatprep.mubr.f32.mxu0 %v225_v25  ;;  %v297_v25 = vld [vmem:[%s7977_s1 + $0x488] sm:$0xff] }
  0x82   : > { %4571 = vmatpush1.bf16.msra.mxu0 %v4570_v26  ;;  %4735 = vmatpush1.bf16.msra.mxu1 %v4734_v27  ;;  %v296_v26 = vld [vmem:[%s7977_s1 + $0x480] sm:$0xff]  ;;  %v303_v27 = vld [vmem:[%s7977_s1 + $0x4b8] sm:$0xff] }
  0x83   : > { %4573 = vmatprep.subr.bf16.mxu0 %v4572_v29  ;;  %4736 = vmatprep.subr.bf16.mxu1 %v5855_v1  ;;  %v309_v29 = vld [vmem:[%s7977_s1 + $0x4e8] sm:$0xff] }
  0x84   : > { %1528 = vmatmul.mubr.f32.gmra.mrb[24].mxu1 %v224_v35  ;;  %769 = vmatmul.mubr.f32.gmra.mrb[24].mxu0 %v224_v35  ;;  %v327_v35 = vld [vmem:[%s7977_s1 + $0x578] sm:$0xff] }
  0x85   : > { %1532 = vmatprep.mubr.f32.mxu1 %v231_v36  ;;  %774 = vmatprep.mubr.f32.mxu0 %v231_v36  ;;  %v326_v36 = vld [vmem:[%s7977_s1 + $0x570] sm:$0xff] }
  0x86   : > { %4575 = vmatpush1.bf16.msra.mxu0 %v4574_v37  ;;  %4738 = vmatpush1.bf16.msra.mxu1 %v4737_v38  ;;  %v333_v37 = vld [vmem:[%s7977_s1 + $0x5a8] sm:$0xff]  ;;  %v332_v38 = vld [vmem:[%s7977_s1 + $0x5a0] sm:$0xff] }
  0x87   : > { %4577 = vmatprep.subr.bf16.mxu0 %v4576_v40  ;;  %4739 = vmatprep.subr.bf16.mxu1 %v5855_v1  ;;  %v338_v40 = vld [vmem:[%s7977_s1 + $0x5d0] sm:$0xff] }
  0x88   : > { %1533 = vmatmul.mubr.f32.gmra.mrb[26].mxu1 %v230_v46  ;;  %775 = vmatmul.mubr.f32.gmra.mrb[26].mxu0 %v230_v46  ;;  %v543_v46 = vld [vmem:[%s5889_s17 + $0x638] sm:$0xff] }
  0x89   : > { %1537 = vmatprep.mubr.f32.mxu1 %v237_v47  ;;  %780 = vmatprep.mubr.f32.mxu0 %v237_v47  ;;  %v546_v47 = vld [vmem:[%s5889_s17 + $0x650] sm:$0xff] }
  0x8a   : > { %4579 = vmatpush1.bf16.msra.mxu0 %v4578_v48  ;;  %4741 = vmatpush1.bf16.msra.mxu1 %v4740_v49  ;;  %v154_v48 = vld [vmem:[%s7977_s1 + $0x10] sm:$0xff]  ;;  %v4590_v49 = vpack.c.bf16 %v539_v43, %v536_v42  ;;  %v4592_v53 = vpack.c.bf16 %v546_v47, %v543_v46  ;;  %v575_v46 = vld [vmem:[%s5889_s17 + $0x738] sm:$0xff] }
  0x8b   : > { %4581 = vmatprep.subr.bf16.mxu0 %v4580_v51  ;;  %4742 = vmatprep.subr.bf16.mxu1 %v5855_v1  ;;  %v4749_v51 = vpack.c.bf16 %v541_v45, %v538_v44  ;;  %v572_v44 = vld [vmem:[%s5889_s17 + $0x720] sm:$0xff]  ;;  %v574_v47 = vld [vmem:[%s5889_s17 + $0x730] sm:$0xff] }
  0x8c   : > { %1538 = vmatmul.mubr.f32.gmra.mrb[28].mxu1 %v236_v57  ;;  %781 = vmatmul.mubr.f32.gmra.mrb[28].mxu0 %v236_v57  ;;  %v549_v57 = vld [vmem:[%s5889_s17 + $0x668] sm:$0xff] }
  0x8d   : > { %1542 = vmatprep.mubr.f32.mxu1 %v243_v58  ;;  %786 = vmatprep.mubr.f32.mxu0 %v243_v58  ;;  %v552_v58 = vld [vmem:[%s5889_s17 + $0x680] sm:$0xff] }
  0x8e   : > { %4583 = vmatpush1.bf16.msra.mxu0 %v4582_v59  ;;  %4744 = vmatpush1.bf16.msra.mxu1 %v4743_v60  ;;  %v160_v59 = vld [vmem:[%s7977_s1 + $0x40] sm:$0xff]  ;;  %v167_v60 = vld [vmem:[%s7977_s1 + $0x78] sm:$0xff]  ;;  %v4596_v0 = vpack.c.bf16 %v552_v58, %v549_v57  ;;  %v581_v57 = vld [vmem:[%s5889_s17 + $0x768] sm:$0xff] }
  0x8f   : > { %4585 = vmatprep.subr.bf16.mxu0 %v4584_v62  ;;  %4745 = vmatprep.subr.bf16.mxu1 %v5855_v1  ;;  %v4752_v62 = vpack.c.bf16 %v547_v56, %v544_v55  ;;  %v578_v55 = vld [vmem:[%s5889_s17 + $0x750] sm:$0xff]  ;;  %v580_v58 = vld [vmem:[%s5889_s17 + $0x760] sm:$0xff] }
  0x90   : > { %1543 = vmatmul.mubr.f32.gmra.mrb[30].mxu1 %v242_v5  ;;  %787 = vmatmul.mubr.f32.gmra.mrb[30].mxu0 %v242_v5  ;;  %v555_v5 = vld [vmem:[%s5889_s17 + $0x698] sm:$0xff] }
  0x91   : > { %1547 = vmatprep.mubr.f32.mxu1 %v249_v6  ;;  %792 = vmatprep.mubr.f32.mxu0 %v249_v6  ;;  %v558_v6 = vld [vmem:[%s5889_s17 + $0x6b0] sm:$0xff] }
  0x92   : > { %4587 = vmatpush1.bf16.msra.mxu0 %v4586_v7  ;;  %4747 = vmatpush1.bf16.msra.mxu1 %v4746_v8  ;;  %v166_v7 = vld [vmem:[%s7977_s1 + $0x70] sm:$0xff]  ;;  %v173_v8 = vld [vmem:[%s7977_s1 + $0xa8] sm:$0xff] }
  0x93   : > { %4589 = vmatprep.subr.bf16.mxu0 %v4588_v9  ;;  %4748 = vmatprep.subr.bf16.mxu1 %v5855_v1  ;;  %v4598_v9 = vpack.c.bf16 %v551_v2, %v548_v63  ;;  %v203_v63 = vld [vmem:[%s7977_s1 + $0x198] sm:$0xff] }
  0x94   : > { %1548 = vmatmul.mubr.f32.gmra.mrb[32].mxu1 %v248_v10  ;;  %793 = vmatmul.mubr.f32.gmra.mrb[32].mxu0 %v248_v10  ;;  %v4755_v10 = vpack.c.bf16 %v553_v4, %v550_v3  ;;  %v584_v3 = vld [vmem:[%s5889_s17 + $0x780] sm:$0xff] }
  0x95   : > { %1552 = vmatprep.mubr.f32.mxu1 %v255_v11  ;;  %798 = vmatprep.mubr.f32.mxu0 %v255_v11  ;;  %v554_v11 = vld [vmem:[%s5889_s17 + $0x690] sm:$0xff] }
  0x98   : > { %1553 = vmatmul.mubr.f32.gmra.mrb[34].mxu1 %v254_v12  ;;  %799 = vmatmul.mubr.f32.gmra.mrb[34].mxu0 %v254_v12  ;;  %v4600_v12 = vpack.c.bf16 %v558_v6, %v555_v5  ;;  %v587_v5 = vld [vmem:[%s5889_s17 + $0x798] sm:$0xff]  ;;  %v586_v6 = vld [vmem:[%s5889_s17 + $0x790] sm:$0xff] }
  0x99   : > { %1557 = vmatprep.mubr.f32.mxu1 %v261_v13  ;;  %804 = vmatprep.mubr.f32.mxu0 %v261_v13  ;;  %v557_v13 = vld [vmem:[%s5889_s17 + $0x6a8] sm:$0xff] }
  0x9c   : > { %1558 = vmatmul.mubr.f32.gmra.mrb[36].mxu1 %v260_v14  ;;  %805 = vmatmul.mubr.f32.gmra.mrb[36].mxu0 %v260_v14  ;;  %v556_v14 = vld [vmem:[%s5889_s17 + $0x6a0] sm:$0xff] }
  0x9d   : > { %1562 = vmatprep.mubr.f32.mxu1 %v267_v15  ;;  %810 = vmatprep.mubr.f32.mxu0 %v267_v15  ;;  %v559_v15 = vld [vmem:[%s5889_s17 + $0x6b8] sm:$0xff] }
  0xa0   : > { %1563 = vmatmul.mubr.f32.gmra.mrb[38].mxu1 %v266_v16  ;;  %811 = vmatmul.mubr.f32.gmra.mrb[38].mxu0 %v266_v16  ;;  %v561_v16 = vld [vmem:[%s5889_s17 + $0x6c8] sm:$0xff] }
  0xa1   : > { %1567 = vmatprep.mubr.f32.mxu1 %v273_v17  ;;  %816 = vmatprep.mubr.f32.mxu0 %v273_v17  ;;  %v564_v17 = vld [vmem:[%s5889_s17 + $0x6e0] sm:$0xff] }
  0xa4   : > { %1568 = vmatmul.mubr.f32.gmra.mrb[40].mxu1 %v272_v18  ;;  %817 = vmatmul.mubr.f32.gmra.mrb[40].mxu0 %v272_v18  ;;  %v172_v18 = vld [vmem:[%s7977_s1 + $0xa0] sm:$0xff] }
  0xa5   : > { %1572 = vmatprep.mubr.f32.mxu1 %v279_v19  ;;  %822 = vmatprep.mubr.f32.mxu0 %v279_v19  ;;  %v179_v19 = vld [vmem:[%s7977_s1 + $0xd8] sm:$0xff] }
  0xa8   : > { %1573 = vmatmul.mubr.f32.gmra.mrb[42].mxu1 %v278_v20  ;;  %823 = vmatmul.mubr.f32.gmra.mrb[42].mxu0 %v278_v20  ;;  %v4602_v20 = vpack.c.bf16 %v557_v13, %v554_v11  ;;  %v209_v11 = vld [vmem:[%s7977_s1 + $0x1c8] sm:$0xff] }
  0xa9   : > { %1577 = vmatprep.mubr.f32.mxu1 %v285_v21  ;;  %828 = vmatprep.mubr.f32.mxu0 %v285_v21  ;;  %v4758_v21 = vpack.c.bf16 %v559_v15, %v556_v14  ;;  %v590_v14 = vld [vmem:[%s5889_s17 + $0x7b0] sm:$0xff] }
  0xac   : > { %1578 = vmatmul.mubr.f32.gmra.mrb[44].mxu1 %v284_v22  ;;  %829 = vmatmul.mubr.f32.gmra.mrb[44].mxu0 %v284_v22  ;;  %v560_v22 = vld [vmem:[%s5889_s17 + $0x6c0] sm:$0xff] }
  0xad   : > { %1582 = vmatprep.mubr.f32.mxu1 %v291_v23  ;;  %834 = vmatprep.mubr.f32.mxu0 %v291_v23  ;;  %v4604_v23 = vpack.c.bf16 %v564_v17, %v561_v16  ;;  %v593_v16 = vld [vmem:[%s5889_s17 + $0x7c8] sm:$0xff]  ;;  %v592_v17 = vld [vmem:[%s5889_s17 + $0x7c0] sm:$0xff] }
  0xb0   : > { %1583 = vmatmul.mubr.f32.gmra.mrb[46].mxu1 %v290_v24  ;;  %835 = vmatmul.mubr.f32.gmra.mrb[46].mxu0 %v290_v24  ;;  %v563_v24 = vld [vmem:[%s5889_s17 + $0x6d8] sm:$0xff] }
  0xb1   : > { %1587 = vmatprep.mubr.f32.mxu1 %v297_v25  ;;  %840 = vmatprep.mubr.f32.mxu0 %v297_v25  ;;  %v562_v25 = vld [vmem:[%s5889_s17 + $0x6d0] sm:$0xff] }
  0xb4   : > { %1588 = vmatmul.mubr.f32.gmra.mrb[48].mxu1 %v296_v26  ;;  %841 = vmatmul.mubr.f32.gmra.mrb[48].mxu0 %v296_v26  ;;  %v565_v26 = vld [vmem:[%s5889_s17 + $0x6e8] sm:$0xff] }
  0xb5   : > { %1592 = vmatprep.mubr.f32.mxu1 %v303_v27  ;;  %846 = vmatprep.mubr.f32.mxu0 %v303_v27  ;;  %v567_v27 = vld [vmem:[%s5889_s17 + $0x6f8] sm:$0xff] }
  0xb8   : > { %1593 = vmatmul.mubr.f32.gmra.mrb[50].mxu1 %v302_v28  ;;  %847 = vmatmul.mubr.f32.gmra.mrb[50].mxu0 %v302_v28  ;;  %v570_v28 = vld [vmem:[%s5889_s17 + $0x710] sm:$0xff] }
  0xb9   : > { %1597 = vmatprep.mubr.f32.mxu1 %v309_v29  ;;  %852 = vmatprep.mubr.f32.mxu0 %v309_v29  ;;  %v178_v29 = vld [vmem:[%s7977_s1 + $0xd0] sm:$0xff] }
  0xbc   : > { %1598 = vmatmul.mubr.f32.gmra.mrb[52].mxu1 %v308_v30  ;;  %853 = vmatmul.mubr.f32.gmra.mrb[52].mxu0 %v308_v30  ;;  %v185_v30 = vld [vmem:[%s7977_s1 + $0x108] sm:$0xff] }
  0xbd   : > { %1602 = vmatprep.mubr.f32.mxu1 %v315_v31  ;;  %858 = vmatprep.mubr.f32.mxu0 %v315_v31  ;;  %v4606_v31 = vpack.c.bf16 %v563_v24, %v560_v22  ;;  %v215_v22 = vld [vmem:[%s7977_s1 + $0x1f8] sm:$0xff] }
  0xc0   : > { %1603 = vmatmul.mubr.f32.gmra.mrb[54].mxu1 %v314_v32  ;;  %859 = vmatmul.mubr.f32.gmra.mrb[54].mxu0 %v314_v32  ;;  %v4761_v32 = vpack.c.bf16 %v565_v26, %v562_v25  ;;  %v596_v25 = vld [vmem:[%s5889_s17 + $0x7e0] sm:$0xff] }
  0xc1   : > { %1607 = vmatprep.mubr.f32.mxu1 %v321_v33  ;;  %864 = vmatprep.mubr.f32.mxu0 %v321_v33  ;;  %v566_v33 = vld [vmem:[%s5889_s17 + $0x6f0] sm:$0xff] }
  0xc4   : > { %1608 = vmatmul.mubr.f32.gmra.mrb[56].mxu1 %v320_v34  ;;  %865 = vmatmul.mubr.f32.gmra.mrb[56].mxu0 %v320_v34  ;;  %v4608_v34 = vpack.c.bf16 %v570_v28, %v567_v27  ;;  %v599_v27 = vld [vmem:[%s5889_s17 + $0x7f8] sm:$0xff]  ;;  %v598_v28 = vld [vmem:[%s5889_s17 + $0x7f0] sm:$0xff] }
  0xc5   : > { %1612 = vmatprep.mubr.f32.mxu1 %v327_v35  ;;  %870 = vmatprep.mubr.f32.mxu0 %v327_v35  ;;  %v569_v35 = vld [vmem:[%s5889_s17 + $0x708] sm:$0xff] }
  0xc6   : > { %v4610_v42 = vpack.c.bf16 %v569_v35, %v566_v33  ;;  %v221_v33 = vld [vmem:[%s7977_s1 + $0x228] sm:$0xff] }
  0xc8   : > { %1613 = vmatmul.mubr.f32.gmra.mrb[58].mxu1 %v326_v36  ;;  %871 = vmatmul.mubr.f32.gmra.mrb[58].mxu0 %v326_v36  ;;  %v568_v36 = vld [vmem:[%s5889_s17 + $0x700] sm:$0xff] }
  0xc9   : > { %1617 = vmatprep.mubr.f32.mxu1 %v333_v37  ;;  %876 = vmatprep.mubr.f32.mxu0 %v333_v37  ;;  %v571_v37 = vld [vmem:[%s5889_s17 + $0x718] sm:$0xff] }
  0xca   : > { %v4764_v43 = vpack.c.bf16 %v571_v37, %v568_v36  ;;  %v602_v36 = vld [vmem:[%s5889_s17 + $0x810] sm:$0xff] }
  0xcc   : > { %1618 = vmatmul.mubr.f32.gmra.mrb[60].mxu1 %v332_v38  ;;  %877 = vmatmul.mubr.f32.gmra.mrb[60].mxu0 %v332_v38  ;;  %v573_v38 = vld [vmem:[%s5889_s17 + $0x728] sm:$0xff] }
  0xcd   : > { %1622 = vmatprep.mubr.f32.mxu1 %v339_v39  ;;  %882 = vmatprep.mubr.f32.mxu0 %v339_v39  ;;  %v576_v39 = vld [vmem:[%s5889_s17 + $0x740] sm:$0xff] }
  0xce   : > { %v4612_v45 = vpack.c.bf16 %v576_v39, %v573_v38  ;;  %v605_v38 = vld [vmem:[%s5889_s17 + $0x828] sm:$0xff]  ;;  %v604_v39 = vld [vmem:[%s5889_s17 + $0x820] sm:$0xff] }
  0xd0   : > { %1623 = vmatmul.mubr.f32.gmra.mrb[62].mxu1 %v338_v40  ;;  %883 = vmatmul.mubr.f32.gmra.mrb[62].mxu0 %v338_v40  ;;  %v184_v40 = vld [vmem:[%s7977_s1 + $0x100] sm:$0xff] }
  0xd1   : > { %1692 = vmatprep.mubr.f32.mxu1 %v155_v41  ;;  %953 = vmatprep.mubr.f32.mxu0 %v155_v41  ;;  %v191_v41 = vld [vmem:[%s7977_s1 + $0x138] sm:$0xff] }
  0xd4   : > { %1693 = vmatmul.mubr.f32.vlgmr.msra.gmra.mrb[0].mxu1 %v154_v48  ;;  %954 = vmatmul.mubr.f32.vlgmr.msra.gmra.mrb[0].mxu0 %v154_v48  ;;  %v577_v48 = vld [vmem:[%s5889_s17 + $0x748] sm:$0xff] }
  0xd5   : > { %4591 = vmatpush1.bf16.msra.mxu0 %v4590_v49  ;;  %1697 = vmatprep.mubr.f32.mxu1 %v161_v50  ;;  %v579_v49 = vld [vmem:[%s5889_s17 + $0x758] sm:$0xff]  ;;  %v4767_v54 = vpack.c.bf16 %v577_v48, %v574_v47  ;;  %v608_v47 = vld [vmem:[%s5889_s17 + $0x840] sm:$0xff] }
  0xd6   : > { %4750 = vmatpush1.bf16.msra.mxu1 %v4749_v51  ;;  %959 = vmatprep.mubr.f32.mxu0 %v161_v50  ;;  %v582_v50 = vld [vmem:[%s5889_s17 + $0x770] sm:$0xff] }
  0xd7   : > { %4593 = vmatprep.subr.bf16.mxu0 %v4592_v53  ;;  %4751 = vmatprep.subr.bf16.mxu1 %v5855_v1  ;;  %v190_v51 = vld [vmem:[%s7977_s1 + $0x130] sm:$0xff]  ;;  %v4614_v53 = vpack.c.bf16 %v575_v46, %v572_v44  ;;  %v4616_v56 = vpack.c.bf16 %v582_v50, %v579_v49  ;;  %v227_v44 = vld [vmem:[%s7977_s1 + $0x258] sm:$0xff] }
  0xd8   : > { %1698 = vmatmul.mubr.f32.gmra.mrb[2].mxu1 %v160_v59  ;;  %960 = vmatmul.mubr.f32.gmra.mrb[2].mxu0 %v160_v59  ;;  %v583_v59 = vld [vmem:[%s5889_s17 + $0x778] sm:$0xff]  ;;  %v610_v50 = vld [vmem:[%s5889_s17 + $0x850] sm:$0xff] }
  0xd9   : > { %1702 = vmatprep.mubr.f32.mxu1 %v167_v60  ;;  %965 = vmatprep.mubr.f32.mxu0 %v167_v60  ;;  %v585_v60 = vld [vmem:[%s5889_s17 + $0x788] sm:$0xff]  ;;  %v4770_v2 = vpack.c.bf16 %v583_v59, %v580_v58  ;;  %v611_v49 = vld [vmem:[%s5889_s17 + $0x858] sm:$0xff]  ;;  %v614_v58 = vld [vmem:[%s5889_s17 + $0x870] sm:$0xff] }
  0xda   : > { %4595 = vmatpush1.bf16.msra.mxu0 %v4594_v61  ;;  %4753 = vmatpush1.bf16.msra.mxu1 %v4752_v62  ;;  %v588_v61 = vld [vmem:[%s5889_s17 + $0x7a0] sm:$0xff] }
  0xdb   : > { %4597 = vmatprep.subr.bf16.mxu0 %v4596_v0  ;;  %4754 = vmatprep.subr.bf16.mxu1 %v5855_v1  ;;  %v196_v62 = vld [vmem:[%s7977_s1 + $0x160] sm:$0xff]  ;;  %v4618_v0 = vpack.c.bf16 %v581_v57, %v578_v55  ;;  %v4620_v4 = vpack.c.bf16 %v588_v61, %v585_v60  ;;  %v233_v55 = vld [vmem:[%s7977_s1 + $0x288] sm:$0xff] }
  0xdc   : > { %1703 = vmatmul.mubr.f32.gmra.mrb[4].mxu1 %v166_v7  ;;  %966 = vmatmul.mubr.f32.gmra.mrb[4].mxu0 %v166_v7  ;;  %v589_v7 = vld [vmem:[%s5889_s17 + $0x7a8] sm:$0xff]  ;;  %v616_v61 = vld [vmem:[%s5889_s17 + $0x880] sm:$0xff] }
  0xdd   : > { %1707 = vmatprep.mubr.f32.mxu1 %v173_v8  ;;  %971 = vmatprep.mubr.f32.mxu0 %v173_v8  ;;  %v591_v8 = vld [vmem:[%s5889_s17 + $0x7b8] sm:$0xff]  ;;  %v4773_v13 = vpack.c.bf16 %v589_v7, %v586_v6  ;;  %v617_v60 = vld [vmem:[%s5889_s17 + $0x888] sm:$0xff]  ;;  %v620_v6 = vld [vmem:[%s5889_s17 + $0x8a0] sm:$0xff] }
  0xde   : > { %4599 = vmatpush1.bf16.msra.mxu0 %v4598_v9  ;;  %4756 = vmatpush1.bf16.msra.mxu1 %v4755_v10  ;;  %v594_v9 = vld [vmem:[%s5889_s17 + $0x7d0] sm:$0xff] }
  0xdf   : > { %4601 = vmatprep.subr.bf16.mxu0 %v4600_v12  ;;  %4757 = vmatprep.subr.bf16.mxu1 %v5855_v1  ;;  %v202_v10 = vld [vmem:[%s7977_s1 + $0x190] sm:$0xff]  ;;  %v4622_v12 = vpack.c.bf16 %v587_v5, %v584_v3  ;;  %v4624_v15 = vpack.c.bf16 %v594_v9, %v591_v8  ;;  %v239_v3 = vld [vmem:[%s7977_s1 + $0x2b8] sm:$0xff] }
  0xe0   : > { %1708 = vmatmul.mubr.f32.gmra.mrb[6].mxu1 %v172_v18  ;;  %972 = vmatmul.mubr.f32.gmra.mrb[6].mxu0 %v172_v18  ;;  %v595_v18 = vld [vmem:[%s5889_s17 + $0x7d8] sm:$0xff]  ;;  %v622_v9 = vld [vmem:[%s5889_s17 + $0x8b0] sm:$0xff] }
  0xe1   : > { %1712 = vmatprep.mubr.f32.mxu1 %v179_v19  ;;  %977 = vmatprep.mubr.f32.mxu0 %v179_v19  ;;  %v597_v19 = vld [vmem:[%s5889_s17 + $0x7e8] sm:$0xff]  ;;  %v4776_v24 = vpack.c.bf16 %v595_v18, %v592_v17  ;;  %v623_v8 = vld [vmem:[%s5889_s17 + $0x8b8] sm:$0xff]  ;;  %v626_v17 = vld [vmem:[%s5889_s17 + $0x8d0] sm:$0xff] }
  0xe2   : > { %4603 = vmatpush1.bf16.msra.mxu0 %v4602_v20  ;;  %4759 = vmatpush1.bf16.msra.mxu1 %v4758_v21  ;;  %v600_v20 = vld [vmem:[%s5889_s17 + $0x800] sm:$0xff] }
  0xe3   : > { %4605 = vmatprep.subr.bf16.mxu0 %v4604_v23  ;;  %4760 = vmatprep.subr.bf16.mxu1 %v5855_v1  ;;  %v208_v21 = vld [vmem:[%s7977_s1 + $0x1c0] sm:$0xff]  ;;  %v4626_v23 = vpack.c.bf16 %v593_v16, %v590_v14  ;;  %v4628_v26 = vpack.c.bf16 %v600_v20, %v597_v19  ;;  %v245_v14 = vld [vmem:[%s7977_s1 + $0x2e8] sm:$0xff] }
  0xe4   : > { %1713 = vmatmul.mubr.f32.gmra.mrb[8].mxu1 %v178_v29  ;;  %978 = vmatmul.mubr.f32.gmra.mrb[8].mxu0 %v178_v29  ;;  %v601_v29 = vld [vmem:[%s5889_s17 + $0x808] sm:$0xff]  ;;  %v628_v20 = vld [vmem:[%s5889_s17 + $0x8e0] sm:$0xff] }
  0xe5   : > { %1717 = vmatprep.mubr.f32.mxu1 %v185_v30  ;;  %983 = vmatprep.mubr.f32.mxu0 %v185_v30  ;;  %v603_v30 = vld [vmem:[%s5889_s17 + $0x818] sm:$0xff]  ;;  %v4779_v35 = vpack.c.bf16 %v601_v29, %v598_v28  ;;  %v629_v19 = vld [vmem:[%s5889_s17 + $0x8e8] sm:$0xff]  ;;  %v250_v29 = vld [vmem:[%s7977_s1 + $0x310] sm:$0xff] }
  0xe6   : > { %4607 = vmatpush1.bf16.msra.mxu0 %v4606_v31  ;;  %4762 = vmatpush1.bf16.msra.mxu1 %v4761_v32  ;;  %v606_v31 = vld [vmem:[%s5889_s17 + $0x830] sm:$0xff] }
  0xe7   : > { %4609 = vmatprep.subr.bf16.mxu0 %v4608_v34  ;;  %4763 = vmatprep.subr.bf16.mxu1 %v5855_v1  ;;  %v214_v32 = vld [vmem:[%s7977_s1 + $0x1f0] sm:$0xff]  ;;  %v4630_v34 = vpack.c.bf16 %v599_v27, %v596_v25  ;;  %v4632_v37 = vpack.c.bf16 %v606_v31, %v603_v30  ;;  %v251_v25 = vld [vmem:[%s7977_s1 + $0x318] sm:$0xff]  ;;  %v257_v30 = vld [vmem:[%s7977_s1 + $0x348] sm:$0xff] }
  0xe8   : > { %1718 = vmatmul.mubr.f32.gmra.mrb[10].mxu1 %v184_v40  ;;  %984 = vmatmul.mubr.f32.gmra.mrb[10].mxu0 %v184_v40  ;;  %v607_v40 = vld [vmem:[%s5889_s17 + $0x838] sm:$0xff]  ;;  %v256_v31 = vld [vmem:[%s7977_s1 + $0x340] sm:$0xff] }
  0xe9   : > { %1722 = vmatprep.mubr.f32.mxu1 %v191_v41  ;;  %989 = vmatprep.mubr.f32.mxu0 %v191_v41  ;;  %v609_v41 = vld [vmem:[%s5889_s17 + $0x848] sm:$0xff]  ;;  %v4782_v46 = vpack.c.bf16 %v607_v40, %v604_v39  ;;  %v280_v39 = vld [vmem:[%s7977_s1 + $0x400] sm:$0xff]  ;;  %v287_v40 = vld [vmem:[%s7977_s1 + $0x438] sm:$0xff] }
  0xea   : > { %4611 = vmatpush1.bf16.msra.mxu0 %v4610_v42  ;;  %4765 = vmatpush1.bf16.msra.mxu1 %v4764_v43  ;;  %v612_v42 = vld [vmem:[%s5889_s17 + $0x860] sm:$0xff] }
  0xeb   : > { %4613 = vmatprep.subr.bf16.mxu0 %v4612_v45  ;;  %4766 = vmatprep.subr.bf16.mxu1 %v5855_v1  ;;  %v220_v43 = vld [vmem:[%s7977_s1 + $0x220] sm:$0xff]  ;;  %v4634_v45 = vpack.c.bf16 %v605_v38, %v602_v36  ;;  %v4636_v48 = vpack.c.bf16 %v612_v42, %v609_v41  ;;  %v275_v36 = vld [vmem:[%s7977_s1 + $0x3d8] sm:$0xff]  ;;  %v281_v38 = vld [vmem:[%s7977_s1 + $0x408] sm:$0xff] }
  0xec   : > { %1723 = vmatmul.mubr.f32.gmra.mrb[12].mxu1 %v190_v51  ;;  %990 = vmatmul.mubr.f32.gmra.mrb[12].mxu0 %v190_v51  ;;  %v613_v51 = vld [vmem:[%s5889_s17 + $0x868] sm:$0xff]  ;;  %v286_v41 = vld [vmem:[%s7977_s1 + $0x430] sm:$0xff] }
  0xed   : > { %1727 = vmatprep.mubr.f32.mxu1 %v197_v52  ;;  %995 = vmatprep.mubr.f32.mxu0 %v197_v52  ;;  %v615_v52 = vld [vmem:[%s5889_s17 + $0x878] sm:$0xff]  ;;  %v4785_v57 = vpack.c.bf16 %v613_v51, %v610_v50  ;;  %v293_v42 = vld [vmem:[%s7977_s1 + $0x468] sm:$0xff]  ;;  %v316_v51 = vld [vmem:[%s7977_s1 + $0x520] sm:$0xff] }
  0xee   : > { %4615 = vmatpush1.bf16.msra.mxu0 %v4614_v53  ;;  %4768 = vmatpush1.bf16.msra.mxu1 %v4767_v54  ;;  %v618_v53 = vld [vmem:[%s5889_s17 + $0x890] sm:$0xff]  ;;  %v317_v50 = vld [vmem:[%s7977_s1 + $0x528] sm:$0xff] }
  0xef   : > { %4617 = vmatprep.subr.bf16.mxu0 %v4616_v56  ;;  %4769 = vmatprep.subr.bf16.mxu1 %v5855_v1  ;;  %v226_v54 = vld [vmem:[%s7977_s1 + $0x250] sm:$0xff]  ;;  %v4638_v56 = vpack.c.bf16 %v611_v49, %v608_v47  ;;  %v4640_v59 = vpack.c.bf16 %v618_v53, %v615_v52  ;;  %v304_v47 = vld [vmem:[%s7977_s1 + $0x4c0] sm:$0xff]  ;;  %v323_v52 = vld [vmem:[%s7977_s1 + $0x558] sm:$0xff] }
  0xf0   : > { %1728 = vmatmul.mubr.f32.gmra.mrb[14].mxu1 %v196_v62  ;;  %996 = vmatmul.mubr.f32.gmra.mrb[14].mxu0 %v196_v62  ;;  %v619_v62 = vld [vmem:[%s5889_s17 + $0x898] sm:$0xff]  ;;  %v310_v49 = vld [vmem:[%s7977_s1 + $0x4f0] sm:$0xff] }
  0xf1   : > { %1732 = vmatprep.mubr.f32.mxu1 %v203_v63  ;;  %1001 = vmatprep.mubr.f32.mxu0 %v203_v63  ;;  %v621_v63 = vld [vmem:[%s5889_s17 + $0x8a8] sm:$0xff]  ;;  %v4788_v5 = vpack.c.bf16 %v619_v62, %v616_v61  ;;  %v322_v53 = vld [vmem:[%s7977_s1 + $0x550] sm:$0xff]  ;;  %v4074_v61 = vld [vmem:[%s5889_s17 + $0x900] sm:$0xff] }
  0xf2   : > { %4619 = vmatpush1.bf16.msra.mxu0 %v4618_v0  ;;  %4771 = vmatpush1.bf16.msra.mxu1 %v4770_v2  ;;  %v624_v0 = vld [vmem:[%s5889_s17 + $0x8c0] sm:$0xff]  ;;  %v4077_v62 = vld [vmem:[%s5889_s17 + $0x918] sm:$0xff] }
  0xf3   : > { %4621 = vmatprep.subr.bf16.mxu0 %v4620_v4  ;;  %4772 = vmatprep.subr.bf16.mxu1 %v5855_v1  ;;  %v232_v2 = vld [vmem:[%s7977_s1 + $0x280] sm:$0xff]  ;;  %v4642_v4 = vpack.c.bf16 %v617_v60, %v614_v58  ;;  %v4644_v7 = vpack.c.bf16 %v624_v0, %v621_v63  ;;  %v341_v58 = vld [vmem:[%s7977_s1 + $0x5e8] sm:$0xff]  ;;  %v4076_v63 = vld [vmem:[%s5889_s17 + $0x910] sm:$0xff] }
  0xf4   : > { %1733 = vmatmul.mubr.f32.gmra.mrb[16].mxu1 %v202_v10  ;;  %1002 = vmatmul.mubr.f32.gmra.mrb[16].mxu0 %v202_v10  ;;  %v625_v10 = vld [vmem:[%s5889_s17 + $0x8c8] sm:$0xff] }
  0xf5   : > { %1737 = vmatprep.mubr.f32.mxu1 %v209_v11  ;;  %1007 = vmatprep.mubr.f32.mxu0 %v209_v11  ;;  %v627_v11 = vld [vmem:[%s5889_s17 + $0x8d8] sm:$0xff]  ;;  %v4791_v16 = vpack.c.bf16 %v625_v10, %v622_v9  ;;  %v157_v60 = vld [vmem:[%s7977_s1 + $0x28] sm:$0xff] }
  0xf6   : > { %4623 = vmatpush1.bf16.msra.mxu0 %v4622_v12  ;;  %4774 = vmatpush1.bf16.msra.mxu1 %v4773_v13  ;;  %v630_v12 = vld [vmem:[%s5889_s17 + $0x8f0] sm:$0xff]  ;;  %v4079_v0 = vld [vmem:[%s5889_s17 + $0x928] sm:$0xff] }
  0xf7   : > { %4625 = vmatprep.subr.bf16.mxu0 %v4624_v15  ;;  %4775 = vmatprep.subr.bf16.mxu1 %v5855_v1  ;;  %v238_v13 = vld [vmem:[%s7977_s1 + $0x2b0] sm:$0xff]  ;;  %v4646_v15 = vpack.c.bf16 %v623_v8, %v620_v6  ;;  %v4648_v18 = vpack.c.bf16 %v630_v12, %v627_v11  ;;  %v163_v6 = vld [vmem:[%s7977_s1 + $0x58] sm:$0xff]  ;;  %v4083_v10 = vld [vmem:[%s5889_s17 + $0x948] sm:$0xff] }
  0xf8   : > { %1738 = vmatmul.mubr.f32.gmra.mrb[18].mxu1 %v208_v21  ;;  %1008 = vmatmul.mubr.f32.gmra.mrb[18].mxu0 %v208_v21  ;;  %v631_v21 = vld [vmem:[%s5889_s17 + $0x8f8] sm:$0xff]  ;;  %v4080_v8 = vld [vmem:[%s5889_s17 + $0x930] sm:$0xff]  ;;  %v4082_v11 = vld [vmem:[%s5889_s17 + $0x940] sm:$0xff] }
  0xf9   : > { %1742 = vmatprep.mubr.f32.mxu1 %v215_v22  ;;  %1013 = vmatprep.mubr.f32.mxu0 %v215_v22  ;;  %v4075_v22 = vld [vmem:[%s5889_s17 + $0x908] sm:$0xff]  ;;  %v4794_v27 = vpack.c.bf16 %v631_v21, %v628_v20  ;;  %v4085_v12 = vld [vmem:[%s5889_s17 + $0x958] sm:$0xff] }
  0xfa   : > { %4627 = vmatpush1.bf16.msra.mxu0 %v4626_v23  ;;  %4777 = vmatpush1.bf16.msra.mxu1 %v4776_v24  ;;  %v4078_v23 = vld [vmem:[%s5889_s17 + $0x920] sm:$0xff]  ;;  %v4089_v21 = vld [vmem:[%s5889_s17 + $0x978] sm:$0xff] }
  0xfb   : > { %4629 = vmatprep.subr.bf16.mxu0 %v4628_v26  ;;  %4778 = vmatprep.subr.bf16.mxu1 %v5855_v1  ;;  %v244_v24 = vld [vmem:[%s7977_s1 + $0x2e0] sm:$0xff]  ;;  %v4650_v26 = vpack.c.bf16 %v629_v19, %v626_v17  ;;  %v4796_v28 = vpack.c.bf16 %v4078_v23, %v4075_v22  ;;  %v4802_v17 = vpack.c.bf16 %v4083_v10, %v4080_v8  ;;  %v4088_v22 = vld [vmem:[%s5889_s17 + $0x970] sm:$0xff]  ;;  %v4091_v23 = vld [vmem:[%s5889_s17 + $0x988] sm:$0xff] }
  0xfc   : > { %1743 = vmatmul.mubr.f32.gmra.mrb[20].mxu1 %v214_v32  ;;  %1014 = vmatmul.mubr.f32.gmra.mrb[20].mxu0 %v214_v32  ;;  %v263_v32 = vld [vmem:[%s7977_s1 + $0x378] sm:$0xff]  ;;  %v4086_v19 = vld [vmem:[%s5889_s17 + $0x960] sm:$0xff] }
  0xfd   : > { %1747 = vmatprep.mubr.f32.mxu1 %v221_v33  ;;  %1019 = vmatprep.mubr.f32.mxu0 %v221_v33  ;;  %v262_v33 = vld [vmem:[%s7977_s1 + $0x370] sm:$0xff]  ;;  %v199_v8 = vld [vmem:[%s7977_s1 + $0x178] sm:$0xff] }
  0xfe   : > { %4631 = vmatpush1.bf16.msra.mxu0 %v4630_v34  ;;  %4780 = vmatpush1.bf16.msra.mxu1 %v4779_v35  ;;  %v269_v34 = vld [vmem:[%s7977_s1 + $0x3a8] sm:$0xff]  ;;  %v268_v35 = vld [vmem:[%s7977_s1 + $0x3a0] sm:$0xff] }
  0xff   : > { %4633 = vmatprep.subr.bf16.mxu0 %v4632_v37  ;;  %4781 = vmatprep.subr.bf16.mxu1 %v5855_v1  ;;  %v274_v37 = vld [vmem:[%s7977_s1 + $0x3d0] sm:$0xff] }
 0x100   : > { %1748 = vmatmul.mubr.f32.gmra.mrb[22].mxu1 %v220_v43  ;;  %1020 = vmatmul.mubr.f32.gmra.mrb[22].mxu0 %v220_v43  ;;  %v292_v43 = vld [vmem:[%s7977_s1 + $0x460] sm:$0xff] }
 0x101   : > { %1752 = vmatprep.mubr.f32.mxu1 %v227_v44  ;;  %1025 = vmatprep.mubr.f32.mxu0 %v227_v44  ;;  %v299_v44 = vld [vmem:[%s7977_s1 + $0x498] sm:$0xff] }
 0x102   : > { %4635 = vmatpush1.bf16.msra.mxu0 %v4634_v45  ;;  %4783 = vmatpush1.bf16.msra.mxu1 %v4782_v46  ;;  %v298_v45 = vld [vmem:[%s7977_s1 + $0x490] sm:$0xff]  ;;  %v305_v46 = vld [vmem:[%s7977_s1 + $0x4c8] sm:$0xff] }
 0x103   : > { %4637 = vmatprep.subr.bf16.mxu0 %v4636_v48  ;;  %4784 = vmatprep.subr.bf16.mxu1 %v5855_v1  ;;  %v311_v48 = vld [vmem:[%s7977_s1 + $0x4f8] sm:$0xff] }
 0x104   : > { %1753 = vmatmul.mubr.f32.gmra.mrb[24].mxu1 %v226_v54  ;;  %1026 = vmatmul.mubr.f32.gmra.mrb[24].mxu0 %v226_v54  ;;  %v329_v54 = vld [vmem:[%s7977_s1 + $0x588] sm:$0xff] }
 0x105   : > { %1757 = vmatprep.mubr.f32.mxu1 %v233_v55  ;;  %1031 = vmatprep.mubr.f32.mxu0 %v233_v55  ;;  %v328_v55 = vld [vmem:[%s7977_s1 + $0x580] sm:$0xff] }
 0x106   : > { %4639 = vmatpush1.bf16.msra.mxu0 %v4638_v56  ;;  %4786 = vmatpush1.bf16.msra.mxu1 %v4785_v57  ;;  %v335_v56 = vld [vmem:[%s7977_s1 + $0x5b8] sm:$0xff]  ;;  %v334_v57 = vld [vmem:[%s7977_s1 + $0x5b0] sm:$0xff] }
 0x107   : > { %4641 = vmatprep.subr.bf16.mxu0 %v4640_v59  ;;  %4787 = vmatprep.subr.bf16.mxu1 %v5855_v1  ;;  %v340_v59 = vld [vmem:[%s7977_s1 + $0x5e0] sm:$0xff] }
 0x108   : > { %1758 = vmatmul.mubr.f32.gmra.mrb[26].mxu1 %v232_v2  ;;  %1032 = vmatmul.mubr.f32.gmra.mrb[26].mxu0 %v232_v2  ;;  %v4081_v2 = vld [vmem:[%s5889_s17 + $0x938] sm:$0xff] }
 0x109   : > { %1762 = vmatprep.mubr.f32.mxu1 %v239_v3  ;;  %1037 = vmatprep.mubr.f32.mxu0 %v239_v3  ;;  %v4084_v3 = vld [vmem:[%s5889_s17 + $0x950] sm:$0xff] }
 0x10a   : > { %4643 = vmatpush1.bf16.msra.mxu0 %v4642_v4  ;;  %4789 = vmatpush1.bf16.msra.mxu1 %v4788_v5  ;;  %v156_v4 = vld [vmem:[%s7977_s1 + $0x20] sm:$0xff]  ;;  %v4798_v5 = vpack.c.bf16 %v4077_v62, %v4074_v61  ;;  %v4800_v9 = vpack.c.bf16 %v4084_v3, %v4081_v2  ;;  %v4113_v2 = vld [vmem:[%s5889_s17 + $0xa38] sm:$0xff]  ;;  %v4112_v3 = vld [vmem:[%s5889_s17 + $0xa30] sm:$0xff] }
 0x10b   : > { %4645 = vmatprep.subr.bf16.mxu0 %v4644_v7  ;;  %4790 = vmatprep.subr.bf16.mxu1 %v5855_v1  ;;  %v4989_v7 = vpack.c.bf16 %v4079_v0, %v4076_v63  ;;  %v4110_v63 = vld [vmem:[%s5889_s17 + $0xa20] sm:$0xff] }
 0x10c   : > { %1763 = vmatmul.mubr.f32.gmra.mrb[28].mxu1 %v238_v13  ;;  %1038 = vmatmul.mubr.f32.gmra.mrb[28].mxu0 %v238_v13  ;;  %v4087_v13 = vld [vmem:[%s5889_s17 + $0x968] sm:$0xff] }
 0x10d   : > { %1767 = vmatprep.mubr.f32.mxu1 %v245_v14  ;;  %1043 = vmatprep.mubr.f32.mxu0 %v245_v14  ;;  %v4090_v14 = vld [vmem:[%s5889_s17 + $0x980] sm:$0xff] }
 0x10e   : > { %4647 = vmatpush1.bf16.msra.mxu0 %v4646_v15  ;;  %4792 = vmatpush1.bf16.msra.mxu1 %v4791_v16  ;;  %v162_v15 = vld [vmem:[%s7977_s1 + $0x50] sm:$0xff]  ;;  %v169_v16 = vld [vmem:[%s7977_s1 + $0x88] sm:$0xff]  ;;  %v4804_v20 = vpack.c.bf16 %v4090_v14, %v4087_v13  ;;  %v4118_v14 = vld [vmem:[%s5889_s17 + $0xa60] sm:$0xff] }
 0x10f   : > { %4649 = vmatprep.subr.bf16.mxu0 %v4648_v18  ;;  %4793 = vmatprep.subr.bf16.mxu1 %v5855_v1  ;;  %v4992_v18 = vpack.c.bf16 %v4085_v12, %v4082_v11  ;;  %v4116_v11 = vld [vmem:[%s5889_s17 + $0xa50] sm:$0xff]  ;;  %v4119_v13 = vld [vmem:[%s5889_s17 + $0xa68] sm:$0xff] }
 0x110   : > { %1768 = vmatmul.mubr.f32.gmra.mrb[30].mxu1 %v244_v24  ;;  %1044 = vmatmul.mubr.f32.gmra.mrb[30].mxu0 %v244_v24  ;;  %v4093_v24 = vld [vmem:[%s5889_s17 + $0x998] sm:$0xff] }
 0x111   : > { %1772 = vmatprep.mubr.f32.mxu1 %v251_v25  ;;  %1049 = vmatprep.mubr.f32.mxu0 %v251_v25  ;;  %v4096_v25 = vld [vmem:[%s5889_s17 + $0x9b0] sm:$0xff] }
 0x112   : > { %4651 = vmatpush1.bf16.msra.mxu0 %v4650_v26  ;;  %4795 = vmatpush1.bf16.msra.mxu1 %v4794_v27  ;;  %v168_v26 = vld [vmem:[%s7977_s1 + $0x80] sm:$0xff]  ;;  %v175_v27 = vld [vmem:[%s7977_s1 + $0xb8] sm:$0xff] }
 0x113   : > { %4797 = vmatprep.subr.bf16.mxu0 %v4796_v28  ;;  %4988 = vmatprep.subr.bf16.mxu1 %v5855_v1  ;;  %v4806_v28 = vpack.c.bf16 %v4089_v21, %v4086_v19  ;;  %v205_v19 = vld [vmem:[%s7977_s1 + $0x1a8] sm:$0xff] }
 0x114   : > { %1773 = vmatmul.mubr.f32.gmra.mrb[32].mxu1 %v250_v29  ;;  %1050 = vmatmul.mubr.f32.gmra.mrb[32].mxu0 %v250_v29  ;;  %v4995_v29 = vpack.c.bf16 %v4091_v23, %v4088_v22  ;;  %v4122_v22 = vld [vmem:[%s5889_s17 + $0xa80] sm:$0xff] }
 0x115   : > { %1777 = vmatprep.mubr.f32.mxu1 %v257_v30  ;;  %1055 = vmatprep.mubr.f32.mxu0 %v257_v30  ;;  %v4092_v30 = vld [vmem:[%s5889_s17 + $0x990] sm:$0xff] }
 0x118   : > { %1778 = vmatmul.mubr.f32.gmra.mrb[34].mxu1 %v256_v31  ;;  %1056 = vmatmul.mubr.f32.gmra.mrb[34].mxu0 %v256_v31  ;;  %v4808_v31 = vpack.c.bf16 %v4096_v25, %v4093_v24  ;;  %v4125_v24 = vld [vmem:[%s5889_s17 + $0xa98] sm:$0xff]  ;;  %v4124_v25 = vld [vmem:[%s5889_s17 + $0xa90] sm:$0xff] }
 0x119   : > { %1782 = vmatprep.mubr.f32.mxu1 %v263_v32  ;;  %1061 = vmatprep.mubr.f32.mxu0 %v263_v32  ;;  %v4095_v32 = vld [vmem:[%s5889_s17 + $0x9a8] sm:$0xff] }
 0x11c   : > { %1783 = vmatmul.mubr.f32.gmra.mrb[36].mxu1 %v262_v33  ;;  %1062 = vmatmul.mubr.f32.gmra.mrb[36].mxu0 %v262_v33  ;;  %v4094_v33 = vld [vmem:[%s5889_s17 + $0x9a0] sm:$0xff] }
 0x11d   : > { %1787 = vmatprep.mubr.f32.mxu1 %v269_v34  ;;  %1067 = vmatprep.mubr.f32.mxu0 %v269_v34  ;;  %v4097_v34 = vld [vmem:[%s5889_s17 + $0x9b8] sm:$0xff] }
 0x120   : > { %1788 = vmatmul.mubr.f32.gmra.mrb[38].mxu1 %v268_v35  ;;  %1068 = vmatmul.mubr.f32.gmra.mrb[38].mxu0 %v268_v35  ;;  %v4099_v35 = vld [vmem:[%s5889_s17 + $0x9c8] sm:$0xff] }
 0x121   : > { %1792 = vmatprep.mubr.f32.mxu1 %v275_v36  ;;  %1073 = vmatprep.mubr.f32.mxu0 %v275_v36  ;;  %v4102_v36 = vld [vmem:[%s5889_s17 + $0x9e0] sm:$0xff] }
 0x124   : > { %1793 = vmatmul.mubr.f32.gmra.mrb[40].mxu1 %v274_v37  ;;  %1074 = vmatmul.mubr.f32.gmra.mrb[40].mxu0 %v274_v37  ;;  %v174_v37 = vld [vmem:[%s7977_s1 + $0xb0] sm:$0xff] }
 0x125   : > { %1797 = vmatprep.mubr.f32.mxu1 %v281_v38  ;;  %1079 = vmatprep.mubr.f32.mxu0 %v281_v38  ;;  %v181_v38 = vld [vmem:[%s7977_s1 + $0xe8] sm:$0xff] }
 0x128   : > { %1798 = vmatmul.mubr.f32.gmra.mrb[42].mxu1 %v280_v39  ;;  %1080 = vmatmul.mubr.f32.gmra.mrb[42].mxu0 %v280_v39  ;;  %v4810_v39 = vpack.c.bf16 %v4095_v32, %v4092_v30  ;;  %v211_v30 = vld [vmem:[%s7977_s1 + $0x1d8] sm:$0xff] }
 0x129   : > { %1802 = vmatprep.mubr.f32.mxu1 %v287_v40  ;;  %1085 = vmatprep.mubr.f32.mxu0 %v287_v40  ;;  %v4998_v40 = vpack.c.bf16 %v4097_v34, %v4094_v33  ;;  %v4128_v33 = vld [vmem:[%s5889_s17 + $0xab0] sm:$0xff] }
 0x12c   : > { %1803 = vmatmul.mubr.f32.gmra.mrb[44].mxu1 %v286_v41  ;;  %1086 = vmatmul.mubr.f32.gmra.mrb[44].mxu0 %v286_v41  ;;  %v4098_v41 = vld [vmem:[%s5889_s17 + $0x9c0] sm:$0xff] }
 0x12d   : > { %1807 = vmatprep.mubr.f32.mxu1 %v293_v42  ;;  %1091 = vmatprep.mubr.f32.mxu0 %v293_v42  ;;  %v4812_v42 = vpack.c.bf16 %v4102_v36, %v4099_v35  ;;  %v4131_v35 = vld [vmem:[%s5889_s17 + $0xac8] sm:$0xff]  ;;  %v4130_v36 = vld [vmem:[%s5889_s17 + $0xac0] sm:$0xff] }
 0x130   : > { %1808 = vmatmul.mubr.f32.gmra.mrb[46].mxu1 %v292_v43  ;;  %1092 = vmatmul.mubr.f32.gmra.mrb[46].mxu0 %v292_v43  ;;  %v4101_v43 = vld [vmem:[%s5889_s17 + $0x9d8] sm:$0xff] }
 0x131   : > { %1812 = vmatprep.mubr.f32.mxu1 %v299_v44  ;;  %1097 = vmatprep.mubr.f32.mxu0 %v299_v44  ;;  %v4100_v44 = vld [vmem:[%s5889_s17 + $0x9d0] sm:$0xff] }
 0x134   : > { %1813 = vmatmul.mubr.f32.gmra.mrb[48].mxu1 %v298_v45  ;;  %1098 = vmatmul.mubr.f32.gmra.mrb[48].mxu0 %v298_v45  ;;  %v4103_v45 = vld [vmem:[%s5889_s17 + $0x9e8] sm:$0xff] }
 0x135   : > { %1817 = vmatprep.mubr.f32.mxu1 %v305_v46  ;;  %1103 = vmatprep.mubr.f32.mxu0 %v305_v46  ;;  %v4105_v46 = vld [vmem:[%s5889_s17 + $0x9f8] sm:$0xff] }
 0x138   : > { %1818 = vmatmul.mubr.f32.gmra.mrb[50].mxu1 %v304_v47  ;;  %1104 = vmatmul.mubr.f32.gmra.mrb[50].mxu0 %v304_v47  ;;  %v4108_v47 = vld [vmem:[%s5889_s17 + $0xa10] sm:$0xff] }
 0x139   : > { %1822 = vmatprep.mubr.f32.mxu1 %v311_v48  ;;  %1109 = vmatprep.mubr.f32.mxu0 %v311_v48  ;;  %v180_v48 = vld [vmem:[%s7977_s1 + $0xe0] sm:$0xff] }
 0x13c   : > { %1823 = vmatmul.mubr.f32.gmra.mrb[52].mxu1 %v310_v49  ;;  %1110 = vmatmul.mubr.f32.gmra.mrb[52].mxu0 %v310_v49  ;;  %v187_v49 = vld [vmem:[%s7977_s1 + $0x118] sm:$0xff] }
 0x13d   : > { %1827 = vmatprep.mubr.f32.mxu1 %v317_v50  ;;  %1115 = vmatprep.mubr.f32.mxu0 %v317_v50  ;;  %v4814_v50 = vpack.c.bf16 %v4101_v43, %v4098_v41  ;;  %v217_v41 = vld [vmem:[%s7977_s1 + $0x208] sm:$0xff] }
 0x140   : > { %1828 = vmatmul.mubr.f32.gmra.mrb[54].mxu1 %v316_v51  ;;  %1116 = vmatmul.mubr.f32.gmra.mrb[54].mxu0 %v316_v51  ;;  %v5001_v51 = vpack.c.bf16 %v4103_v45, %v4100_v44  ;;  %v4134_v44 = vld [vmem:[%s5889_s17 + $0xae0] sm:$0xff] }
 0x141   : > { %1832 = vmatprep.mubr.f32.mxu1 %v323_v52  ;;  %1121 = vmatprep.mubr.f32.mxu0 %v323_v52  ;;  %v4104_v52 = vld [vmem:[%s5889_s17 + $0x9f0] sm:$0xff] }
 0x144   : > { %1833 = vmatmul.mubr.f32.gmra.mrb[56].mxu1 %v322_v53  ;;  %1122 = vmatmul.mubr.f32.gmra.mrb[56].mxu0 %v322_v53  ;;  %v4816_v53 = vpack.c.bf16 %v4108_v47, %v4105_v46  ;;  %v4137_v46 = vld [vmem:[%s5889_s17 + $0xaf8] sm:$0xff]  ;;  %v4136_v47 = vld [vmem:[%s5889_s17 + $0xaf0] sm:$0xff] }
 0x145   : > { %1837 = vmatprep.mubr.f32.mxu1 %v329_v54  ;;  %1127 = vmatprep.mubr.f32.mxu0 %v329_v54  ;;  %v4107_v54 = vld [vmem:[%s5889_s17 + $0xa08] sm:$0xff] }
 0x146   : > { %v4818_v61 = vpack.c.bf16 %v4107_v54, %v4104_v52  ;;  %v223_v52 = vld [vmem:[%s7977_s1 + $0x238] sm:$0xff] }
 0x148   : > { %1838 = vmatmul.mubr.f32.gmra.mrb[58].mxu1 %v328_v55  ;;  %1128 = vmatmul.mubr.f32.gmra.mrb[58].mxu0 %v328_v55  ;;  %v4106_v55 = vld [vmem:[%s5889_s17 + $0xa00] sm:$0xff] }
 0x149   : > { %1842 = vmatprep.mubr.f32.mxu1 %v335_v56  ;;  %1133 = vmatprep.mubr.f32.mxu0 %v335_v56  ;;  %v4109_v56 = vld [vmem:[%s5889_s17 + $0xa18] sm:$0xff] }
 0x14a   : > { %v5004_v62 = vpack.c.bf16 %v4109_v56, %v4106_v55  ;;  %v4140_v55 = vld [vmem:[%s5889_s17 + $0xb10] sm:$0xff] }
 0x14c   : > { %1843 = vmatmul.mubr.f32.gmra.mrb[60].mxu1 %v334_v57  ;;  %1134 = vmatmul.mubr.f32.gmra.mrb[60].mxu0 %v334_v57  ;;  %v4111_v57 = vld [vmem:[%s5889_s17 + $0xa28] sm:$0xff] }
 0x14d   : > { %1847 = vmatprep.mubr.f32.mxu1 %v341_v58  ;;  %1139 = vmatprep.mubr.f32.mxu0 %v341_v58  ;;  %v4114_v58 = vld [vmem:[%s5889_s17 + $0xa40] sm:$0xff] }
 0x14e   : > { %v4820_v0 = vpack.c.bf16 %v4114_v58, %v4111_v57  ;;  %v4143_v57 = vld [vmem:[%s5889_s17 + $0xb28] sm:$0xff]  ;;  %v4142_v58 = vld [vmem:[%s5889_s17 + $0xb20] sm:$0xff] }
 0x150   : > { %1848 = vmatmul.mubr.f32.gmra.mrb[62].mxu1 %v340_v59  ;;  %1140 = vmatmul.mubr.f32.gmra.mrb[62].mxu0 %v340_v59  ;;  %v186_v59 = vld [vmem:[%s7977_s1 + $0x110] sm:$0xff] }
 0x151   : > { %1917 = vmatprep.mubr.f32.mxu1 %v157_v60  ;;  %1210 = vmatprep.mubr.f32.mxu0 %v157_v60  ;;  %v193_v60 = vld [vmem:[%s7977_s1 + $0x148] sm:$0xff] }
 0x154   : > { %1918 = vmatmul.mubr.f32.vlgmr.msra.gmra.mrb[0].mxu1 %v156_v4  ;;  %1211 = vmatmul.mubr.f32.vlgmr.msra.gmra.mrb[0].mxu0 %v156_v4  ;;  %v4115_v4 = vld [vmem:[%s5889_s17 + $0xa48] sm:$0xff] }
 0x155   : > { %4799 = vmatpush1.bf16.msra.mxu0 %v4798_v5  ;;  %1922 = vmatprep.mubr.f32.mxu1 %v163_v6  ;;  %v4117_v5 = vld [vmem:[%s5889_s17 + $0xa58] sm:$0xff]  ;;  %v5007_v10 = vpack.c.bf16 %v4115_v4, %v4112_v3  ;;  %v4146_v3 = vld [vmem:[%s5889_s17 + $0xb40] sm:$0xff] }
 0x156   : > { %4990 = vmatpush1.bf16.msra.mxu1 %v4989_v7  ;;  %1216 = vmatprep.mubr.f32.mxu0 %v163_v6  ;;  %v4120_v6 = vld [vmem:[%s5889_s17 + $0xa70] sm:$0xff]  ;;  %v192_v7 = vld [vmem:[%s7977_s1 + $0x140] sm:$0xff] }
 0x157   : > { %4801 = vmatprep.subr.bf16.mxu0 %v4800_v9  ;;  %4991 = vmatprep.subr.bf16.mxu1 %v5855_v1  ;;  %v4822_v9 = vpack.c.bf16 %v4113_v2, %v4110_v63  ;;  %v4824_v12 = vpack.c.bf16 %v4120_v6, %v4117_v5  ;;  %v229_v63 = vld [vmem:[%s7977_s1 + $0x268] sm:$0xff]  ;;  %v4149_v5 = vld [vmem:[%s5889_s17 + $0xb58] sm:$0xff]  ;;  %v4148_v6 = vld [vmem:[%s5889_s17 + $0xb50] sm:$0xff] }
 0x158   : > { %1923 = vmatmul.mubr.f32.gmra.mrb[2].mxu1 %v162_v15  ;;  %1217 = vmatmul.mubr.f32.gmra.mrb[2].mxu0 %v162_v15  ;;  %v4121_v15 = vld [vmem:[%s5889_s17 + $0xa78] sm:$0xff] }
 0x159   : > { %1927 = vmatprep.mubr.f32.mxu1 %v169_v16  ;;  %1222 = vmatprep.mubr.f32.mxu0 %v169_v16  ;;  %v4123_v16 = vld [vmem:[%s5889_s17 + $0xa88] sm:$0xff]  ;;  %v5010_v21 = vpack.c.bf16 %v4121_v15, %v4118_v14  ;;  %v4152_v14 = vld [vmem:[%s5889_s17 + $0xb70] sm:$0xff] }
 0x15a   : > { %4803 = vmatpush1.bf16.msra.mxu0 %v4802_v17  ;;  %4993 = vmatpush1.bf16.msra.mxu1 %v4992_v18  ;;  %v4126_v17 = vld [vmem:[%s5889_s17 + $0xaa0] sm:$0xff]  ;;  %v198_v18 = vld [vmem:[%s7977_s1 + $0x170] sm:$0xff] }
 0x15b   : > { %4805 = vmatprep.subr.bf16.mxu0 %v4804_v20  ;;  %4994 = vmatprep.subr.bf16.mxu1 %v5855_v1  ;;  %v4826_v20 = vpack.c.bf16 %v4119_v13, %v4116_v11  ;;  %v4828_v23 = vpack.c.bf16 %v4126_v17, %v4123_v16  ;;  %v235_v11 = vld [vmem:[%s7977_s1 + $0x298] sm:$0xff]  ;;  %v4155_v16 = vld [vmem:[%s5889_s17 + $0xb88] sm:$0xff]  ;;  %v4154_v17 = vld [vmem:[%s5889_s17 + $0xb80] sm:$0xff] }
 0x15c   : > { %1928 = vmatmul.mubr.f32.gmra.mrb[4].mxu1 %v168_v26  ;;  %1223 = vmatmul.mubr.f32.gmra.mrb[4].mxu0 %v168_v26  ;;  %v4127_v26 = vld [vmem:[%s5889_s17 + $0xaa8] sm:$0xff] }
 0x15d   : > { %1932 = vmatprep.mubr.f32.mxu1 %v175_v27  ;;  %1228 = vmatprep.mubr.f32.mxu0 %v175_v27  ;;  %v4129_v27 = vld [vmem:[%s5889_s17 + $0xab8] sm:$0xff]  ;;  %v5013_v32 = vpack.c.bf16 %v4127_v26, %v4124_v25  ;;  %v4158_v25 = vld [vmem:[%s5889_s17 + $0xba0] sm:$0xff] }
 0x15e   : > { %4807 = vmatpush1.bf16.msra.mxu0 %v4806_v28  ;;  %4996 = vmatpush1.bf16.msra.mxu1 %v4995_v29  ;;  %v4132_v28 = vld [vmem:[%s5889_s17 + $0xad0] sm:$0xff]  ;;  %v204_v29 = vld [vmem:[%s7977_s1 + $0x1a0] sm:$0xff] }
 0x15f   : > { %4809 = vmatprep.subr.bf16.mxu0 %v4808_v31  ;;  %4997 = vmatprep.subr.bf16.mxu1 %v5855_v1  ;;  %v4830_v31 = vpack.c.bf16 %v4125_v24, %v4122_v22  ;;  %v4832_v34 = vpack.c.bf16 %v4132_v28, %v4129_v27  ;;  %v241_v22 = vld [vmem:[%s7977_s1 + $0x2c8] sm:$0xff]  ;;  %v4161_v27 = vld [vmem:[%s5889_s17 + $0xbb8] sm:$0xff]  ;;  %v4160_v28 = vld [vmem:[%s5889_s17 + $0xbb0] sm:$0xff] }
 0x160   : > { %1933 = vmatmul.mubr.f32.gmra.mrb[6].mxu1 %v174_v37  ;;  %1229 = vmatmul.mubr.f32.gmra.mrb[6].mxu0 %v174_v37  ;;  %v4133_v37 = vld [vmem:[%s5889_s17 + $0xad8] sm:$0xff] }
 0x161   : > { %1937 = vmatprep.mubr.f32.mxu1 %v181_v38  ;;  %1234 = vmatprep.mubr.f32.mxu0 %v181_v38  ;;  %v4135_v38 = vld [vmem:[%s5889_s17 + $0xae8] sm:$0xff]  ;;  %v5016_v43 = vpack.c.bf16 %v4133_v37, %v4130_v36  ;;  %v4164_v36 = vld [vmem:[%s5889_s17 + $0xbd0] sm:$0xff] }
 0x162   : > { %4811 = vmatpush1.bf16.msra.mxu0 %v4810_v39  ;;  %4999 = vmatpush1.bf16.msra.mxu1 %v4998_v40  ;;  %v4138_v39 = vld [vmem:[%s5889_s17 + $0xb00] sm:$0xff]  ;;  %v210_v40 = vld [vmem:[%s7977_s1 + $0x1d0] sm:$0xff] }
 0x163   : > { %4813 = vmatprep.subr.bf16.mxu0 %v4812_v42  ;;  %5000 = vmatprep.subr.bf16.mxu1 %v5855_v1  ;;  %v4834_v42 = vpack.c.bf16 %v4131_v35, %v4128_v33  ;;  %v4836_v45 = vpack.c.bf16 %v4138_v39, %v4135_v38  ;;  %v247_v33 = vld [vmem:[%s7977_s1 + $0x2f8] sm:$0xff]  ;;  %v4167_v38 = vld [vmem:[%s5889_s17 + $0xbe8] sm:$0xff]  ;;  %v4166_v39 = vld [vmem:[%s5889_s17 + $0xbe0] sm:$0xff] }
 0x164   : > { %1938 = vmatmul.mubr.f32.gmra.mrb[8].mxu1 %v180_v48  ;;  %1235 = vmatmul.mubr.f32.gmra.mrb[8].mxu0 %v180_v48  ;;  %v4139_v48 = vld [vmem:[%s5889_s17 + $0xb08] sm:$0xff] }
 0x165   : > { %1942 = vmatprep.mubr.f32.mxu1 %v187_v49  ;;  %1240 = vmatprep.mubr.f32.mxu0 %v187_v49  ;;  %v4141_v49 = vld [vmem:[%s5889_s17 + $0xb18] sm:$0xff]  ;;  %v5019_v54 = vpack.c.bf16 %v4139_v48, %v4136_v47  ;;  %v252_v48 = vld [vmem:[%s7977_s1 + $0x320] sm:$0xff] }
 0x166   : > { %4815 = vmatpush1.bf16.msra.mxu0 %v4814_v50  ;;  %5002 = vmatpush1.bf16.msra.mxu1 %v5001_v51  ;;  %v4144_v50 = vld [vmem:[%s5889_s17 + $0xb30] sm:$0xff]  ;;  %v216_v51 = vld [vmem:[%s7977_s1 + $0x200] sm:$0xff] }
 0x167   : > { %4817 = vmatprep.subr.bf16.mxu0 %v4816_v53  ;;  %5003 = vmatprep.subr.bf16.mxu1 %v5855_v1  ;;  %v4838_v53 = vpack.c.bf16 %v4137_v46, %v4134_v44  ;;  %v4840_v56 = vpack.c.bf16 %v4144_v50, %v4141_v49  ;;  %v253_v44 = vld [vmem:[%s7977_s1 + $0x328] sm:$0xff]  ;;  %v259_v49 = vld [vmem:[%s7977_s1 + $0x358] sm:$0xff]  ;;  %v258_v50 = vld [vmem:[%s7977_s1 + $0x350] sm:$0xff] }
 0x168   : > { %1943 = vmatmul.mubr.f32.gmra.mrb[10].mxu1 %v186_v59  ;;  %1241 = vmatmul.mubr.f32.gmra.mrb[10].mxu0 %v186_v59  ;;  %v4145_v59 = vld [vmem:[%s5889_s17 + $0xb38] sm:$0xff] }
 0x169   : > { %1947 = vmatprep.mubr.f32.mxu1 %v193_v60  ;;  %1246 = vmatprep.mubr.f32.mxu0 %v193_v60  ;;  %v4147_v60 = vld [vmem:[%s5889_s17 + $0xb48] sm:$0xff]  ;;  %v5022_v2 = vpack.c.bf16 %v4145_v59, %v4142_v58  ;;  %v282_v58 = vld [vmem:[%s7977_s1 + $0x410] sm:$0xff] }
 0x16a   : > { %4819 = vmatpush1.bf16.msra.mxu0 %v4818_v61  ;;  %5005 = vmatpush1.bf16.msra.mxu1 %v5004_v62  ;;  %v4150_v61 = vld [vmem:[%s5889_s17 + $0xb60] sm:$0xff]  ;;  %v222_v62 = vld [vmem:[%s7977_s1 + $0x230] sm:$0xff]  ;;  %v289_v59 = vld [vmem:[%s7977_s1 + $0x448] sm:$0xff] }
 0x16b   : > { %4821 = vmatprep.subr.bf16.mxu0 %v4820_v0  ;;  %5006 = vmatprep.subr.bf16.mxu1 %v5855_v1  ;;  %v4842_v0 = vpack.c.bf16 %v4143_v57, %v4140_v55  ;;  %v4844_v4 = vpack.c.bf16 %v4150_v61, %v4147_v60  ;;  %v277_v55 = vld [vmem:[%s7977_s1 + $0x3e8] sm:$0xff]  ;;  %v283_v57 = vld [vmem:[%s7977_s1 + $0x418] sm:$0xff]  ;;  %v288_v60 = vld [vmem:[%s7977_s1 + $0x440] sm:$0xff] }
 0x16c   : > { %1948 = vmatmul.mubr.f32.gmra.mrb[12].mxu1 %v192_v7  ;;  %1247 = vmatmul.mubr.f32.gmra.mrb[12].mxu0 %v192_v7  ;;  %v4151_v7 = vld [vmem:[%s5889_s17 + $0xb68] sm:$0xff]  ;;  %v295_v61 = vld [vmem:[%s7977_s1 + $0x478] sm:$0xff] }
 0x16d   : > { %1952 = vmatprep.mubr.f32.mxu1 %v199_v8  ;;  %1252 = vmatprep.mubr.f32.mxu0 %v199_v8  ;;  %v4153_v8 = vld [vmem:[%s5889_s17 + $0xb78] sm:$0xff]  ;;  %v5025_v13 = vpack.c.bf16 %v4151_v7, %v4148_v6  ;;  %v318_v7 = vld [vmem:[%s7977_s1 + $0x530] sm:$0xff] }
 0x16e   : > { %4823 = vmatpush1.bf16.msra.mxu0 %v4822_v9  ;;  %5008 = vmatpush1.bf16.msra.mxu1 %v5007_v10  ;;  %v4156_v9 = vld [vmem:[%s5889_s17 + $0xb90] sm:$0xff]  ;;  %v228_v10 = vld [vmem:[%s7977_s1 + $0x260] sm:$0xff]  ;;  %v319_v6 = vld [vmem:[%s7977_s1 + $0x538] sm:$0xff] }
 0x16f   : > { %4825 = vmatprep.subr.bf16.mxu0 %v4824_v12  ;;  %5009 = vmatprep.subr.bf16.mxu1 %v5855_v1  ;;  %v4846_v12 = vpack.c.bf16 %v4149_v5, %v4146_v3  ;;  %v4848_v15 = vpack.c.bf16 %v4156_v9, %v4153_v8  ;;  %v306_v3 = vld [vmem:[%s7977_s1 + $0x4d0] sm:$0xff]  ;;  %v312_v5 = vld [vmem:[%s7977_s1 + $0x500] sm:$0xff]  ;;  %v325_v8 = vld [vmem:[%s7977_s1 + $0x568] sm:$0xff] }
 0x170   : > { %1953 = vmatmul.mubr.f32.gmra.mrb[14].mxu1 %v198_v18  ;;  %1253 = vmatmul.mubr.f32.gmra.mrb[14].mxu0 %v198_v18  ;;  %v4157_v18 = vld [vmem:[%s5889_s17 + $0xb98] sm:$0xff]  ;;  %v324_v9 = vld [vmem:[%s7977_s1 + $0x560] sm:$0xff] }
 0x171   : > { %1957 = vmatprep.mubr.f32.mxu1 %v205_v19  ;;  %1258 = vmatprep.mubr.f32.mxu0 %v205_v19  ;;  %v4159_v19 = vld [vmem:[%s5889_s17 + $0xba8] sm:$0xff]  ;;  %v5028_v24 = vpack.c.bf16 %v4157_v18, %v4154_v17  ;;  %v4173_v17 = vld [vmem:[%s5889_s17 + $0xc18] sm:$0xff]  ;;  %v4172_v18 = vld [vmem:[%s5889_s17 + $0xc10] sm:$0xff] }
 0x172   : > { %4827 = vmatpush1.bf16.msra.mxu0 %v4826_v20  ;;  %5011 = vmatpush1.bf16.msra.mxu1 %v5010_v21  ;;  %v4162_v20 = vld [vmem:[%s5889_s17 + $0xbc0] sm:$0xff]  ;;  %v234_v21 = vld [vmem:[%s7977_s1 + $0x290] sm:$0xff] }
 0x173   : > { %4829 = vmatprep.subr.bf16.mxu0 %v4828_v23  ;;  %5012 = vmatprep.subr.bf16.mxu1 %v5855_v1  ;;  %v4850_v23 = vpack.c.bf16 %v4155_v16, %v4152_v14  ;;  %v4852_v26 = vpack.c.bf16 %v4162_v20, %v4159_v19  ;;  %v343_v14 = vld [vmem:[%s7977_s1 + $0x5f8] sm:$0xff]  ;;  %v4170_v16 = vld [vmem:[%s5889_s17 + $0xc00] sm:$0xff]  ;;  %v4175_v19 = vld [vmem:[%s5889_s17 + $0xc28] sm:$0xff] }
 0x174   : > { %1958 = vmatmul.mubr.f32.gmra.mrb[16].mxu1 %v204_v29  ;;  %1259 = vmatmul.mubr.f32.gmra.mrb[16].mxu0 %v204_v29  ;;  %v4163_v29 = vld [vmem:[%s5889_s17 + $0xbc8] sm:$0xff]  ;;  %v4177_v20 = vld [vmem:[%s5889_s17 + $0xc38] sm:$0xff] }
 0x175   : > { %1962 = vmatprep.mubr.f32.mxu1 %v211_v30  ;;  %1264 = vmatprep.mubr.f32.mxu0 %v211_v30  ;;  %v4165_v30 = vld [vmem:[%s5889_s17 + $0xbd8] sm:$0xff]  ;;  %v5031_v35 = vpack.c.bf16 %v4163_v29, %v4160_v28  ;;  %v4178_v28 = vld [vmem:[%s5889_s17 + $0xc40] sm:$0xff] }
 0x176   : > { %4831 = vmatpush1.bf16.msra.mxu0 %v4830_v31  ;;  %5014 = vmatpush1.bf16.msra.mxu1 %v5013_v32  ;;  %v4168_v31 = vld [vmem:[%s5889_s17 + $0xbf0] sm:$0xff]  ;;  %v240_v32 = vld [vmem:[%s7977_s1 + $0x2c0] sm:$0xff]  ;;  %v4181_v29 = vld [vmem:[%s5889_s17 + $0xc58] sm:$0xff] }
 0x177   : > { %4833 = vmatprep.subr.bf16.mxu0 %v4832_v34  ;;  %5015 = vmatprep.subr.bf16.mxu1 %v5855_v1  ;;  %v4854_v34 = vpack.c.bf16 %v4161_v27, %v4158_v25  ;;  %v4856_v37 = vpack.c.bf16 %v4168_v31, %v4165_v30  ;;  %v4176_v25 = vld [vmem:[%s5889_s17 + $0xc30] sm:$0xff]  ;;  %v4179_v27 = vld [vmem:[%s5889_s17 + $0xc48] sm:$0xff]  ;;  %v5656_v30 = vld [vmem:[%s7977_s1] sm:$0xff] }
 0x178   : > { %1963 = vmatmul.mubr.f32.gmra.mrb[18].mxu1 %v210_v40  ;;  %1265 = vmatmul.mubr.f32.gmra.mrb[18].mxu0 %v210_v40  ;;  %v4169_v40 = vld [vmem:[%s5889_s17 + $0xbf8] sm:$0xff]  ;;  %v4183_v31 = vld [vmem:[%s5889_s17 + $0xc68] sm:$0xff] }
 0x179   : > { %1967 = vmatprep.mubr.f32.mxu1 %v217_v41  ;;  %1270 = vmatprep.mubr.f32.mxu0 %v217_v41  ;;  %v4171_v41 = vld [vmem:[%s5889_s17 + $0xc08] sm:$0xff]  ;;  %v5034_v46 = vpack.c.bf16 %v4169_v40, %v4166_v39  ;;  %v4184_v39 = vld [vmem:[%s5889_s17 + $0xc70] sm:$0xff] }
 0x17a   : > { %4835 = vmatpush1.bf16.msra.mxu0 %v4834_v42  ;;  %5017 = vmatpush1.bf16.msra.mxu1 %v5016_v43  ;;  %v4174_v42 = vld [vmem:[%s5889_s17 + $0xc20] sm:$0xff]  ;;  %v246_v43 = vld [vmem:[%s7977_s1 + $0x2f0] sm:$0xff]  ;;  %v4187_v40 = vld [vmem:[%s5889_s17 + $0xc88] sm:$0xff] }
 0x17b   : > { %4837 = vmatprep.subr.bf16.mxu0 %v4836_v45  ;;  %5018 = vmatprep.subr.bf16.mxu1 %v5855_v1  ;;  %v4858_v45 = vpack.c.bf16 %v4167_v38, %v4164_v36  ;;  %v4860_v47 = vpack.c.bf16 %v4174_v42, %v4171_v41  ;;  %v4182_v36 = vld [vmem:[%s5889_s17 + $0xc60] sm:$0xff]  ;;  %v4185_v38 = vld [vmem:[%s5889_s17 + $0xc78] sm:$0xff]  ;;  %v5658_v41 = vld [vmem:[%s7977_s1 + $0x30] sm:$0xff] }
 0x17c   : > { %1968 = vmatmul.mubr.f32.gmra.mrb[20].mxu1 %v216_v51  ;;  %1271 = vmatmul.mubr.f32.gmra.mrb[20].mxu0 %v216_v51  ;;  %v265_v51 = vld [vmem:[%s7977_s1 + $0x388] sm:$0xff]  ;;  %v4189_v42 = vld [vmem:[%s5889_s17 + $0xc98] sm:$0xff] }
 0x17d   : > { %1972 = vmatprep.mubr.f32.mxu1 %v223_v52  ;;  %1276 = vmatprep.mubr.f32.mxu0 %v223_v52  ;;  %v264_v52 = vld [vmem:[%s7977_s1 + $0x380] sm:$0xff] }
 0x17e   : > { %4839 = vmatpush1.bf16.msra.mxu0 %v4838_v53  ;;  %5020 = vmatpush1.bf16.msra.mxu1 %v5019_v54  ;;  %v271_v53 = vld [vmem:[%s7977_s1 + $0x3b8] sm:$0xff]  ;;  %v270_v54 = vld [vmem:[%s7977_s1 + $0x3b0] sm:$0xff] }
 0x17f   : > { %4841 = vmatprep.subr.bf16.mxu0 %v4840_v56  ;;  %5021 = vmatprep.subr.bf16.mxu1 %v5855_v1  ;;  %v276_v56 = vld [vmem:[%s7977_s1 + $0x3e0] sm:$0xff] }
 0x180   : > { %1973 = vmatmul.mubr.f32.gmra.mrb[22].mxu1 %v222_v62  ;;  %1277 = vmatmul.mubr.f32.gmra.mrb[22].mxu0 %v222_v62  ;;  %v294_v62 = vld [vmem:[%s7977_s1 + $0x470] sm:$0xff] }
 0x181   : > { %1977 = vmatprep.mubr.f32.mxu1 %v229_v63  ;;  %1282 = vmatprep.mubr.f32.mxu0 %v229_v63  ;;  %v301_v63 = vld [vmem:[%s7977_s1 + $0x4a8] sm:$0xff] }
 0x182   : > { %4843 = vmatpush1.bf16.msra.mxu0 %v4842_v0  ;;  %5023 = vmatpush1.bf16.msra.mxu1 %v5022_v2  ;;  %v300_v0 = vld [vmem:[%s7977_s1 + $0x4a0] sm:$0xff]  ;;  %v307_v2 = vld [vmem:[%s7977_s1 + $0x4d8] sm:$0xff] }
 0x183   : > { %4845 = vmatprep.subr.bf16.mxu0 %v4844_v4  ;;  %5024 = vmatprep.subr.bf16.mxu1 %v5855_v1  ;;  %v313_v4 = vld [vmem:[%s7977_s1 + $0x508] sm:$0xff] }
 0x184   : > { %1978 = vmatmul.mubr.f32.gmra.mrb[24].mxu1 %v228_v10  ;;  %1283 = vmatmul.mubr.f32.gmra.mrb[24].mxu0 %v228_v10  ;;  %v331_v10 = vld [vmem:[%s7977_s1 + $0x598] sm:$0xff] }
 0x185   : > { %1982 = vmatprep.mubr.f32.mxu1 %v235_v11  ;;  %1288 = vmatprep.mubr.f32.mxu0 %v235_v11  ;;  %v330_v11 = vld [vmem:[%s7977_s1 + $0x590] sm:$0xff] }
 0x186   : > { %4847 = vmatpush1.bf16.msra.mxu0 %v4846_v12  ;;  %5026 = vmatpush1.bf16.msra.mxu1 %v5025_v13  ;;  %v337_v12 = vld [vmem:[%s7977_s1 + $0x5c8] sm:$0xff]  ;;  %v336_v13 = vld [vmem:[%s7977_s1 + $0x5c0] sm:$0xff] }
 0x187   : > { %4849 = vmatprep.subr.bf16.mxu0 %v4848_v15  ;;  %5027 = vmatprep.subr.bf16.mxu1 %v5855_v1  ;;  %v342_v15 = vld [vmem:[%s7977_s1 + $0x5f0] sm:$0xff] }
 0x188   : > { %1983 = vmatmul.mubr.f32.gmra.mrb[26].mxu1 %v234_v21  ;;  %1289 = vmatmul.mubr.f32.gmra.mrb[26].mxu0 %v234_v21  ;;  %v4180_v21 = vld [vmem:[%s5889_s17 + $0xc50] sm:$0xff] }
 0x189   : > { %1987 = vmatprep.mubr.f32.mxu1 %v241_v22  ;;  %1294 = vmatprep.mubr.f32.mxu0 %v241_v22  ;;  %v5655_v22 = vld [vmem:[%s7977_s1 + $0x8] sm:$0xff] }
 0x18a   : > { %4851 = vmatpush1.bf16.msra.mxu0 %v4850_v23  ;;  %5029 = vmatpush1.bf16.msra.mxu1 %v5028_v24  ;;  %v4862_v23 = vpack.c.bf16 %v4173_v17, %v4170_v16  ;;  %v5037_v24 = vpack.c.bf16 %v4175_v19, %v4172_v18  ;;  %v4206_v17 = vld [vmem:[%s5889_s17 + $0xd20] sm:$0xff]  ;;  %v4209_v19 = vld [vmem:[%s5889_s17 + $0xd38] sm:$0xff] }
 0x18b   : > { %4853 = vmatprep.subr.bf16.mxu0 %v4852_v26  ;;  %5030 = vmatprep.subr.bf16.mxu1 %v5855_v1  ;;  %v4864_v26 = vpack.c.bf16 %v4180_v21, %v4177_v20  ;;  %v4208_v20 = vld [vmem:[%s5889_s17 + $0xd30] sm:$0xff]  ;;  %v4211_v21 = vld [vmem:[%s5889_s17 + $0xd48] sm:$0xff] }
 0x18c   : > { %1988 = vmatmul.mubr.f32.gmra.mrb[28].mxu1 %v240_v32  ;;  %1295 = vmatmul.mubr.f32.gmra.mrb[28].mxu0 %v240_v32  ;;  %v4186_v32 = vld [vmem:[%s5889_s17 + $0xc80] sm:$0xff] }
 0x18d   : > { %1992 = vmatprep.mubr.f32.mxu1 %v247_v33  ;;  %1300 = vmatprep.mubr.f32.mxu0 %v247_v33  ;;  %v5657_v33 = vld [vmem:[%s7977_s1 + $0x38] sm:$0xff] }
 0x18e   : > { %4855 = vmatpush1.bf16.msra.mxu0 %v4854_v34  ;;  %5032 = vmatpush1.bf16.msra.mxu1 %v5031_v35  ;;  %v4866_v34 = vpack.c.bf16 %v4179_v27, %v4176_v25  ;;  %v5040_v35 = vpack.c.bf16 %v4181_v29, %v4178_v28  ;;  %v5667_v25 = vld [vmem:[%s7977_s1 + $0x128] sm:$0xff]  ;;  %v5055_v27 = vpack.c.bf16 %v4211_v21, %v4208_v20  ;;  %v4212_v28 = vld [vmem:[%s5889_s17 + $0xd50] sm:$0xff]  ;;  %v4242_v20 = vld [vmem:[%s5889_s17 + $0xe40] sm:$0xff] }
 0x18f   : > { %4857 = vmatprep.subr.bf16.mxu0 %v4856_v37  ;;  %5033 = vmatprep.subr.bf16.mxu1 %v5855_v1  ;;  %v4868_v37 = vpack.c.bf16 %v4186_v32, %v4183_v31  ;;  %v4214_v31 = vld [vmem:[%s5889_s17 + $0xd60] sm:$0xff]  ;;  %v4217_v32 = vld [vmem:[%s5889_s17 + $0xd78] sm:$0xff] }
 0x190   : > { %1993 = vmatmul.mubr.f32.gmra.mrb[30].mxu1 %v246_v43  ;;  %1301 = vmatmul.mubr.f32.gmra.mrb[30].mxu0 %v246_v43  ;;  %v4192_v43 = vld [vmem:[%s5889_s17 + $0xcb0] sm:$0xff] }
 0x191   : > { %1997 = vmatprep.mubr.f32.mxu1 %v253_v44  ;;  %1306 = vmatprep.mubr.f32.mxu0 %v253_v44  ;;  %v5659_v44 = vld [vmem:[%s7977_s1 + $0x68] sm:$0xff] }
 0x192   : > { %4859 = vmatpush1.bf16.msra.mxu0 %v4858_v45  ;;  %5035 = vmatpush1.bf16.msra.mxu1 %v5034_v46  ;;  %v4870_v45 = vpack.c.bf16 %v4185_v38, %v4182_v36  ;;  %v5043_v46 = vpack.c.bf16 %v4187_v40, %v4184_v39  ;;  %v5669_v36 = vld [vmem:[%s7977_s1 + $0x158] sm:$0xff]  ;;  %v5058_v38 = vpack.c.bf16 %v4217_v32, %v4214_v31  ;;  %v4218_v39 = vld [vmem:[%s5889_s17 + $0xd80] sm:$0xff]  ;;  %v4248_v31 = vld [vmem:[%s5889_s17 + $0xe70] sm:$0xff] }
 0x193   : > { %4861 = vmatprep.subr.bf16.mxu0 %v4860_v47  ;;  %5036 = vmatprep.subr.bf16.mxu1 %v5855_v1  ;;  %v4188_v47 = vld [vmem:[%s5889_s17 + $0xc90] sm:$0xff] }
 0x194   : > { %1998 = vmatmul.mubr.f32.gmra.mrb[32].mxu1 %v252_v48  ;;  %1307 = vmatmul.mubr.f32.gmra.mrb[32].mxu0 %v252_v48  ;;  %v4872_v48 = vpack.c.bf16 %v4192_v43, %v4189_v42  ;;  %v4220_v42 = vld [vmem:[%s5889_s17 + $0xd90] sm:$0xff]  ;;  %v4223_v43 = vld [vmem:[%s5889_s17 + $0xda8] sm:$0xff] }
 0x195   : > { %2002 = vmatprep.mubr.f32.mxu1 %v259_v49  ;;  %1312 = vmatprep.mubr.f32.mxu0 %v259_v49  ;;  %v4191_v49 = vld [vmem:[%s5889_s17 + $0xca8] sm:$0xff] }
 0x198   : > { %2003 = vmatmul.mubr.f32.gmra.mrb[34].mxu1 %v258_v50  ;;  %1313 = vmatmul.mubr.f32.gmra.mrb[34].mxu0 %v258_v50  ;;  %v4190_v50 = vld [vmem:[%s5889_s17 + $0xca0] sm:$0xff] }
 0x199   : > { %2007 = vmatprep.mubr.f32.mxu1 %v265_v51  ;;  %1318 = vmatprep.mubr.f32.mxu0 %v265_v51  ;;  %v4193_v51 = vld [vmem:[%s5889_s17 + $0xcb8] sm:$0xff] }
 0x19c   : > { %2008 = vmatmul.mubr.f32.gmra.mrb[36].mxu1 %v264_v52  ;;  %1319 = vmatmul.mubr.f32.gmra.mrb[36].mxu0 %v264_v52  ;;  %v5660_v52 = vld [vmem:[%s7977_s1 + $0x60] sm:$0xff] }
 0x19d   : > { %2012 = vmatprep.mubr.f32.mxu1 %v271_v53  ;;  %1324 = vmatprep.mubr.f32.mxu0 %v271_v53  ;;  %v4195_v53 = vld [vmem:[%s5889_s17 + $0xcc8] sm:$0xff] }
 0x1a0   : > { %2013 = vmatmul.mubr.f32.gmra.mrb[38].mxu1 %v270_v54  ;;  %1325 = vmatmul.mubr.f32.gmra.mrb[38].mxu0 %v270_v54  ;;  %v4198_v54 = vld [vmem:[%s5889_s17 + $0xce0] sm:$0xff] }
 0x1a1   : > { %2017 = vmatprep.mubr.f32.mxu1 %v277_v55  ;;  %1330 = vmatprep.mubr.f32.mxu0 %v277_v55  ;;  %v5661_v55 = vld [vmem:[%s7977_s1 + $0x98] sm:$0xff] }
 0x1a4   : > { %2018 = vmatmul.mubr.f32.gmra.mrb[40].mxu1 %v276_v56  ;;  %1331 = vmatmul.mubr.f32.gmra.mrb[40].mxu0 %v276_v56  ;;  %v4874_v56 = vpack.c.bf16 %v4191_v49, %v4188_v47  ;;  %v5671_v47 = vld [vmem:[%s7977_s1 + $0x188] sm:$0xff]  ;;  %v5061_v49 = vpack.c.bf16 %v4223_v43, %v4220_v42  ;;  %v4254_v42 = vld [vmem:[%s5889_s17 + $0xea0] sm:$0xff] }
 0x1a5   : > { %2022 = vmatprep.mubr.f32.mxu1 %v283_v57  ;;  %1336 = vmatprep.mubr.f32.mxu0 %v283_v57  ;;  %v5046_v57 = vpack.c.bf16 %v4193_v51, %v4190_v50  ;;  %v4224_v50 = vld [vmem:[%s5889_s17 + $0xdb0] sm:$0xff] }
 0x1a8   : > { %2023 = vmatmul.mubr.f32.gmra.mrb[42].mxu1 %v282_v58  ;;  %1337 = vmatmul.mubr.f32.gmra.mrb[42].mxu0 %v282_v58  ;;  %v4194_v58 = vld [vmem:[%s5889_s17 + $0xcc0] sm:$0xff] }
 0x1a9   : > { %2027 = vmatprep.mubr.f32.mxu1 %v289_v59  ;;  %1342 = vmatprep.mubr.f32.mxu0 %v289_v59  ;;  %v4876_v59 = vpack.c.bf16 %v4198_v54, %v4195_v53  ;;  %v4226_v53 = vld [vmem:[%s5889_s17 + $0xdc0] sm:$0xff]  ;;  %v4229_v54 = vld [vmem:[%s5889_s17 + $0xdd8] sm:$0xff] }
 0x1ac   : > { %2028 = vmatmul.mubr.f32.gmra.mrb[44].mxu1 %v288_v60  ;;  %1343 = vmatmul.mubr.f32.gmra.mrb[44].mxu0 %v288_v60  ;;  %v4197_v60 = vld [vmem:[%s5889_s17 + $0xcd8] sm:$0xff] }
 0x1ad   : > { %2032 = vmatprep.mubr.f32.mxu1 %v295_v61  ;;  %1348 = vmatprep.mubr.f32.mxu0 %v295_v61  ;;  %v4196_v61 = vld [vmem:[%s5889_s17 + $0xcd0] sm:$0xff] }
 0x1b0   : > { %2033 = vmatmul.mubr.f32.gmra.mrb[46].mxu1 %v294_v62  ;;  %1349 = vmatmul.mubr.f32.gmra.mrb[46].mxu0 %v294_v62  ;;  %v4199_v62 = vld [vmem:[%s5889_s17 + $0xce8] sm:$0xff] }
 0x1b1   : > { %2037 = vmatprep.mubr.f32.mxu1 %v301_v63  ;;  %1354 = vmatprep.mubr.f32.mxu0 %v301_v63  ;;  %v5662_v63 = vld [vmem:[%s7977_s1 + $0x90] sm:$0xff] }
 0x1b4   : > { %2038 = vmatmul.mubr.f32.gmra.mrb[48].mxu1 %v300_v0  ;;  %1355 = vmatmul.mubr.f32.gmra.mrb[48].mxu0 %v300_v0  ;;  %v4201_v0 = vld [vmem:[%s5889_s17 + $0xcf8] sm:$0xff] }
 0x1b5   : > { %2042 = vmatprep.mubr.f32.mxu1 %v307_v2  ;;  %1360 = vmatprep.mubr.f32.mxu0 %v307_v2  ;;  %v4204_v2 = vld [vmem:[%s5889_s17 + $0xd10] sm:$0xff] }
 0x1b8   : > { %2043 = vmatmul.mubr.f32.gmra.mrb[50].mxu1 %v306_v3  ;;  %1361 = vmatmul.mubr.f32.gmra.mrb[50].mxu0 %v306_v3  ;;  %v5663_v3 = vld [vmem:[%s7977_s1 + $0xc8] sm:$0xff] }
 0x1b9   : > { %2047 = vmatprep.mubr.f32.mxu1 %v313_v4  ;;  %1366 = vmatprep.mubr.f32.mxu0 %v313_v4  ;;  %v4878_v4 = vpack.c.bf16 %v4197_v60, %v4194_v58  ;;  %v5673_v58 = vld [vmem:[%s7977_s1 + $0x1b8] sm:$0xff]  ;;  %v5064_v60 = vpack.c.bf16 %v4229_v54, %v4226_v53  ;;  %v4260_v53 = vld [vmem:[%s5889_s17 + $0xed0] sm:$0xff] }
 0x1bc   : > { %2048 = vmatmul.mubr.f32.gmra.mrb[52].mxu1 %v312_v5  ;;  %1367 = vmatmul.mubr.f32.gmra.mrb[52].mxu0 %v312_v5  ;;  %v5049_v5 = vpack.c.bf16 %v4199_v62, %v4196_v61  ;;  %v4230_v61 = vld [vmem:[%s5889_s17 + $0xde0] sm:$0xff] }
 0x1bd   : > { %2052 = vmatprep.mubr.f32.mxu1 %v319_v6  ;;  %1372 = vmatprep.mubr.f32.mxu0 %v319_v6  ;;  %v4200_v6 = vld [vmem:[%s5889_s17 + $0xcf0] sm:$0xff] }
 0x1c0   : > { %2053 = vmatmul.mubr.f32.gmra.mrb[54].mxu1 %v318_v7  ;;  %1373 = vmatmul.mubr.f32.gmra.mrb[54].mxu0 %v318_v7  ;;  %v4880_v7 = vpack.c.bf16 %v4204_v2, %v4201_v0  ;;  %v4232_v0 = vld [vmem:[%s5889_s17 + $0xdf0] sm:$0xff]  ;;  %v4235_v2 = vld [vmem:[%s5889_s17 + $0xe08] sm:$0xff] }
 0x1c1   : > { %2057 = vmatprep.mubr.f32.mxu1 %v325_v8  ;;  %1378 = vmatprep.mubr.f32.mxu0 %v325_v8  ;;  %v4203_v8 = vld [vmem:[%s5889_s17 + $0xd08] sm:$0xff] }
 0x1c4   : > { %2058 = vmatmul.mubr.f32.gmra.mrb[56].mxu1 %v324_v9  ;;  %1379 = vmatmul.mubr.f32.gmra.mrb[56].mxu0 %v324_v9  ;;  %v4202_v9 = vld [vmem:[%s5889_s17 + $0xd00] sm:$0xff] }
 0x1c5   : > { %2062 = vmatprep.mubr.f32.mxu1 %v331_v10  ;;  %1384 = vmatprep.mubr.f32.mxu0 %v331_v10  ;;  %v4205_v10 = vld [vmem:[%s5889_s17 + $0xd18] sm:$0xff] }
 0x1c6   : > { %v5052_v16 = vpack.c.bf16 %v4205_v10, %v4202_v9  ;;  %v4236_v9 = vld [vmem:[%s5889_s17 + $0xe10] sm:$0xff] }
 0x1c8   : > { %2063 = vmatmul.mubr.f32.gmra.mrb[58].mxu1 %v330_v11  ;;  %1385 = vmatmul.mubr.f32.gmra.mrb[58].mxu0 %v330_v11  ;;  %v5664_v11 = vld [vmem:[%s7977_s1 + $0xc0] sm:$0xff] }
 0x1c9   : > { %2067 = vmatprep.mubr.f32.mxu1 %v337_v12  ;;  %1390 = vmatprep.mubr.f32.mxu0 %v337_v12  ;;  %v4207_v12 = vld [vmem:[%s5889_s17 + $0xd28] sm:$0xff] }
 0x1cc   : > { %2068 = vmatmul.mubr.f32.gmra.mrb[60].mxu1 %v336_v13  ;;  %1391 = vmatmul.mubr.f32.gmra.mrb[60].mxu0 %v336_v13  ;;  %v4210_v13 = vld [vmem:[%s5889_s17 + $0xd40] sm:$0xff] }
 0x1cd   : > { %2072 = vmatprep.mubr.f32.mxu1 %v343_v14  ;;  %1396 = vmatprep.mubr.f32.mxu0 %v343_v14  ;;  %v5665_v14 = vld [vmem:[%s7977_s1 + $0xf8] sm:$0xff]  ;;  %v4884_v18 = vpack.c.bf16 %v4210_v13, %v4207_v12  ;;  %v4238_v12 = vld [vmem:[%s5889_s17 + $0xe20] sm:$0xff] }
 0x1ce   : > { %v4241_v13 = vld [vmem:[%s5889_s17 + $0xe38] sm:$0xff] }
 0x1d0   : > { %2073 = vmatmul.mubr.f32.gmra.mrb[62].mxu1 %v342_v15  ;;  %1397 = vmatmul.mubr.f32.gmra.mrb[62].mxu0 %v342_v15  ;;  %v4882_v15 = vpack.c.bf16 %v4203_v8, %v4200_v6  ;;  %v5675_v6 = vld [vmem:[%s7977_s1 + $0x1e8] sm:$0xff]  ;;  %v5067_v8 = vpack.c.bf16 %v4235_v2, %v4232_v0  ;;  %v5686_v2 = vld [vmem:[%s7977_s1 + $0x2d0] sm:$0xff] }
 0x1d1   : > { %3299 = vmatprep.mubr.f32.mxu1 %v5655_v22  ;;  %2528 = vmatprep.mubr.f32.mxu0 %v5655_v22  ;;  %v5666_v22 = vld [vmem:[%s7977_s1 + $0xf0] sm:$0xff] }
 0x1d4   : > { %3300 = vmatmul.mubr.f32.vlgmr.msra.gmra.mrb[64].mxu1 %v5656_v30  ;;  %2529 = vmatmul.mubr.f32.vlgmr.msra.gmra.mrb[64].mxu0 %v5656_v30  ;;  %v4215_v30 = vld [vmem:[%s5889_s17 + $0xd68] sm:$0xff] }
 0x1d5   : > { %4863 = vmatpush1.bf16.msra.mxu0 %v4862_v23  ;;  %3304 = vmatprep.mubr.f32.mxu1 %v5657_v33  ;;  %v4213_v23 = vld [vmem:[%s5889_s17 + $0xd58] sm:$0xff] }
 0x1d6   : > { %5038 = vmatpush1.bf16.msra.mxu1 %v5037_v24  ;;  %2534 = vmatprep.mubr.f32.mxu0 %v5657_v33  ;;  %v4216_v24 = vld [vmem:[%s5889_s17 + $0xd70] sm:$0xff]  ;;  %v5668_v33 = vld [vmem:[%s7977_s1 + $0x120] sm:$0xff] }
 0x1d7   : > { %4865 = vmatprep.subr.bf16.mxu0 %v4864_v26  ;;  %5039 = vmatprep.subr.bf16.mxu1 %v5855_v1  ;;  %v4886_v26 = vpack.c.bf16 %v4209_v19, %v4206_v17  ;;  %v4888_v29 = vpack.c.bf16 %v4216_v24, %v4213_v23  ;;  %v5677_v17 = vld [vmem:[%s7977_s1 + $0x218] sm:$0xff]  ;;  %v5070_v19 = vpack.c.bf16 %v4241_v13, %v4238_v12  ;;  %v4244_v23 = vld [vmem:[%s5889_s17 + $0xe50] sm:$0xff]  ;;  %v4247_v24 = vld [vmem:[%s5889_s17 + $0xe68] sm:$0xff] }
 0x1d8   : > { %3305 = vmatmul.mubr.f32.gmra.mrb[66].mxu1 %v5658_v41  ;;  %2535 = vmatmul.mubr.f32.gmra.mrb[66].mxu0 %v5658_v41  ;;  %v4221_v41 = vld [vmem:[%s5889_s17 + $0xd98] sm:$0xff]  ;;  %v5696_v12 = vld [vmem:[%s7977_s1 + $0x3c0] sm:$0xff] }
 0x1d9   : > { %3309 = vmatprep.mubr.f32.mxu1 %v5659_v44  ;;  %2540 = vmatprep.mubr.f32.mxu0 %v5659_v44  ;;  %v5670_v44 = vld [vmem:[%s7977_s1 + $0x150] sm:$0xff]  ;;  %v5697_v13 = vld [vmem:[%s7977_s1 + $0x3f8] sm:$0xff] }
 0x1da   : > { %4867 = vmatpush1.bf16.msra.mxu0 %v4866_v34  ;;  %5041 = vmatpush1.bf16.msra.mxu1 %v5040_v35  ;;  %v4219_v34 = vld [vmem:[%s5889_s17 + $0xd88] sm:$0xff]  ;;  %v4222_v35 = vld [vmem:[%s5889_s17 + $0xda0] sm:$0xff] }
 0x1db   : > { %4869 = vmatprep.subr.bf16.mxu0 %v4868_v37  ;;  %5042 = vmatprep.subr.bf16.mxu1 %v5855_v1  ;;  %v4890_v37 = vpack.c.bf16 %v4215_v30, %v4212_v28  ;;  %v4892_v40 = vpack.c.bf16 %v4222_v35, %v4219_v34  ;;  %v5679_v28 = vld [vmem:[%s7977_s1 + $0x248] sm:$0xff]  ;;  %v5073_v30 = vpack.c.bf16 %v4247_v24, %v4244_v23  ;;  %v4250_v34 = vld [vmem:[%s5889_s17 + $0xe80] sm:$0xff]  ;;  %v4253_v35 = vld [vmem:[%s5889_s17 + $0xe98] sm:$0xff] }
 0x1dc   : > { %3310 = vmatmul.mubr.f32.gmra.mrb[68].mxu1 %v5660_v52  ;;  %2541 = vmatmul.mubr.f32.gmra.mrb[68].mxu0 %v5660_v52  ;;  %v4227_v52 = vld [vmem:[%s5889_s17 + $0xdc8] sm:$0xff]  ;;  %v5700_v23 = vld [vmem:[%s7977_s1 + $0x420] sm:$0xff] }
 0x1dd   : > { %3314 = vmatprep.mubr.f32.mxu1 %v5661_v55  ;;  %2546 = vmatprep.mubr.f32.mxu0 %v5661_v55  ;;  %v5672_v55 = vld [vmem:[%s7977_s1 + $0x180] sm:$0xff] }
 0x1de   : > { %4871 = vmatpush1.bf16.msra.mxu0 %v4870_v45  ;;  %5044 = vmatpush1.bf16.msra.mxu1 %v5043_v46  ;;  %v4225_v45 = vld [vmem:[%s5889_s17 + $0xdb8] sm:$0xff]  ;;  %v4228_v46 = vld [vmem:[%s5889_s17 + $0xdd0] sm:$0xff] }
 0x1df   : > { %4873 = vmatprep.subr.bf16.mxu0 %v4872_v48  ;;  %5045 = vmatprep.subr.bf16.mxu1 %v5855_v1  ;;  %v4894_v48 = vpack.c.bf16 %v4221_v41, %v4218_v39  ;;  %v4896_v51 = vpack.c.bf16 %v4228_v46, %v4225_v45  ;;  %v5681_v39 = vld [vmem:[%s7977_s1 + $0x278] sm:$0xff]  ;;  %v5076_v41 = vpack.c.bf16 %v4253_v35, %v4250_v34  ;;  %v4256_v45 = vld [vmem:[%s5889_s17 + $0xeb0] sm:$0xff]  ;;  %v4259_v46 = vld [vmem:[%s5889_s17 + $0xec8] sm:$0xff] }
 0x1e0   : > { %3315 = vmatmul.mubr.f32.gmra.mrb[70].mxu1 %v5662_v63  ;;  %2547 = vmatmul.mubr.f32.gmra.mrb[70].mxu0 %v5662_v63  ;;  %v4233_v63 = vld [vmem:[%s5889_s17 + $0xdf8] sm:$0xff]  ;;  %v5704_v35 = vld [vmem:[%s7977_s1 + $0x480] sm:$0xff] }
 0x1e1   : > { %3319 = vmatprep.mubr.f32.mxu1 %v5663_v3  ;;  %2552 = vmatprep.mubr.f32.mxu0 %v5663_v3  ;;  %v5674_v3 = vld [vmem:[%s7977_s1 + $0x1b0] sm:$0xff] }
 0x1e2   : > { %4875 = vmatpush1.bf16.msra.mxu0 %v4874_v56  ;;  %5047 = vmatpush1.bf16.msra.mxu1 %v5046_v57  ;;  %v4231_v56 = vld [vmem:[%s5889_s17 + $0xde8] sm:$0xff]  ;;  %v4234_v57 = vld [vmem:[%s5889_s17 + $0xe00] sm:$0xff] }
 0x1e3   : > { %4877 = vmatprep.subr.bf16.mxu0 %v4876_v59  ;;  %5048 = vmatprep.subr.bf16.mxu1 %v5855_v1  ;;  %v4898_v59 = vpack.c.bf16 %v4227_v52, %v4224_v50  ;;  %v4900_v62 = vpack.c.bf16 %v4234_v57, %v4231_v56  ;;  %v5683_v50 = vld [vmem:[%s7977_s1 + $0x2a8] sm:$0xff]  ;;  %v5079_v52 = vpack.c.bf16 %v4259_v46, %v4256_v45  ;;  %v4262_v56 = vld [vmem:[%s5889_s17 + $0xee0] sm:$0xff]  ;;  %v4265_v57 = vld [vmem:[%s5889_s17 + $0xef8] sm:$0xff] }
 0x1e4   : > { %3320 = vmatmul.mubr.f32.gmra.mrb[72].mxu1 %v5664_v11  ;;  %2553 = vmatmul.mubr.f32.gmra.mrb[72].mxu0 %v5664_v11  ;;  %v4239_v11 = vld [vmem:[%s5889_s17 + $0xe28] sm:$0xff] }
 0x1e5   : > { %3324 = vmatprep.mubr.f32.mxu1 %v5665_v14  ;;  %2558 = vmatprep.mubr.f32.mxu0 %v5665_v14  ;;  %v5676_v14 = vld [vmem:[%s7977_s1 + $0x1e0] sm:$0xff] }
 0x1e6   : > { %4879 = vmatpush1.bf16.msra.mxu0 %v4878_v4  ;;  %5050 = vmatpush1.bf16.msra.mxu1 %v5049_v5  ;;  %v4237_v4 = vld [vmem:[%s5889_s17 + $0xe18] sm:$0xff]  ;;  %v4240_v5 = vld [vmem:[%s5889_s17 + $0xe30] sm:$0xff] }
 0x1e7   : > { %4881 = vmatprep.subr.bf16.mxu0 %v4880_v7  ;;  %5051 = vmatprep.subr.bf16.mxu1 %v5855_v1  ;;  %v4902_v7 = vpack.c.bf16 %v4233_v63, %v4230_v61  ;;  %v4904_v10 = vpack.c.bf16 %v4240_v5, %v4237_v4  ;;  %v5685_v61 = vld [vmem:[%s7977_s1 + $0x2d8] sm:$0xff]  ;;  %v5082_v63 = vpack.c.bf16 %v4265_v57, %v4262_v56  ;;  %v5688_v4 = vld [vmem:[%s7977_s1 + $0x300] sm:$0xff] }
 0x1e8   : > { %3325 = vmatmul.mubr.f32.gmra.mrb[74].mxu1 %v5666_v22  ;;  %2559 = vmatmul.mubr.f32.gmra.mrb[74].mxu0 %v5666_v22  ;;  %v4245_v22 = vld [vmem:[%s5889_s17 + $0xe58] sm:$0xff] }
 0x1e9   : > { %3329 = vmatprep.mubr.f32.mxu1 %v5667_v25  ;;  %2564 = vmatprep.mubr.f32.mxu0 %v5667_v25  ;;  %v5678_v25 = vld [vmem:[%s7977_s1 + $0x210] sm:$0xff]  ;;  %v5689_v5 = vld [vmem:[%s7977_s1 + $0x338] sm:$0xff] }
 0x1ea   : > { %4883 = vmatpush1.bf16.msra.mxu0 %v4882_v15  ;;  %5053 = vmatpush1.bf16.msra.mxu1 %v5052_v16  ;;  %v4243_v15 = vld [vmem:[%s5889_s17 + $0xe48] sm:$0xff]  ;;  %v4246_v16 = vld [vmem:[%s5889_s17 + $0xe60] sm:$0xff] }
 0x1eb   : > { %4885 = vmatprep.subr.bf16.mxu0 %v4884_v18  ;;  %5054 = vmatprep.subr.bf16.mxu1 %v5855_v1  ;;  %v4906_v18 = vpack.c.bf16 %v4239_v11, %v4236_v9  ;;  %v4908_v21 = vpack.c.bf16 %v4246_v16, %v4243_v15  ;;  %v5693_v9 = vld [vmem:[%s7977_s1 + $0x398] sm:$0xff]  ;;  %v5695_v11 = vld [vmem:[%s7977_s1 + $0x3c8] sm:$0xff] }
 0x1ec   : > { %3330 = vmatmul.mubr.f32.gmra.mrb[76].mxu1 %v5668_v33  ;;  %2565 = vmatmul.mubr.f32.gmra.mrb[76].mxu0 %v5668_v33  ;;  %v4251_v33 = vld [vmem:[%s5889_s17 + $0xe88] sm:$0xff] }
 0x1ed   : > { %3334 = vmatprep.mubr.f32.mxu1 %v5669_v36  ;;  %2570 = vmatprep.mubr.f32.mxu0 %v5669_v36  ;;  %v5680_v36 = vld [vmem:[%s7977_s1 + $0x240] sm:$0xff] }
 0x1ee   : > { %4887 = vmatpush1.bf16.msra.mxu0 %v4886_v26  ;;  %5056 = vmatpush1.bf16.msra.mxu1 %v5055_v27  ;;  %v4249_v26 = vld [vmem:[%s5889_s17 + $0xe78] sm:$0xff]  ;;  %v4252_v27 = vld [vmem:[%s5889_s17 + $0xe90] sm:$0xff] }
 0x1ef   : > { %4889 = vmatprep.subr.bf16.mxu0 %v4888_v29  ;;  %5057 = vmatprep.subr.bf16.mxu1 %v5855_v1  ;;  %v4910_v29 = vpack.c.bf16 %v4245_v22, %v4242_v20  ;;  %v4912_v32 = vpack.c.bf16 %v4252_v27, %v4249_v26 }
 0x1f0   : > { %3335 = vmatmul.mubr.f32.gmra.mrb[78].mxu1 %v5670_v44  ;;  %2571 = vmatmul.mubr.f32.gmra.mrb[78].mxu0 %v5670_v44  ;;  %v4257_v44 = vld [vmem:[%s5889_s17 + $0xeb8] sm:$0xff] }
 0x1f1   : > { %3339 = vmatprep.mubr.f32.mxu1 %v5671_v47  ;;  %2576 = vmatprep.mubr.f32.mxu0 %v5671_v47  ;;  %v5682_v47 = vld [vmem:[%s7977_s1 + $0x270] sm:$0xff] }
 0x1f2   : > { %4891 = vmatpush1.bf16.msra.mxu0 %v4890_v37  ;;  %5059 = vmatpush1.bf16.msra.mxu1 %v5058_v38  ;;  %v4255_v37 = vld [vmem:[%s5889_s17 + $0xea8] sm:$0xff]  ;;  %v4258_v38 = vld [vmem:[%s5889_s17 + $0xec0] sm:$0xff] }
 0x1f3   : > { %4893 = vmatprep.subr.bf16.mxu0 %v4892_v40  ;;  %5060 = vmatprep.subr.bf16.mxu1 %v5855_v1  ;;  %v4914_v40 = vpack.c.bf16 %v4251_v33, %v4248_v31  ;;  %v4916_v43 = vpack.c.bf16 %v4258_v38, %v4255_v37  ;;  %v5703_v31 = vld [vmem:[%s7977_s1 + $0x488] sm:$0xff]  ;;  %v5705_v37 = vld [vmem:[%s7977_s1 + $0x4b8] sm:$0xff] }
 0x1f4   : > { %3340 = vmatmul.mubr.f32.gmra.mrb[80].mxu1 %v5672_v55  ;;  %2577 = vmatmul.mubr.f32.gmra.mrb[80].mxu0 %v5672_v55  ;;  %v4263_v55 = vld [vmem:[%s5889_s17 + $0xee8] sm:$0xff] }
 0x1f5   : > { %3344 = vmatprep.mubr.f32.mxu1 %v5673_v58  ;;  %2582 = vmatprep.mubr.f32.mxu0 %v5673_v58  ;;  %v5684_v58 = vld [vmem:[%s7977_s1 + $0x2a0] sm:$0xff] }
 0x1f6   : > { %4895 = vmatpush1.bf16.msra.mxu0 %v4894_v48  ;;  %5062 = vmatpush1.bf16.msra.mxu1 %v5061_v49  ;;  %v4261_v48 = vld [vmem:[%s5889_s17 + $0xed8] sm:$0xff]  ;;  %v4264_v49 = vld [vmem:[%s5889_s17 + $0xef0] sm:$0xff] }
 0x1f7   : > { %4897 = vmatprep.subr.bf16.mxu0 %v4896_v51  ;;  %5063 = vmatprep.subr.bf16.mxu1 %v5855_v1  ;;  %v4918_v51 = vpack.c.bf16 %v4257_v44, %v4254_v42  ;;  %v4920_v54 = vpack.c.bf16 %v4264_v49, %v4261_v48  ;;  %v5709_v49 = vld [vmem:[%s7977_s1 + $0x518] sm:$0xff] }
 0x1f8   : > { %3345 = vmatmul.mubr.f32.gmra.mrb[82].mxu1 %v5674_v3  ;;  %2583 = vmatmul.mubr.f32.gmra.mrb[82].mxu0 %v5674_v3  ;;  %v5687_v3 = vld [vmem:[%s7977_s1 + $0x308] sm:$0xff] }
 0x1f9   : > { %3349 = vmatprep.mubr.f32.mxu1 %v5675_v6  ;;  %2588 = vmatprep.mubr.f32.mxu0 %v5675_v6  ;;  %v5690_v6 = vld [vmem:[%s7977_s1 + $0x330] sm:$0xff] }
 0x1fa   : > { %4899 = vmatpush1.bf16.msra.mxu0 %v4898_v59  ;;  %5065 = vmatpush1.bf16.msra.mxu1 %v5064_v60  ;;  %v4267_v59 = vld [vmem:[%s5889_s17 + $0xf08] sm:$0xff]  ;;  %v4270_v60 = vld [vmem:[%s5889_s17 + $0xf20] sm:$0xff] }
 0x1fb   : > { %4901 = vmatprep.subr.bf16.mxu0 %v4900_v62  ;;  %5066 = vmatprep.subr.bf16.mxu1 %v5855_v1  ;;  %v4922_v62 = vpack.c.bf16 %v4263_v55, %v4260_v53  ;;  %v4924_v0 = vpack.c.bf16 %v4270_v60, %v4267_v59  ;;  %v5710_v53 = vld [vmem:[%s7977_s1 + $0x510] sm:$0xff]  ;;  %v5711_v55 = vld [vmem:[%s7977_s1 + $0x548] sm:$0xff]  ;;  %v5712_v59 = vld [vmem:[%s7977_s1 + $0x540] sm:$0xff] }
 0x1fc   : > { %3350 = vmatmul.mubr.f32.gmra.mrb[84].mxu1 %v5676_v14  ;;  %2589 = vmatmul.mubr.f32.gmra.mrb[84].mxu0 %v5676_v14 }
 0x1fd   : > { %3354 = vmatprep.mubr.f32.mxu1 %v5677_v17  ;;  %2594 = vmatprep.mubr.f32.mxu0 %v5677_v17  ;;  %v5698_v17 = vld [vmem:[%s7977_s1 + $0x3f0] sm:$0xff] }
 0x1fe   : > { %4903 = vmatpush1.bf16.msra.mxu0 %v4902_v7  ;;  %5068 = vmatpush1.bf16.msra.mxu1 %v5067_v8  ;;  %v5691_v7 = vld [vmem:[%s7977_s1 + $0x368] sm:$0xff]  ;;  %v5692_v8 = vld [vmem:[%s7977_s1 + $0x360] sm:$0xff] }
 0x1ff   : > { %4905 = vmatprep.subr.bf16.mxu0 %v4904_v10  ;;  %5069 = vmatprep.subr.bf16.mxu1 %v5855_v1  ;;  %v5694_v10 = vld [vmem:[%s7977_s1 + $0x390] sm:$0xff] }
 0x200   : > { %3355 = vmatmul.mubr.f32.gmra.mrb[86].mxu1 %v5678_v25  ;;  %2595 = vmatmul.mubr.f32.gmra.mrb[86].mxu0 %v5678_v25  ;;  %v5701_v25 = vld [vmem:[%s7977_s1 + $0x458] sm:$0xff] }
 0x201   : > { %3359 = vmatprep.mubr.f32.mxu1 %v5679_v28  ;;  %2600 = vmatprep.mubr.f32.mxu0 %v5679_v28 }
 0x202   : > { %4907 = vmatpush1.bf16.msra.mxu0 %v4906_v18  ;;  %5071 = vmatpush1.bf16.msra.mxu1 %v5070_v19  ;;  %v5699_v19 = vld [vmem:[%s7977_s1 + $0x428] sm:$0xff] }
 0x203   : > { %4909 = vmatprep.subr.bf16.mxu0 %v4908_v21  ;;  %5072 = vmatprep.subr.bf16.mxu1 %v5855_v1 }
 0x204   : > { %3360 = vmatmul.mubr.f32.gmra.mrb[88].mxu1 %v5680_v36  ;;  %2601 = vmatmul.mubr.f32.gmra.mrb[88].mxu0 %v5680_v36 }
 0x205   : > { %3364 = vmatprep.mubr.f32.mxu1 %v5681_v39  ;;  %2606 = vmatprep.mubr.f32.mxu0 %v5681_v39 }
 0x206   : > { %4911 = vmatpush1.bf16.msra.mxu0 %v4910_v29  ;;  %5074 = vmatpush1.bf16.msra.mxu1 %v5073_v30  ;;  %v5702_v29 = vld [vmem:[%s7977_s1 + $0x450] sm:$0xff] }
 0x207   : > { %4913 = vmatprep.subr.bf16.mxu0 %v4912_v32  ;;  %5075 = vmatprep.subr.bf16.mxu1 %v5855_v1 }
 0x208   : > { %3365 = vmatmul.mubr.f32.gmra.mrb[90].mxu1 %v5682_v47  ;;  %2607 = vmatmul.mubr.f32.gmra.mrb[90].mxu0 %v5682_v47  ;;  %v5708_v47 = vld [vmem:[%s7977_s1 + $0x4e0] sm:$0xff] }
 0x209   : > { %3369 = vmatprep.mubr.f32.mxu1 %v5683_v50  ;;  %2612 = vmatprep.mubr.f32.mxu0 %v5683_v50 }
 0x20a   : > { %4915 = vmatpush1.bf16.msra.mxu0 %v4914_v40  ;;  %5077 = vmatpush1.bf16.msra.mxu1 %v5076_v41  ;;  %v5706_v41 = vld [vmem:[%s7977_s1 + $0x4b0] sm:$0xff] }
 0x20b   : > { %4917 = vmatprep.subr.bf16.mxu0 %v4916_v43  ;;  %5078 = vmatprep.subr.bf16.mxu1 %v5855_v1  ;;  %v5707_v43 = vld [vmem:[%s7977_s1 + $0x4e8] sm:$0xff] }
 0x20c   : > { %3370 = vmatmul.mubr.f32.gmra.mrb[92].mxu1 %v5684_v58  ;;  %2613 = vmatmul.mubr.f32.gmra.mrb[92].mxu0 %v5684_v58 }
 0x20d   : > { %3374 = vmatprep.mubr.f32.mxu1 %v5685_v61  ;;  %2618 = vmatprep.mubr.f32.mxu0 %v5685_v61  ;;  %v5713_v61 = vld [vmem:[%s7977_s1 + $0x578] sm:$0xff] }
 0x20e   : > { %4919 = vmatpush1.bf16.msra.mxu0 %v4918_v51  ;;  %5080 = vmatpush1.bf16.msra.mxu1 %v5079_v52 }
 0x20f   : > { %4921 = vmatprep.subr.bf16.mxu0 %v4920_v54  ;;  %5081 = vmatprep.subr.bf16.mxu1 %v5855_v1 }
 0x210   : > { %3375 = vmatmul.mubr.f32.gmra.mrb[94].mxu1 %v5686_v2  ;;  %2619 = vmatmul.mubr.f32.gmra.mrb[94].mxu0 %v5686_v2  ;;  %v5714_v2 = vld [vmem:[%s7977_s1 + $0x570] sm:$0xff] }
 0x211   : > { %3379 = vmatprep.mubr.f32.mxu1 %v5687_v3  ;;  %2624 = vmatprep.mubr.f32.mxu0 %v5687_v3 }
 0x212   : > { %4923 = vmatpush1.bf16.msra.mxu0 %v4922_v62  ;;  %5083 = vmatpush1.bf16.msra.mxu1 %v5082_v63 }
 0x213   : > { %4925 = vmatprep.subr.bf16.mxu0 %v4924_v0  ;;  %5084 = vmatprep.subr.bf16.mxu1 %v5855_v1 }
 0x214   : > { %3380 = vmatmul.mubr.f32.gmra.mrb[96].mxu1 %v5688_v4  ;;  %2625 = vmatmul.mubr.f32.gmra.mrb[96].mxu0 %v5688_v4  ;;  %v5715_v4 = vld [vmem:[%s7977_s1 + $0x5a8] sm:$0xff] }
 0x215   : > { %3384 = vmatprep.mubr.f32.mxu1 %v5689_v5  ;;  %2630 = vmatprep.mubr.f32.mxu0 %v5689_v5 }
 0x218   : > { %3385 = vmatmul.mubr.f32.gmra.mrb[98].mxu1 %v5690_v6  ;;  %2631 = vmatmul.mubr.f32.gmra.mrb[98].mxu0 %v5690_v6 }
 0x219   : > { %3389 = vmatprep.mubr.f32.mxu1 %v5691_v7  ;;  %2636 = vmatprep.mubr.f32.mxu0 %v5691_v7 }
 0x21c   : > { %3390 = vmatmul.mubr.f32.gmra.mrb[100].mxu1 %v5692_v8  ;;  %2637 = vmatmul.mubr.f32.gmra.mrb[100].mxu0 %v5692_v8  ;;  %v5716_v8 = vld [vmem:[%s7977_s1 + $0x5a0] sm:$0xff] }
 0x21d   : > { %3394 = vmatprep.mubr.f32.mxu1 %v5693_v9  ;;  %2642 = vmatprep.mubr.f32.mxu0 %v5693_v9 }
 0x220   : > { %3395 = vmatmul.mubr.f32.gmra.mrb[102].mxu1 %v5694_v10  ;;  %2643 = vmatmul.mubr.f32.gmra.mrb[102].mxu0 %v5694_v10  ;;  %v5717_v10 = vld [vmem:[%s7977_s1 + $0x5d8] sm:$0xff] }
 0x221   : > { %3399 = vmatprep.mubr.f32.mxu1 %v5695_v11  ;;  %2648 = vmatprep.mubr.f32.mxu0 %v5695_v11  ;;  %v4266_v11 = vld [vmem:[%s5889_s17 + $0xf00] sm:$0xff] }
 0x224   : > { %3400 = vmatmul.mubr.f32.gmra.mrb[104].mxu1 %v5696_v12  ;;  %2649 = vmatmul.mubr.f32.gmra.mrb[104].mxu0 %v5696_v12  ;;  %v4269_v12 = vld [vmem:[%s5889_s17 + $0xf18] sm:$0xff] }
 0x225   : > { %3404 = vmatprep.mubr.f32.mxu1 %v5697_v13  ;;  %2654 = vmatprep.mubr.f32.mxu0 %v5697_v13 }
 0x227   : > { %v1919_v14 = vpop.f32.mrb[0].mxu1  ;;  %v1212_v15 = vpop.f32.mrb[0].mxu0 }
 0x228   : > { %2081 = vst.msk [vmem:[%s7156_s10 + $0x10] sm:$0xff] %vm2080_vm0, %v1919_v14  ;;  %2078 = vst [vmem:[%s7156_s10] sm:$0xff] %v1212_v15  ;;  %v1921_v16 = vpop.f32.mrb[1].mxu1  ;;  %3405 = vmatmul.mubr.f32.gmra.mrb[106].mxu1 %v5698_v17  ;;  %v1214_v18 = vpop.f32.mrb[1].mxu0  ;;  %2655 = vmatmul.mubr.f32.gmra.mrb[106].mxu0 %v5698_v17  ;;  %v4268_v15 = vld [vmem:[%s5889_s17 + $0xf10] sm:$0xff] }
 0x229   : > { %2079 = vst [vmem:[%s7156_s10 + $0x8] sm:$0xff] %v1214_v18  ;;  %3409 = vmatprep.mubr.f32.mxu1 %v5699_v19  ;;  %2660 = vmatprep.mubr.f32.mxu0 %v5699_v19  ;;  %v4271_v16 = vld [vmem:[%s5889_s17 + $0xf28] sm:$0xff]  ;;  %v5718_v18 = vld [vmem:[%s7977_s1 + $0x5d0] sm:$0xff] }
 0x22b   : > { %v1924_v20 = vpop.f32.mrb[2].mxu1  ;;  %v1218_v21 = vpop.f32.mrb[2].mxu0 }
 0x22c   : > { %2084 = vst.msk [vmem:[%s7156_s10 + $0x28] sm:$0xff] %vm2080_vm0, %v1924_v20  ;;  %2082 = vst [vmem:[%s7156_s10 + $0x18] sm:$0xff] %v1218_v21  ;;  %v1926_v22 = vpop.f32.mrb[3].mxu1  ;;  %3410 = vmatmul.mubr.f32.gmra.mrb[108].mxu1 %v5700_v23  ;;  %v1220_v24 = vpop.f32.mrb[3].mxu0  ;;  %2661 = vmatmul.mubr.f32.gmra.mrb[108].mxu0 %v5700_v23  ;;  %v4273_v20 = vld [vmem:[%s5889_s17 + $0xf38] sm:$0xff]  ;;  %v4276_v21 = vld [vmem:[%s5889_s17 + $0xf50] sm:$0xff]  ;;  %v4926_v23 = vpack.c.bf16 %v4269_v12, %v4266_v11 }
 0x22d   : > { %2083 = vst [vmem:[%s7156_s10 + $0x20] sm:$0xff] %v1220_v24  ;;  %3414 = vmatprep.mubr.f32.mxu1 %v5701_v25  ;;  %2666 = vmatprep.mubr.f32.mxu0 %v5701_v25  ;;  %v5719_v22 = vld [vmem:[%s7977_s1 + $0x18] sm:$0xff]  ;;  %v5085_v24 = vpack.c.bf16 %v4271_v16, %v4268_v15  ;;  %v4272_v25 = vld [vmem:[%s5889_s17 + $0xf30] sm:$0xff]  ;;  %v5726_v15 = vld [vmem:[%s7977_s1 + $0xa0] sm:$0xff] }
 0x22e   : > { %v4293_v11 = vld [vmem:[%s5889_s17 + $0xfd8] sm:$0xff]  ;;  %v4292_v12 = vld [vmem:[%s5889_s17 + $0xfd0] sm:$0xff] }
 0x22f   : > { %v1929_v26 = vpop.f32.mrb[4].mxu1  ;;  %v1224_v27 = vpop.f32.mrb[4].mxu0 }
 0x230   : > { %2087 = vst.msk [vmem:[%s7156_s10 + $0x40] sm:$0xff] %vm2080_vm0, %v1929_v26  ;;  %2085 = vst [vmem:[%s7156_s10 + $0x30] sm:$0xff] %v1224_v27  ;;  %v1931_v28 = vpop.f32.mrb[5].mxu1  ;;  %3415 = vmatmul.mubr.f32.gmra.mrb[110].mxu1 %v5702_v29  ;;  %v1226_v30 = vpop.f32.mrb[5].mxu0  ;;  %2667 = vmatmul.mubr.f32.gmra.mrb[110].mxu0 %v5702_v29  ;;  %v4275_v29 = vld [vmem:[%s5889_s17 + $0xf48] sm:$0xff] }
 0x231   : > { %2086 = vst [vmem:[%s7156_s10 + $0x38] sm:$0xff] %v1226_v30  ;;  %3419 = vmatprep.mubr.f32.mxu1 %v5703_v31  ;;  %2672 = vmatprep.mubr.f32.mxu0 %v5703_v31  ;;  %v4928_v28 = vpack.c.bf16 %v4276_v21, %v4273_v20  ;;  %v4274_v30 = vld [vmem:[%s5889_s17 + $0xf40] sm:$0xff]  ;;  %v4277_v31 = vld [vmem:[%s5889_s17 + $0xf58] sm:$0xff] }
 0x233   : > { %v1934_v32 = vpop.f32.mrb[6].mxu1  ;;  %v1230_v33 = vpop.f32.mrb[6].mxu0 }
 0x234   : > { %2090 = vst.msk [vmem:[%s7156_s10 + $0x58] sm:$0xff] %vm2080_vm0, %v1934_v32  ;;  %2088 = vst [vmem:[%s7156_s10 + $0x48] sm:$0xff] %v1230_v33  ;;  %v1936_v34 = vpop.f32.mrb[7].mxu1  ;;  %3420 = vmatmul.mubr.f32.gmra.mrb[112].mxu1 %v5704_v35  ;;  %v1232_v36 = vpop.f32.mrb[7].mxu0  ;;  %2673 = vmatmul.mubr.f32.gmra.mrb[112].mxu0 %v5704_v35  ;;  %v5720_v33 = vld [vmem:[%s7977_s1 + $0x10] sm:$0xff]  ;;  %v4279_v35 = vld [vmem:[%s5889_s17 + $0xf68] sm:$0xff] }
 0x235   : > { %2089 = vst [vmem:[%s7156_s10 + $0x50] sm:$0xff] %v1232_v36  ;;  %3424 = vmatprep.mubr.f32.mxu1 %v5705_v37  ;;  %2678 = vmatprep.mubr.f32.mxu0 %v5705_v37  ;;  %v4282_v36 = vld [vmem:[%s5889_s17 + $0xf80] sm:$0xff]  ;;  %v5721_v37 = vld [vmem:[%s7977_s1 + $0x48] sm:$0xff] }
 0x237   : > { %v1939_v38 = vpop.f32.mrb[8].mxu1  ;;  %v1236_v39 = vpop.f32.mrb[8].mxu0 }
 0x238   : > { %2093 = vst.msk [vmem:[%s7156_s10 + $0x70] sm:$0xff] %vm2080_vm0, %v1939_v38  ;;  %2091 = vst [vmem:[%s7156_s10 + $0x60] sm:$0xff] %v1236_v39  ;;  %v1941_v40 = vpop.f32.mrb[9].mxu1  ;;  %3425 = vmatmul.mubr.f32.gmra.mrb[114].mxu1 %v5706_v41  ;;  %v1238_v42 = vpop.f32.mrb[9].mxu0  ;;  %2679 = vmatmul.mubr.f32.gmra.mrb[114].mxu0 %v5706_v41  ;;  %v4930_v38 = vpack.c.bf16 %v4275_v29, %v4272_v25  ;;  %v5088_v39 = vpack.c.bf16 %v4277_v31, %v4274_v30  ;;  %v5728_v30 = vld [vmem:[%s7977_s1 + $0xd0] sm:$0xff] }
 0x239   : > { %2092 = vst [vmem:[%s7156_s10 + $0x68] sm:$0xff] %v1238_v42  ;;  %3429 = vmatprep.mubr.f32.mxu1 %v5707_v43  ;;  %2684 = vmatprep.mubr.f32.mxu0 %v5707_v43  ;;  %v4278_v40 = vld [vmem:[%s5889_s17 + $0xf60] sm:$0xff]  ;;  %v4932_v43 = vpack.c.bf16 %v4282_v36, %v4279_v35 }
 0x23b   : > { %v1944_v44 = vpop.f32.mrb[10].mxu1  ;;  %v1242_v45 = vpop.f32.mrb[10].mxu0 }
 0x23c   : > { %2096 = vst.msk [vmem:[%s7156_s10 + $0x88] sm:$0xff] %vm2080_vm0, %v1944_v44  ;;  %2094 = vst [vmem:[%s7156_s10 + $0x78] sm:$0xff] %v1242_v45  ;;  %v1946_v46 = vpop.f32.mrb[11].mxu1  ;;  %3430 = vmatmul.mubr.f32.gmra.mrb[116].mxu1 %v5708_v47  ;;  %v1244_v48 = vpop.f32.mrb[11].mxu0  ;;  %2685 = vmatmul.mubr.f32.gmra.mrb[116].mxu0 %v5708_v47  ;;  %v4281_v44 = vld [vmem:[%s5889_s17 + $0xf78] sm:$0xff]  ;;  %v4280_v45 = vld [vmem:[%s5889_s17 + $0xf70] sm:$0xff] }
 0x23d   : > { %2095 = vst [vmem:[%s7156_s10 + $0x80] sm:$0xff] %v1244_v48  ;;  %3434 = vmatprep.mubr.f32.mxu1 %v5709_v49  ;;  %2690 = vmatprep.mubr.f32.mxu0 %v5709_v49  ;;  %v4283_v46 = vld [vmem:[%s5889_s17 + $0xf88] sm:$0xff]  ;;  %v5722_v48 = vld [vmem:[%s7977_s1 + $0x40] sm:$0xff] }
 0x23f   : > { %v1949_v50 = vpop.f32.mrb[12].mxu1  ;;  %v1248_v51 = vpop.f32.mrb[12].mxu0 }
 0x240   : > { %2099 = vst.msk [vmem:[%s7156_s10 + $0xa0] sm:$0xff] %vm2080_vm0, %v1949_v50  ;;  %2097 = vst [vmem:[%s7156_s10 + $0x90] sm:$0xff] %v1248_v51  ;;  %v1951_v52 = vpop.f32.mrb[13].mxu1  ;;  %3435 = vmatmul.mubr.f32.gmra.mrb[118].mxu1 %v5710_v53  ;;  %v1250_v54 = vpop.f32.mrb[13].mxu0  ;;  %2691 = vmatmul.mubr.f32.gmra.mrb[118].mxu0 %v5710_v53  ;;  %v4285_v50 = vld [vmem:[%s5889_s17 + $0xf98] sm:$0xff]  ;;  %v4288_v51 = vld [vmem:[%s5889_s17 + $0xfb0] sm:$0xff]  ;;  %v4934_v53 = vpack.c.bf16 %v4281_v44, %v4278_v40 }
 0x241   : > { %2098 = vst [vmem:[%s7156_s10 + $0x98] sm:$0xff] %v1250_v54  ;;  %3439 = vmatprep.mubr.f32.mxu1 %v5711_v55  ;;  %2696 = vmatprep.mubr.f32.mxu0 %v5711_v55  ;;  %v5723_v52 = vld [vmem:[%s7977_s1 + $0x78] sm:$0xff]  ;;  %v5091_v54 = vpack.c.bf16 %v4283_v46, %v4280_v45  ;;  %v4284_v55 = vld [vmem:[%s5889_s17 + $0xf90] sm:$0xff]  ;;  %v5730_v45 = vld [vmem:[%s7977_s1 + $0x100] sm:$0xff] }
 0x243   : > { %v1954_v56 = vpop.f32.mrb[14].mxu1  ;;  %v1254_v57 = vpop.f32.mrb[14].mxu0 }
 0x244   : > { %2102 = vst.msk [vmem:[%s7156_s10 + $0xb8] sm:$0xff] %vm2080_vm0, %v1954_v56  ;;  %2100 = vst [vmem:[%s7156_s10 + $0xa8] sm:$0xff] %v1254_v57  ;;  %v1956_v58 = vpop.f32.mrb[15].mxu1  ;;  %3440 = vmatmul.mubr.f32.gmra.mrb[120].mxu1 %v5712_v59  ;;  %v1256_v60 = vpop.f32.mrb[15].mxu0  ;;  %2697 = vmatmul.mubr.f32.gmra.mrb[120].mxu0 %v5712_v59  ;;  %v4287_v59 = vld [vmem:[%s5889_s17 + $0xfa8] sm:$0xff] }
 0x245   : > { %2101 = vst [vmem:[%s7156_s10 + $0xb0] sm:$0xff] %v1256_v60  ;;  %3444 = vmatprep.mubr.f32.mxu1 %v5713_v61  ;;  %2702 = vmatprep.mubr.f32.mxu0 %v5713_v61  ;;  %v4936_v58 = vpack.c.bf16 %v4288_v51, %v4285_v50  ;;  %v4286_v60 = vld [vmem:[%s5889_s17 + $0xfa0] sm:$0xff]  ;;  %v4289_v61 = vld [vmem:[%s5889_s17 + $0xfb8] sm:$0xff] }
 0x247   : > { %v1959_v62 = vpop.f32.mrb[16].mxu1  ;;  %v1260_v63 = vpop.f32.mrb[16].mxu0 }
 0x248   : > { %2105 = vst.msk [vmem:[%s7156_s10 + $0xd0] sm:$0xff] %vm2080_vm0, %v1959_v62  ;;  %2103 = vst [vmem:[%s7156_s10 + $0xc0] sm:$0xff] %v1260_v63  ;;  %v1961_v0 = vpop.f32.mrb[17].mxu1  ;;  %3445 = vmatmul.mubr.f32.gmra.mrb[122].mxu1 %v5714_v2  ;;  %v1262_v3 = vpop.f32.mrb[17].mxu0  ;;  %2703 = vmatmul.mubr.f32.gmra.mrb[122].mxu0 %v5714_v2  ;;  %v5724_v63 = vld [vmem:[%s7977_s1 + $0x70] sm:$0xff]  ;;  %v4291_v2 = vld [vmem:[%s5889_s17 + $0xfc8] sm:$0xff] }
 0x249   : > { %2104 = vst [vmem:[%s7156_s10 + $0xc8] sm:$0xff] %v1262_v3  ;;  %3449 = vmatprep.mubr.f32.mxu1 %v5715_v4  ;;  %2708 = vmatprep.mubr.f32.mxu0 %v5715_v4  ;;  %v4294_v3 = vld [vmem:[%s5889_s17 + $0xfe0] sm:$0xff]  ;;  %v5725_v4 = vld [vmem:[%s7977_s1 + $0xa8] sm:$0xff] }
 0x24b   : > { %v1964_v5 = vpop.f32.mrb[18].mxu1  ;;  %v1266_v6 = vpop.f32.mrb[18].mxu0 }
 0x24c   : > { %2108 = vst.msk [vmem:[%s7156_s10 + $0xe8] sm:$0xff] %vm2080_vm0, %v1964_v5  ;;  %2106 = vst [vmem:[%s7156_s10 + $0xd8] sm:$0xff] %v1266_v6  ;;  %v1966_v7 = vpop.f32.mrb[19].mxu1  ;;  %3450 = vmatmul.mubr.f32.gmra.mrb[124].mxu1 %v5716_v8  ;;  %v1268_v9 = vpop.f32.mrb[19].mxu0  ;;  %2709 = vmatmul.mubr.f32.gmra.mrb[124].mxu0 %v5716_v8  ;;  %v4938_v5 = vpack.c.bf16 %v4287_v59, %v4284_v55  ;;  %v5094_v6 = vpack.c.bf16 %v4289_v61, %v4286_v60  ;;  %v5732_v60 = vld [vmem:[%s7977_s1 + $0x130] sm:$0xff] }
 0x24d   : > { %2107 = vst [vmem:[%s7156_s10 + $0xe0] sm:$0xff] %v1268_v9  ;;  %3454 = vmatprep.mubr.f32.mxu1 %v5717_v10  ;;  %2714 = vmatprep.mubr.f32.mxu0 %v5717_v10  ;;  %v4290_v7 = vld [vmem:[%s5889_s17 + $0xfc0] sm:$0xff]  ;;  %v4940_v10 = vpack.c.bf16 %v4294_v3, %v4291_v2 }
 0x24e   : > { %v4942_v20 = vpack.c.bf16 %v4293_v11, %v4290_v7 }
 0x24f   : > { %v1969_v13 = vpop.f32.mrb[20].mxu1  ;;  %v1272_v14 = vpop.f32.mrb[20].mxu0 }
 0x250   : > { %2111 = vst.msk [vmem:[%s7156_s10 + $0x100] sm:$0xff] %vm2080_vm0, %v1969_v13  ;;  %2109 = vst [vmem:[%s7156_s10 + $0xf0] sm:$0xff] %v1272_v14  ;;  %v1971_v17 = vpop.f32.mrb[21].mxu1  ;;  %3455 = vmatmul.mubr.f32.gmra.mrb[126].mxu1 %v5718_v18  ;;  %v1274_v19 = vpop.f32.mrb[21].mxu0  ;;  %2715 = vmatmul.mubr.f32.gmra.mrb[126].mxu0 %v5718_v18  ;;  %v4295_v13 = vld [vmem:[%s5889_s17 + $0xfe8] sm:$0xff]  ;;  %v4300_v18 = vld [vmem:[%s5889_s17 + $0x1010] sm:$0xff] }
 0x251   : > { %2110 = vst [vmem:[%s7156_s10 + $0xf8] sm:$0xff] %v1274_v19  ;;  %3524 = vmatprep.mubr.f32.mxu1 %v5719_v22  ;;  %2785 = vmatprep.mubr.f32.mxu0 %v5719_v22  ;;  %v4297_v17 = vld [vmem:[%s5889_s17 + $0xff8] sm:$0xff]  ;;  %v5097_v21 = vpack.c.bf16 %v4295_v13, %v4292_v12  ;;  %v4296_v22 = vld [vmem:[%s5889_s17 + $0xff0] sm:$0xff]  ;;  %v5734_v12 = vld [vmem:[%s7977_s1 + $0x160] sm:$0xff] }
 0x252   : > { %v5727_v19 = vld [vmem:[%s7977_s1 + $0xd8] sm:$0xff]  ;;  %v4944_v25 = vpack.c.bf16 %v4300_v18, %v4297_v17 }
 0x253   : > { %v1974_v26 = vpop.f32.mrb[22].mxu1  ;;  %v1278_v27 = vpop.f32.mrb[22].mxu0 }
 0x254   : > { %2114 = vst.msk [vmem:[%s7156_s10 + $0x118] sm:$0xff] %vm2080_vm0, %v1974_v26  ;;  %2112 = vst [vmem:[%s7156_s10 + $0x108] sm:$0xff] %v1278_v27  ;;  %v1976_v32 = vpop.f32.mrb[23].mxu1  ;;  %3525 = vmatmul.mubr.f32.vlgmr.msra.gmra.mrb[64].mxu1 %v5720_v33  ;;  %v1280_v34 = vpop.f32.mrb[23].mxu0  ;;  %2786 = vmatmul.mubr.f32.vlgmr.msra.gmra.mrb[64].mxu0 %v5720_v33  ;;  %v4299_v26 = vld [vmem:[%s5889_s17 + $0x1008] sm:$0xff]  ;;  %v4298_v27 = vld [vmem:[%s5889_s17 + $0x1000] sm:$0xff] }
 0x255   : > { %2113 = vst [vmem:[%s7156_s10 + $0x110] sm:$0xff] %v1280_v34  ;;  %4927 = vmatpush1.bf16.msra.mxu0 %v4926_v23  ;;  %3529 = vmatprep.mubr.f32.mxu1 %v5721_v37  ;;  %v4303_v32 = vld [vmem:[%s5889_s17 + $0x1028] sm:$0xff]  ;;  %v4306_v33 = vld [vmem:[%s5889_s17 + $0x1040] sm:$0xff]  ;;  %v4946_v35 = vpack.c.bf16 %v4299_v26, %v4296_v22 }
 0x256   : > { %5086 = vmatpush1.bf16.msra.mxu1 %v5085_v24  ;;  %2791 = vmatprep.mubr.f32.mxu0 %v5721_v37  ;;  %v5729_v34 = vld [vmem:[%s7977_s1 + $0x108] sm:$0xff]  ;;  %v4302_v37 = vld [vmem:[%s5889_s17 + $0x1020] sm:$0xff]  ;;  %v4948_v40 = vpack.c.bf16 %v4306_v33, %v4303_v32 }
 0x257   : > { %v1979_v41 = vpop.f32.mrb[24].mxu1  ;;  %v1284_v42 = vpop.f32.mrb[24].mxu0  ;;  %4929 = vmatprep.subr.bf16.mxu0 %v4928_v28  ;;  %5087 = vmatprep.subr.bf16.mxu1 %v5855_v1  ;;  %v4301_v28 = vld [vmem:[%s5889_s17 + $0x1018] sm:$0xff] }
 0x258   : > { %2117 = vst.msk [vmem:[%s7156_s10 + $0x130] sm:$0xff] %vm2080_vm0, %v1979_v41  ;;  %2115 = vst [vmem:[%s7156_s10 + $0x120] sm:$0xff] %v1284_v42  ;;  %v1981_v47 = vpop.f32.mrb[25].mxu1  ;;  %3530 = vmatmul.mubr.f32.gmra.mrb[66].mxu1 %v5722_v48  ;;  %v1286_v49 = vpop.f32.mrb[25].mxu0  ;;  %2792 = vmatmul.mubr.f32.gmra.mrb[66].mxu0 %v5722_v48  ;;  %v5100_v36 = vpack.c.bf16 %v4301_v28, %v4298_v27  ;;  %v4305_v41 = vld [vmem:[%s5889_s17 + $0x1038] sm:$0xff]  ;;  %v4304_v42 = vld [vmem:[%s5889_s17 + $0x1030] sm:$0xff] }
 0x259   : > { %2116 = vst [vmem:[%s7156_s10 + $0x128] sm:$0xff] %v1286_v49  ;;  %3534 = vmatprep.mubr.f32.mxu1 %v5723_v52  ;;  %2797 = vmatprep.mubr.f32.mxu0 %v5723_v52  ;;  %v4309_v47 = vld [vmem:[%s5889_s17 + $0x1058] sm:$0xff]  ;;  %v4312_v48 = vld [vmem:[%s5889_s17 + $0x1070] sm:$0xff]  ;;  %v4950_v50 = vpack.c.bf16 %v4305_v41, %v4302_v37 }
 0x25a   : > { %4931 = vmatpush1.bf16.msra.mxu0 %v4930_v38  ;;  %5089 = vmatpush1.bf16.msra.mxu1 %v5088_v39  ;;  %v5731_v49 = vld [vmem:[%s7977_s1 + $0x138] sm:$0xff]  ;;  %v4308_v52 = vld [vmem:[%s5889_s17 + $0x1050] sm:$0xff]  ;;  %v4952_v55 = vpack.c.bf16 %v4312_v48, %v4309_v47 }
 0x25b   : > { %v1984_v56 = vpop.f32.mrb[26].mxu1  ;;  %v1290_v57 = vpop.f32.mrb[26].mxu0  ;;  %4933 = vmatprep.subr.bf16.mxu0 %v4932_v43  ;;  %5090 = vmatprep.subr.bf16.mxu1 %v5855_v1  ;;  %v4307_v43 = vld [vmem:[%s5889_s17 + $0x1048] sm:$0xff]  ;;  %v5736_v27 = vld [vmem:[%s7977_s1 + $0x190] sm:$0xff] }
 0x25c   : > { %2120 = vst.msk [vmem:[%s7156_s10 + $0x148] sm:$0xff] %vm2080_vm0, %v1984_v56  ;;  %2118 = vst [vmem:[%s7156_s10 + $0x138] sm:$0xff] %v1290_v57  ;;  %v1986_v62 = vpop.f32.mrb[27].mxu1  ;;  %3535 = vmatmul.mubr.f32.gmra.mrb[68].mxu1 %v5724_v63  ;;  %v1292_v0 = vpop.f32.mrb[27].mxu0  ;;  %2798 = vmatmul.mubr.f32.gmra.mrb[68].mxu0 %v5724_v63  ;;  %v5103_v51 = vpack.c.bf16 %v4307_v43, %v4304_v42  ;;  %v4311_v56 = vld [vmem:[%s5889_s17 + $0x1068] sm:$0xff]  ;;  %v4310_v57 = vld [vmem:[%s5889_s17 + $0x1060] sm:$0xff] }
 0x25d   : > { %2119 = vst [vmem:[%s7156_s10 + $0x140] sm:$0xff] %v1292_v0  ;;  %3539 = vmatprep.mubr.f32.mxu1 %v5725_v4  ;;  %2803 = vmatprep.mubr.f32.mxu0 %v5725_v4  ;;  %v4315_v62 = vld [vmem:[%s5889_s17 + $0x1088] sm:$0xff]  ;;  %v4318_v63 = vld [vmem:[%s5889_s17 + $0x10a0] sm:$0xff]  ;;  %v4954_v2 = vpack.c.bf16 %v4311_v56, %v4308_v52 }
 0x25e   : > { %4935 = vmatpush1.bf16.msra.mxu0 %v4934_v53  ;;  %5092 = vmatpush1.bf16.msra.mxu1 %v5091_v54  ;;  %v5733_v0 = vld [vmem:[%s7977_s1 + $0x168] sm:$0xff]  ;;  %v4314_v4 = vld [vmem:[%s5889_s17 + $0x1080] sm:$0xff]  ;;  %v4956_v7 = vpack.c.bf16 %v4318_v63, %v4315_v62 }
 0x25f   : > { %v1989_v8 = vpop.f32.mrb[28].mxu1  ;;  %v1296_v9 = vpop.f32.mrb[28].mxu0  ;;  %4937 = vmatprep.subr.bf16.mxu0 %v4936_v58  ;;  %5093 = vmatprep.subr.bf16.mxu1 %v5855_v1  ;;  %v4313_v58 = vld [vmem:[%s5889_s17 + $0x1078] sm:$0xff]  ;;  %v5738_v42 = vld [vmem:[%s7977_s1 + $0x1c0] sm:$0xff] }
 0x260   : > { %2123 = vst.msk [vmem:[%s7156_s10 + $0x160] sm:$0xff] %vm2080_vm0, %v1989_v8  ;;  %2121 = vst [vmem:[%s7156_s10 + $0x150] sm:$0xff] %v1296_v9  ;;  %v1991_v14 = vpop.f32.mrb[29].mxu1  ;;  %3540 = vmatmul.mubr.f32.gmra.mrb[70].mxu1 %v5726_v15  ;;  %v1298_v16 = vpop.f32.mrb[29].mxu0  ;;  %2804 = vmatmul.mubr.f32.gmra.mrb[70].mxu0 %v5726_v15  ;;  %v5106_v3 = vpack.c.bf16 %v4313_v58, %v4310_v57  ;;  %v4317_v8 = vld [vmem:[%s5889_s17 + $0x1098] sm:$0xff]  ;;  %v4316_v9 = vld [vmem:[%s5889_s17 + $0x1090] sm:$0xff] }
 0x261   : > { %2122 = vst [vmem:[%s7156_s10 + $0x158] sm:$0xff] %v1298_v16  ;;  %3544 = vmatprep.mubr.f32.mxu1 %v5727_v19  ;;  %2809 = vmatprep.mubr.f32.mxu0 %v5727_v19  ;;  %v4321_v14 = vld [vmem:[%s5889_s17 + $0x10b8] sm:$0xff]  ;;  %v4324_v15 = vld [vmem:[%s5889_s17 + $0x10d0] sm:$0xff]  ;;  %v4958_v17 = vpack.c.bf16 %v4317_v8, %v4314_v4 }
 0x262   : > { %4939 = vmatpush1.bf16.msra.mxu0 %v4938_v5  ;;  %5095 = vmatpush1.bf16.msra.mxu1 %v5094_v6  ;;  %v5735_v16 = vld [vmem:[%s7977_s1 + $0x198] sm:$0xff]  ;;  %v4320_v19 = vld [vmem:[%s5889_s17 + $0x10b0] sm:$0xff]  ;;  %v4960_v22 = vpack.c.bf16 %v4324_v15, %v4321_v14 }
 0x263   : > { %v1994_v23 = vpop.f32.mrb[30].mxu1  ;;  %v1302_v24 = vpop.f32.mrb[30].mxu0  ;;  %4941 = vmatprep.subr.bf16.mxu0 %v4940_v10  ;;  %5096 = vmatprep.subr.bf16.mxu1 %v5855_v1  ;;  %v4319_v10 = vld [vmem:[%s5889_s17 + $0x10a8] sm:$0xff]  ;;  %v5740_v57 = vld [vmem:[%s7977_s1 + $0x1f0] sm:$0xff] }
 0x264   : > { %2126 = vst.msk [vmem:[%s7156_s10 + $0x178] sm:$0xff] %vm2080_vm0, %v1994_v23  ;;  %2124 = vst [vmem:[%s7156_s10 + $0x168] sm:$0xff] %v1302_v24  ;;  %v1996_v29 = vpop.f32.mrb[31].mxu1  ;;  %3545 = vmatmul.mubr.f32.gmra.mrb[72].mxu1 %v5728_v30  ;;  %v1304_v31 = vpop.f32.mrb[31].mxu0  ;;  %2810 = vmatmul.mubr.f32.gmra.mrb[72].mxu0 %v5728_v30  ;;  %v5109_v18 = vpack.c.bf16 %v4319_v10, %v4316_v9  ;;  %v4323_v23 = vld [vmem:[%s5889_s17 + $0x10c8] sm:$0xff]  ;;  %v4322_v24 = vld [vmem:[%s5889_s17 + $0x10c0] sm:$0xff] }
 0x265   : > { %2125 = vst [vmem:[%s7156_s10 + $0x170] sm:$0xff] %v1304_v31  ;;  %3549 = vmatprep.mubr.f32.mxu1 %v5729_v34  ;;  %2815 = vmatprep.mubr.f32.mxu0 %v5729_v34  ;;  %v4327_v29 = vld [vmem:[%s5889_s17 + $0x10e8] sm:$0xff]  ;;  %v4330_v30 = vld [vmem:[%s5889_s17 + $0x1100] sm:$0xff]  ;;  %v4962_v32 = vpack.c.bf16 %v4323_v23, %v4320_v19 }
 0x266   : > { %4943 = vmatpush1.bf16.msra.mxu0 %v4942_v20  ;;  %5098 = vmatpush1.bf16.msra.mxu1 %v5097_v21  ;;  %v5737_v31 = vld [vmem:[%s7977_s1 + $0x1c8] sm:$0xff]  ;;  %v4326_v34 = vld [vmem:[%s5889_s17 + $0x10e0] sm:$0xff]  ;;  %v4964_v37 = vpack.c.bf16 %v4330_v30, %v4327_v29 }
 0x267   : > { %v1999_v38 = vpop.f32.mrb[32].mxu1  ;;  %v1308_v39 = vpop.f32.mrb[32].mxu0  ;;  %4945 = vmatprep.subr.bf16.mxu0 %v4944_v25  ;;  %5099 = vmatprep.subr.bf16.mxu1 %v5855_v1  ;;  %v4325_v25 = vld [vmem:[%s5889_s17 + $0x10d8] sm:$0xff]  ;;  %v5742_v9 = vld [vmem:[%s7977_s1 + $0x220] sm:$0xff] }
 0x268   : > { %2129 = vst.msk [vmem:[%s7156_s10 + $0x190] sm:$0xff] %vm2080_vm0, %v1999_v38  ;;  %2127 = vst [vmem:[%s7156_s10 + $0x180] sm:$0xff] %v1308_v39  ;;  %v2001_v44 = vpop.f32.mrb[33].mxu1  ;;  %3550 = vmatmul.mubr.f32.gmra.mrb[74].mxu1 %v5730_v45  ;;  %v1310_v46 = vpop.f32.mrb[33].mxu0  ;;  %2816 = vmatmul.mubr.f32.gmra.mrb[74].mxu0 %v5730_v45  ;;  %v5112_v33 = vpack.c.bf16 %v4325_v25, %v4322_v24  ;;  %v4329_v38 = vld [vmem:[%s5889_s17 + $0x10f8] sm:$0xff]  ;;  %v4328_v39 = vld [vmem:[%s5889_s17 + $0x10f0] sm:$0xff] }
 0x269   : > { %2128 = vst [vmem:[%s7156_s10 + $0x188] sm:$0xff] %v1310_v46  ;;  %3554 = vmatprep.mubr.f32.mxu1 %v5731_v49  ;;  %2821 = vmatprep.mubr.f32.mxu0 %v5731_v49  ;;  %v4333_v44 = vld [vmem:[%s5889_s17 + $0x1118] sm:$0xff]  ;;  %v4336_v45 = vld [vmem:[%s5889_s17 + $0x1130] sm:$0xff]  ;;  %v4966_v47 = vpack.c.bf16 %v4329_v38, %v4326_v34 }
 0x26a   : > { %4947 = vmatpush1.bf16.msra.mxu0 %v4946_v35  ;;  %5101 = vmatpush1.bf16.msra.mxu1 %v5100_v36  ;;  %v5739_v46 = vld [vmem:[%s7977_s1 + $0x1f8] sm:$0xff]  ;;  %v4332_v49 = vld [vmem:[%s5889_s17 + $0x1110] sm:$0xff]  ;;  %v4968_v52 = vpack.c.bf16 %v4336_v45, %v4333_v44 }
 0x26b   : > { %v2004_v53 = vpop.f32.mrb[34].mxu1  ;;  %v1314_v54 = vpop.f32.mrb[34].mxu0  ;;  %4949 = vmatprep.subr.bf16.mxu0 %v4948_v40  ;;  %5102 = vmatprep.subr.bf16.mxu1 %v5855_v1  ;;  %v4331_v40 = vld [vmem:[%s5889_s17 + $0x1108] sm:$0xff]  ;;  %v5744_v24 = vld [vmem:[%s7977_s1 + $0x250] sm:$0xff] }
 0x26c   : > { %2132 = vst.msk [vmem:[%s7156_s10 + $0x1a8] sm:$0xff] %vm2080_vm0, %v2004_v53  ;;  %2130 = vst [vmem:[%s7156_s10 + $0x198] sm:$0xff] %v1314_v54  ;;  %v2006_v59 = vpop.f32.mrb[35].mxu1  ;;  %3555 = vmatmul.mubr.f32.gmra.mrb[76].mxu1 %v5732_v60  ;;  %v1316_v61 = vpop.f32.mrb[35].mxu0  ;;  %2822 = vmatmul.mubr.f32.gmra.mrb[76].mxu0 %v5732_v60  ;;  %v5115_v48 = vpack.c.bf16 %v4331_v40, %v4328_v39  ;;  %v4335_v53 = vld [vmem:[%s5889_s17 + $0x1128] sm:$0xff]  ;;  %v4334_v54 = vld [vmem:[%s5889_s17 + $0x1120] sm:$0xff] }
 0x26d   : > { %2131 = vst [vmem:[%s7156_s10 + $0x1a0] sm:$0xff] %v1316_v61  ;;  %3559 = vmatprep.mubr.f32.mxu1 %v5733_v0  ;;  %2827 = vmatprep.mubr.f32.mxu0 %v5733_v0  ;;  %v4339_v59 = vld [vmem:[%s5889_s17 + $0x1148] sm:$0xff]  ;;  %v4342_v60 = vld [vmem:[%s5889_s17 + $0x1160] sm:$0xff]  ;;  %v4970_v62 = vpack.c.bf16 %v4335_v53, %v4332_v49 }
 0x26e   : > { %4951 = vmatpush1.bf16.msra.mxu0 %v4950_v50  ;;  %5104 = vmatpush1.bf16.msra.mxu1 %v5103_v51  ;;  %v5741_v61 = vld [vmem:[%s7977_s1 + $0x228] sm:$0xff]  ;;  %v4338_v0 = vld [vmem:[%s5889_s17 + $0x1140] sm:$0xff]  ;;  %v4972_v4 = vpack.c.bf16 %v4342_v60, %v4339_v59 }
 0x26f   : > { %v2009_v5 = vpop.f32.mrb[36].mxu1  ;;  %v1320_v6 = vpop.f32.mrb[36].mxu0  ;;  %4953 = vmatprep.subr.bf16.mxu0 %v4952_v55  ;;  %5105 = vmatprep.subr.bf16.mxu1 %v5855_v1  ;;  %v4337_v55 = vld [vmem:[%s5889_s17 + $0x1138] sm:$0xff]  ;;  %v5746_v39 = vld [vmem:[%s7977_s1 + $0x280] sm:$0xff] }
 0x270   : > { %2135 = vst.msk [vmem:[%s7156_s10 + $0x1c0] sm:$0xff] %vm2080_vm0, %v2009_v5  ;;  %2133 = vst [vmem:[%s7156_s10 + $0x1b0] sm:$0xff] %v1320_v6  ;;  %v2011_v11 = vpop.f32.mrb[37].mxu1  ;;  %3560 = vmatmul.mubr.f32.gmra.mrb[78].mxu1 %v5734_v12  ;;  %v1322_v13 = vpop.f32.mrb[37].mxu0  ;;  %2828 = vmatmul.mubr.f32.gmra.mrb[78].mxu0 %v5734_v12  ;;  %v5118_v63 = vpack.c.bf16 %v4337_v55, %v4334_v54  ;;  %v4341_v5 = vld [vmem:[%s5889_s17 + $0x1158] sm:$0xff]  ;;  %v4340_v6 = vld [vmem:[%s5889_s17 + $0x1150] sm:$0xff] }
 0x271   : > { %2134 = vst [vmem:[%s7156_s10 + $0x1b8] sm:$0xff] %v1322_v13  ;;  %3564 = vmatprep.mubr.f32.mxu1 %v5735_v16  ;;  %2833 = vmatprep.mubr.f32.mxu0 %v5735_v16  ;;  %v4345_v11 = vld [vmem:[%s5889_s17 + $0x1178] sm:$0xff]  ;;  %v4348_v12 = vld [vmem:[%s5889_s17 + $0x1190] sm:$0xff]  ;;  %v4974_v14 = vpack.c.bf16 %v4341_v5, %v4338_v0 }
 0x272   : > { %4955 = vmatpush1.bf16.msra.mxu0 %v4954_v2  ;;  %5107 = vmatpush1.bf16.msra.mxu1 %v5106_v3  ;;  %v5743_v13 = vld [vmem:[%s7977_s1 + $0x258] sm:$0xff]  ;;  %v4344_v16 = vld [vmem:[%s5889_s17 + $0x1170] sm:$0xff]  ;;  %v4976_v19 = vpack.c.bf16 %v4348_v12, %v4345_v11 }
 0x273   : > { %v2014_v20 = vpop.f32.mrb[38].mxu1  ;;  %v1326_v21 = vpop.f32.mrb[38].mxu0  ;;  %4957 = vmatprep.subr.bf16.mxu0 %v4956_v7  ;;  %5108 = vmatprep.subr.bf16.mxu1 %v5855_v1  ;;  %v4343_v7 = vld [vmem:[%s5889_s17 + $0x1168] sm:$0xff]  ;;  %v5748_v54 = vld [vmem:[%s7977_s1 + $0x2b0] sm:$0xff]  ;;  %v5751_v0 = vld [vmem:[%s7977_s1 + $0x318] sm:$0xff] }
 0x274   : > { %2138 = vst.msk [vmem:[%s7156_s10 + $0x1d8] sm:$0xff] %vm2080_vm0, %v2014_v20  ;;  %2136 = vst [vmem:[%s7156_s10 + $0x1c8] sm:$0xff] %v1326_v21  ;;  %v2016_v26 = vpop.f32.mrb[39].mxu1  ;;  %3565 = vmatmul.mubr.f32.gmra.mrb[80].mxu1 %v5736_v27  ;;  %v1328_v28 = vpop.f32.mrb[39].mxu0  ;;  %2834 = vmatmul.mubr.f32.gmra.mrb[80].mxu0 %v5736_v27  ;;  %v5121_v15 = vpack.c.bf16 %v4343_v7, %v4340_v6  ;;  %v4347_v20 = vld [vmem:[%s5889_s17 + $0x1188] sm:$0xff]  ;;  %v4346_v21 = vld [vmem:[%s5889_s17 + $0x1180] sm:$0xff] }
 0x275   : > { %2137 = vst [vmem:[%s7156_s10 + $0x1d0] sm:$0xff] %v1328_v28  ;;  %3569 = vmatprep.mubr.f32.mxu1 %v5737_v31  ;;  %2839 = vmatprep.mubr.f32.mxu0 %v5737_v31  ;;  %v4351_v26 = vld [vmem:[%s5889_s17 + $0x11a8] sm:$0xff]  ;;  %v4354_v27 = vld [vmem:[%s5889_s17 + $0x11c0] sm:$0xff]  ;;  %v4978_v29 = vpack.c.bf16 %v4347_v20, %v4344_v16  ;;  %v5755_v12 = vld [vmem:[%s7977_s1 + $0x378] sm:$0xff] }
 0x276   : > { %4959 = vmatpush1.bf16.msra.mxu0 %v4958_v17  ;;  %5110 = vmatpush1.bf16.msra.mxu1 %v5109_v18  ;;  %v5745_v28 = vld [vmem:[%s7977_s1 + $0x288] sm:$0xff]  ;;  %v4350_v31 = vld [vmem:[%s5889_s17 + $0x11a0] sm:$0xff]  ;;  %v4980_v34 = vpack.c.bf16 %v4354_v27, %v4351_v26  ;;  %v5756_v16 = vld [vmem:[%s7977_s1 + $0x370] sm:$0xff] }
 0x277   : > { %v2019_v35 = vpop.f32.mrb[40].mxu1  ;;  %v1332_v36 = vpop.f32.mrb[40].mxu0  ;;  %4961 = vmatprep.subr.bf16.mxu0 %v4960_v22  ;;  %5111 = vmatprep.subr.bf16.mxu1 %v5855_v1  ;;  %v4349_v22 = vld [vmem:[%s5889_s17 + $0x1198] sm:$0xff]  ;;  %v5753_v6 = vld [vmem:[%s7977_s1 + $0x348] sm:$0xff] }
 0x278   : > { %2141 = vst.msk [vmem:[%s7156_s10 + $0x1f0] sm:$0xff] %vm2080_vm0, %v2019_v35  ;;  %2139 = vst [vmem:[%s7156_s10 + $0x1e0] sm:$0xff] %v1332_v36  ;;  %v2021_v41 = vpop.f32.mrb[41].mxu1  ;;  %3570 = vmatmul.mubr.f32.gmra.mrb[82].mxu1 %v5738_v42  ;;  %v1334_v43 = vpop.f32.mrb[41].mxu0  ;;  %2840 = vmatmul.mubr.f32.gmra.mrb[82].mxu0 %v5738_v42  ;;  %v5124_v30 = vpack.c.bf16 %v4349_v22, %v4346_v21  ;;  %v4353_v35 = vld [vmem:[%s5889_s17 + $0x11b8] sm:$0xff]  ;;  %v4352_v36 = vld [vmem:[%s5889_s17 + $0x11b0] sm:$0xff] }
 0x279   : > { %2140 = vst [vmem:[%s7156_s10 + $0x1e8] sm:$0xff] %v1334_v43  ;;  %3574 = vmatprep.mubr.f32.mxu1 %v5739_v46  ;;  %2845 = vmatprep.mubr.f32.mxu0 %v5739_v46  ;;  %v4357_v41 = vld [vmem:[%s5889_s17 + $0x11d8] sm:$0xff]  ;;  %v4360_v42 = vld [vmem:[%s5889_s17 + $0x11f0] sm:$0xff]  ;;  %v4982_v44 = vpack.c.bf16 %v4353_v35, %v4350_v31  ;;  %v5758_v22 = vld [vmem:[%s7977_s1 + $0x3a0] sm:$0xff] }
 0x27a   : > { %4963 = vmatpush1.bf16.msra.mxu0 %v4962_v32  ;;  %5113 = vmatpush1.bf16.msra.mxu1 %v5112_v33  ;;  %v5747_v43 = vld [vmem:[%s7977_s1 + $0x2b8] sm:$0xff]  ;;  %v4356_v46 = vld [vmem:[%s5889_s17 + $0x11d0] sm:$0xff]  ;;  %v4984_v49 = vpack.c.bf16 %v4360_v42, %v4357_v41  ;;  %v5762_v31 = vld [vmem:[%s7977_s1 + $0x400] sm:$0xff] }
 0x27b   : > { %v2024_v50 = vpop.f32.mrb[42].mxu1  ;;  %v1338_v51 = vpop.f32.mrb[42].mxu0  ;;  %4965 = vmatprep.subr.bf16.mxu0 %v4964_v37  ;;  %5114 = vmatprep.subr.bf16.mxu1 %v5855_v1  ;;  %v4355_v37 = vld [vmem:[%s5889_s17 + $0x11c8] sm:$0xff]  ;;  %v5766_v35 = vld [vmem:[%s7977_s1 + $0x460] sm:$0xff]  ;;  %v5772_v41 = vld [vmem:[%s7977_s1 + $0x4f0] sm:$0xff] }
 0x27c   : > { %2144 = vst.msk [vmem:[%s7156_s10 + $0x208] sm:$0xff] %vm2080_vm0, %v2024_v50  ;;  %2142 = vst [vmem:[%s7156_s10 + $0x1f8] sm:$0xff] %v1338_v51  ;;  %v2026_v56 = vpop.f32.mrb[43].mxu1  ;;  %3575 = vmatmul.mubr.f32.gmra.mrb[84].mxu1 %v5740_v57  ;;  %v1340_v58 = vpop.f32.mrb[43].mxu0  ;;  %2846 = vmatmul.mubr.f32.gmra.mrb[84].mxu0 %v5740_v57  ;;  %v5127_v45 = vpack.c.bf16 %v4355_v37, %v4352_v36  ;;  %v4359_v50 = vld [vmem:[%s5889_s17 + $0x11e8] sm:$0xff]  ;;  %v4358_v51 = vld [vmem:[%s5889_s17 + $0x11e0] sm:$0xff] }
 0x27d   : > { %2143 = vst [vmem:[%s7156_s10 + $0x200] sm:$0xff] %v1340_v58  ;;  %3579 = vmatprep.mubr.f32.mxu1 %v5741_v61  ;;  %2851 = vmatprep.mubr.f32.mxu0 %v5741_v61  ;;  %v5749_v56 = vld [vmem:[%s7977_s1 + $0x2e8] sm:$0xff]  ;;  %v4986_v57 = vpack.c.bf16 %v4359_v50, %v4356_v46  ;;  %v5767_v36 = vld [vmem:[%s7977_s1 + $0x498] sm:$0xff]  ;;  %v5768_v37 = vld [vmem:[%s7977_s1 + $0x490] sm:$0xff] }
 0x27e   : > { %4967 = vmatpush1.bf16.msra.mxu0 %v4966_v47  ;;  %5116 = vmatpush1.bf16.msra.mxu1 %v5115_v48  ;;  %v5773_v42 = vld [vmem:[%s7977_s1 + $0x528] sm:$0xff] }
 0x27f   : > { %v2029_v2 = vpop.f32.mrb[44].mxu1  ;;  %v1344_v3 = vpop.f32.mrb[44].mxu0  ;;  %4969 = vmatprep.subr.bf16.mxu0 %v4968_v52  ;;  %5117 = vmatprep.subr.bf16.mxu1 %v5855_v1  ;;  %v4361_v52 = vld [vmem:[%s5889_s17 + $0x11f8] sm:$0xff]  ;;  %v5777_v46 = vld [vmem:[%s7977_s1 + $0x588] sm:$0xff] }
 0x280   : > { %2147 = vst.msk [vmem:[%s7156_s10 + $0x220] sm:$0xff] %vm2080_vm0, %v2029_v2  ;;  %2145 = vst [vmem:[%s7156_s10 + $0x210] sm:$0xff] %v1344_v3  ;;  %v2031_v8 = vpop.f32.mrb[45].mxu1  ;;  %3580 = vmatmul.mubr.f32.gmra.mrb[86].mxu1 %v5742_v9  ;;  %v1346_v10 = vpop.f32.mrb[45].mxu0  ;;  %2852 = vmatmul.mubr.f32.gmra.mrb[86].mxu0 %v5742_v9  ;;  %v5130_v58 = vpack.c.bf16 %v4361_v52, %v4358_v51  ;;  %v5781_v50 = vld [vmem:[%s7977_s1 + $0x5e8] sm:$0xff]  ;;  %v5782_v51 = vld [vmem:[%s7977_s1 + $0x5e0] sm:$0xff] }
 0x281   : > { %2146 = vst [vmem:[%s7156_s10 + $0x218] sm:$0xff] %v1346_v10  ;;  %3584 = vmatprep.mubr.f32.mxu1 %v5743_v13  ;;  %2857 = vmatprep.mubr.f32.mxu0 %v5743_v13  ;;  %v5754_v10 = vld [vmem:[%s7977_s1 + $0x340] sm:$0xff]  ;;  %v5783_v52 = vld [vmem:[%s7977_s1 + $0x28] sm:$0xff] }
 0x282   : > { %4971 = vmatpush1.bf16.msra.mxu0 %v4970_v62  ;;  %5119 = vmatpush1.bf16.msra.mxu1 %v5118_v63  ;;  %v5750_v62 = vld [vmem:[%s7977_s1 + $0x2e0] sm:$0xff] }
 0x283   : > { %v2034_v17 = vpop.f32.mrb[46].mxu1  ;;  %v1350_v18 = vpop.f32.mrb[46].mxu0  ;;  %4973 = vmatprep.subr.bf16.mxu0 %v4972_v4  ;;  %5120 = vmatprep.subr.bf16.mxu1 %v5855_v1  ;;  %v5752_v4 = vld [vmem:[%s7977_s1 + $0x310] sm:$0xff] }
 0x284   : > { %2150 = vst.msk [vmem:[%s7156_s10 + $0x238] sm:$0xff] %vm2080_vm0, %v2034_v17  ;;  %2148 = vst [vmem:[%s7156_s10 + $0x228] sm:$0xff] %v1350_v18  ;;  %v2036_v23 = vpop.f32.mrb[47].mxu1  ;;  %3585 = vmatmul.mubr.f32.gmra.mrb[88].mxu1 %v5744_v24  ;;  %v1352_v25 = vpop.f32.mrb[47].mxu0  ;;  %2858 = vmatmul.mubr.f32.gmra.mrb[88].mxu0 %v5744_v24  ;;  %v5757_v18 = vld [vmem:[%s7977_s1 + $0x3a8] sm:$0xff]  ;;  %v5759_v24 = vld [vmem:[%s7977_s1 + $0x3d8] sm:$0xff] }
 0x285   : > { %2149 = vst [vmem:[%s7156_s10 + $0x230] sm:$0xff] %v1352_v25  ;;  %3589 = vmatprep.mubr.f32.mxu1 %v5745_v28  ;;  %2863 = vmatprep.mubr.f32.mxu0 %v5745_v28  ;;  %v5760_v28 = vld [vmem:[%s7977_s1 + $0x3d0] sm:$0xff] }
 0x286   : > { %4975 = vmatpush1.bf16.msra.mxu0 %v4974_v14  ;;  %5122 = vmatpush1.bf16.msra.mxu1 %v5121_v15 }
 0x287   : > { %v2039_v32 = vpop.f32.mrb[48].mxu1  ;;  %v1356_v33 = vpop.f32.mrb[48].mxu0  ;;  %4977 = vmatprep.subr.bf16.mxu0 %v4976_v19  ;;  %5123 = vmatprep.subr.bf16.mxu1 %v5855_v1 }
 0x288   : > { %2153 = vst.msk [vmem:[%s7156_s10 + $0x250] sm:$0xff] %vm2080_vm0, %v2039_v32  ;;  %2151 = vst [vmem:[%s7156_s10 + $0x240] sm:$0xff] %v1356_v33  ;;  %v2041_v38 = vpop.f32.mrb[49].mxu1  ;;  %3590 = vmatmul.mubr.f32.gmra.mrb[90].mxu1 %v5746_v39  ;;  %v1358_v40 = vpop.f32.mrb[49].mxu0  ;;  %2864 = vmatmul.mubr.f32.gmra.mrb[90].mxu0 %v5746_v39  ;;  %v5763_v32 = vld [vmem:[%s7977_s1 + $0x438] sm:$0xff]  ;;  %v5764_v33 = vld [vmem:[%s7977_s1 + $0x430] sm:$0xff] }
 0x289   : > { %2152 = vst [vmem:[%s7156_s10 + $0x248] sm:$0xff] %v1358_v40  ;;  %3594 = vmatprep.mubr.f32.mxu1 %v5747_v43  ;;  %2869 = vmatprep.mubr.f32.mxu0 %v5747_v43  ;;  %v5769_v38 = vld [vmem:[%s7977_s1 + $0x4c8] sm:$0xff]  ;;  %v5770_v39 = vld [vmem:[%s7977_s1 + $0x4c0] sm:$0xff]  ;;  %v5771_v40 = vld [vmem:[%s7977_s1 + $0x4f8] sm:$0xff] }
 0x28a   : > { %4979 = vmatpush1.bf16.msra.mxu0 %v4978_v29  ;;  %5125 = vmatpush1.bf16.msra.mxu1 %v5124_v30  ;;  %v5761_v30 = vld [vmem:[%s7977_s1 + $0x408] sm:$0xff]  ;;  %v5774_v43 = vld [vmem:[%s7977_s1 + $0x520] sm:$0xff] }
 0x28b   : > { %v2044_v47 = vpop.f32.mrb[50].mxu1  ;;  %v1362_v48 = vpop.f32.mrb[50].mxu0  ;;  %4981 = vmatprep.subr.bf16.mxu0 %v4980_v34  ;;  %5126 = vmatprep.subr.bf16.mxu1 %v5855_v1  ;;  %v5765_v34 = vld [vmem:[%s7977_s1 + $0x468] sm:$0xff] }
 0x28c   : > { %2156 = vst.msk [vmem:[%s7156_s10 + $0x268] sm:$0xff] %vm2080_vm0, %v2044_v47  ;;  %2154 = vst [vmem:[%s7156_s10 + $0x258] sm:$0xff] %v1362_v48  ;;  %v2046_v53 = vpop.f32.mrb[51].mxu1  ;;  %3595 = vmatmul.mubr.f32.gmra.mrb[92].mxu1 %v5748_v54  ;;  %v1364_v55 = vpop.f32.mrb[51].mxu0  ;;  %2870 = vmatmul.mubr.f32.gmra.mrb[92].mxu0 %v5748_v54  ;;  %v5778_v47 = vld [vmem:[%s7977_s1 + $0x580] sm:$0xff]  ;;  %v5779_v48 = vld [vmem:[%s7977_s1 + $0x5b8] sm:$0xff] }
 0x28d   : > { %2155 = vst [vmem:[%s7156_s10 + $0x260] sm:$0xff] %v1364_v55  ;;  %3599 = vmatprep.mubr.f32.mxu1 %v5749_v56  ;;  %2875 = vmatprep.mubr.f32.mxu0 %v5749_v56  ;;  %v5784_v53 = vld [vmem:[%s7977_s1 + $0x20] sm:$0xff]  ;;  %v5785_v54 = vld [vmem:[%s7977_s1 + $0x58] sm:$0xff]  ;;  %v5786_v55 = vld [vmem:[%s7977_s1 + $0x50] sm:$0xff] }
 0x28e   : > { %4983 = vmatpush1.bf16.msra.mxu0 %v4982_v44  ;;  %5128 = vmatpush1.bf16.msra.mxu1 %v5127_v45  ;;  %v5775_v44 = vld [vmem:[%s7977_s1 + $0x558] sm:$0xff]  ;;  %v5776_v45 = vld [vmem:[%s7977_s1 + $0x550] sm:$0xff]  ;;  %v5787_v56 = vld [vmem:[%s7977_s1 + $0x88] sm:$0xff] }
 0x28f   : > { %v2049_v59 = vpop.f32.mrb[52].mxu1  ;;  %v1368_v60 = vpop.f32.mrb[52].mxu0  ;;  %4985 = vmatprep.subr.bf16.mxu0 %v4984_v49  ;;  %5129 = vmatprep.subr.bf16.mxu1 %v5855_v1  ;;  %v5780_v49 = vld [vmem:[%s7977_s1 + $0x5b0] sm:$0xff] }
 0x290   : > { %2159 = vst.msk [vmem:[%s7156_s10 + $0x280] sm:$0xff] %vm2080_vm0, %v2049_v59  ;;  %2157 = vst [vmem:[%s7156_s10 + $0x270] sm:$0xff] %v1368_v60  ;;  %v2051_v61 = vpop.f32.mrb[53].mxu1  ;;  %3600 = vmatmul.mubr.f32.gmra.mrb[94].mxu1 %v5750_v62  ;;  %v1370_v63 = vpop.f32.mrb[53].mxu0  ;;  %2876 = vmatmul.mubr.f32.gmra.mrb[94].mxu0 %v5750_v62  ;;  %v5790_v59 = vld [vmem:[%s7977_s1 + $0xb0] sm:$0xff]  ;;  %v5791_v60 = vld [vmem:[%s7977_s1 + $0xe8] sm:$0xff] }
 0x291   : > { %2158 = vst [vmem:[%s7156_s10 + $0x278] sm:$0xff] %v1370_v63  ;;  %3604 = vmatprep.mubr.f32.mxu1 %v5751_v0  ;;  %2881 = vmatprep.mubr.f32.mxu0 %v5751_v0  ;;  %v5792_v61 = vld [vmem:[%s7977_s1 + $0xe0] sm:$0xff]  ;;  %v5793_v62 = vld [vmem:[%s7977_s1 + $0x118] sm:$0xff]  ;;  %v5794_v63 = vld [vmem:[%s7977_s1 + $0x110] sm:$0xff] }
 0x292   : > { %4987 = vmatpush1.bf16.msra.mxu0 %v4986_v57  ;;  %5131 = vmatpush1.bf16.msra.mxu1 %v5130_v58  ;;  %v5788_v57 = vld [vmem:[%s7977_s1 + $0x80] sm:$0xff]  ;;  %v5789_v58 = vld [vmem:[%s7977_s1 + $0xb8] sm:$0xff]  ;;  %v5795_v0 = vld [vmem:[%s7977_s1 + $0x148] sm:$0xff] }
 0x293   : > { %v2054_v1 = vpop.f32.mrb[54].mxu1  ;;  %v1374_v2 = vpop.f32.mrb[54].mxu0 }
 0x294   : > { %2162 = vst.msk [vmem:[%s7156_s10 + $0x298] sm:$0xff] %vm2080_vm0, %v2054_v1  ;;  %2160 = vst [vmem:[%s7156_s10 + $0x288] sm:$0xff] %v1374_v2  ;;  %v2056_v3 = vpop.f32.mrb[55].mxu1  ;;  %3605 = vmatmul.mubr.f32.gmra.mrb[96].mxu1 %v5752_v4  ;;  %v1376_v5 = vpop.f32.mrb[55].mxu0  ;;  %2882 = vmatmul.mubr.f32.gmra.mrb[96].mxu0 %v5752_v4  ;;  %v5796_v1 = vld [vmem:[%s7977_s1 + $0x140] sm:$0xff]  ;;  %v5797_v2 = vld [vmem:[%s7977_s1 + $0x178] sm:$0xff] }
 0x295   : > { %2161 = vst [vmem:[%s7156_s10 + $0x290] sm:$0xff] %v1376_v5  ;;  %3609 = vmatprep.mubr.f32.mxu1 %v5753_v6  ;;  %2887 = vmatprep.mubr.f32.mxu0 %v5753_v6  ;;  %v5798_v3 = vld [vmem:[%s7977_s1 + $0x170] sm:$0xff]  ;;  %v5799_v4 = vld [vmem:[%s7977_s1 + $0x1a8] sm:$0xff]  ;;  %v5800_v5 = vld [vmem:[%s7977_s1 + $0x1a0] sm:$0xff] }
 0x296   : > { %v5801_v6 = vld [vmem:[%s7977_s1 + $0x1d8] sm:$0xff] }
 0x297   : > { %v2059_v7 = vpop.f32.mrb[56].mxu1  ;;  %v1380_v8 = vpop.f32.mrb[56].mxu0 }
 0x298   : > { %2165 = vst.msk [vmem:[%s7156_s10 + $0x2b0] sm:$0xff] %vm2080_vm0, %v2059_v7  ;;  %2163 = vst [vmem:[%s7156_s10 + $0x2a0] sm:$0xff] %v1380_v8  ;;  %v2061_v9 = vpop.f32.mrb[57].mxu1  ;;  %3610 = vmatmul.mubr.f32.gmra.mrb[98].mxu1 %v5754_v10  ;;  %v1382_v11 = vpop.f32.mrb[57].mxu0  ;;  %2888 = vmatmul.mubr.f32.gmra.mrb[98].mxu0 %v5754_v10  ;;  %v5802_v7 = vld [vmem:[%s7977_s1 + $0x1d0] sm:$0xff]  ;;  %v5803_v8 = vld [vmem:[%s7977_s1 + $0x208] sm:$0xff] }
 0x299   : > { %2164 = vst [vmem:[%s7156_s10 + $0x2a8] sm:$0xff] %v1382_v11  ;;  %3614 = vmatprep.mubr.f32.mxu1 %v5755_v12  ;;  %2893 = vmatprep.mubr.f32.mxu0 %v5755_v12  ;;  %v5804_v9 = vld [vmem:[%s7977_s1 + $0x200] sm:$0xff]  ;;  %v5805_v10 = vld [vmem:[%s7977_s1 + $0x238] sm:$0xff]  ;;  %v5806_v11 = vld [vmem:[%s7977_s1 + $0x230] sm:$0xff] }
 0x29a   : > { %v5807_v12 = vld [vmem:[%s7977_s1 + $0x268] sm:$0xff] }
 0x29b   : > { %v2064_v13 = vpop.f32.mrb[58].mxu1  ;;  %v1386_v14 = vpop.f32.mrb[58].mxu0 }
 0x29c   : > { %2168 = vst.msk [vmem:[%s7156_s10 + $0x2c8] sm:$0xff] %vm2080_vm0, %v2064_v13  ;;  %2166 = vst [vmem:[%s7156_s10 + $0x2b8] sm:$0xff] %v1386_v14  ;;  %v2066_v15 = vpop.f32.mrb[59].mxu1  ;;  %3615 = vmatmul.mubr.f32.gmra.mrb[100].mxu1 %v5756_v16  ;;  %v1388_v17 = vpop.f32.mrb[59].mxu0  ;;  %2894 = vmatmul.mubr.f32.gmra.mrb[100].mxu0 %v5756_v16  ;;  %v5808_v13 = vld [vmem:[%s7977_s1 + $0x260] sm:$0xff]  ;;  %v5809_v14 = vld [vmem:[%s7977_s1 + $0x298] sm:$0xff] }
 0x29d   : > { %2167 = vst [vmem:[%s7156_s10 + $0x2c0] sm:$0xff] %v1388_v17  ;;  %3619 = vmatprep.mubr.f32.mxu1 %v5757_v18  ;;  %2899 = vmatprep.mubr.f32.mxu0 %v5757_v18  ;;  %v5810_v15 = vld [vmem:[%s7977_s1 + $0x290] sm:$0xff]  ;;  %v5811_v16 = vld [vmem:[%s7977_s1 + $0x2c8] sm:$0xff]  ;;  %v5812_v17 = vld [vmem:[%s7977_s1 + $0x2c0] sm:$0xff] }
 0x29e   : > { %v5813_v18 = vld [vmem:[%s7977_s1 + $0x2f8] sm:$0xff] }
 0x29f   : > { %v2069_v19 = vpop.f32.mrb[60].mxu1  ;;  %v1392_v20 = vpop.f32.mrb[60].mxu0 }
 0x2a0   : > { %2171 = vst.msk [vmem:[%s7156_s10 + $0x2e0] sm:$0xff] %vm2080_vm0, %v2069_v19  ;;  %2169 = vst [vmem:[%s7156_s10 + $0x2d0] sm:$0xff] %v1392_v20  ;;  %v2071_v21 = vpop.f32.mrb[61].mxu1  ;;  %3620 = vmatmul.mubr.f32.gmra.mrb[102].mxu1 %v5758_v22  ;;  %v1394_v23 = vpop.f32.mrb[61].mxu0  ;;  %2900 = vmatmul.mubr.f32.gmra.mrb[102].mxu0 %v5758_v22  ;;  %v5814_v19 = vld [vmem:[%s7977_s1 + $0x2f0] sm:$0xff]  ;;  %v5815_v20 = vld [vmem:[%s7977_s1 + $0x328] sm:$0xff] }
 0x2a1   : > { %2170 = vst [vmem:[%s7156_s10 + $0x2d8] sm:$0xff] %v1394_v23  ;;  %3624 = vmatprep.mubr.f32.mxu1 %v5759_v24  ;;  %2905 = vmatprep.mubr.f32.mxu0 %v5759_v24  ;;  %v5816_v21 = vld [vmem:[%s7977_s1 + $0x320] sm:$0xff]  ;;  %v5817_v22 = vld [vmem:[%s7977_s1 + $0x358] sm:$0xff]  ;;  %v5818_v23 = vld [vmem:[%s7977_s1 + $0x350] sm:$0xff] }
 0x2a2   : > { %v5819_v24 = vld [vmem:[%s7977_s1 + $0x388] sm:$0xff] }
 0x2a3   : > { %v2074_v25 = vpop.f32.mrb[62].mxu1  ;;  %v1398_v26 = vpop.f32.mrb[62].mxu0 }
 0x2a4   : > { %2174 = vst.msk [vmem:[%s7156_s10 + $0x2f8] sm:$0xff] %vm2080_vm0, %v2074_v25  ;;  %2172 = vst [vmem:[%s7156_s10 + $0x2e8] sm:$0xff] %v1398_v26  ;;  %v2076_v27 = vpop.f32.mrb[63].mxu1  ;;  %3625 = vmatmul.mubr.f32.gmra.mrb[104].mxu1 %v5760_v28  ;;  %v1400_v29 = vpop.f32.mrb[63].mxu0  ;;  %2906 = vmatmul.mubr.f32.gmra.mrb[104].mxu0 %v5760_v28  ;;  %v5820_v25 = vld [vmem:[%s7977_s1 + $0x380] sm:$0xff]  ;;  %v5821_v26 = vld [vmem:[%s7977_s1 + $0x3b8] sm:$0xff] }
 0x2a5   : > { %2173 = vst [vmem:[%s7156_s10 + $0x2f0] sm:$0xff] %v1400_v29  ;;  %3629 = vmatprep.mubr.f32.mxu1 %v5761_v30  ;;  %2911 = vmatprep.mubr.f32.mxu0 %v5761_v30  ;;  %v5822_v27 = vld [vmem:[%s7977_s1 + $0x3b0] sm:$0xff]  ;;  %v5823_v28 = vld [vmem:[%s7977_s1 + $0x3e8] sm:$0xff]  ;;  %v5824_v29 = vld [vmem:[%s7977_s1 + $0x3e0] sm:$0xff] }
 0x2a6   : > { %v5825_v30 = vld [vmem:[%s7977_s1 + $0x418] sm:$0xff] }
 0x2a8   : > { %3630 = vmatmul.mubr.f32.gmra.mrb[106].mxu1 %v5762_v31  ;;  %2912 = vmatmul.mubr.f32.gmra.mrb[106].mxu0 %v5762_v31  ;;  %v5826_v31 = vld [vmem:[%s7977_s1 + $0x410] sm:$0xff] }
 0x2a9   : > { %3634 = vmatprep.mubr.f32.mxu1 %v5763_v32  ;;  %2917 = vmatprep.mubr.f32.mxu0 %v5763_v32  ;;  %v5827_v32 = vld [vmem:[%s7977_s1 + $0x448] sm:$0xff] }
 0x2ac   : > { %3635 = vmatmul.mubr.f32.gmra.mrb[108].mxu1 %v5764_v33  ;;  %2918 = vmatmul.mubr.f32.gmra.mrb[108].mxu0 %v5764_v33  ;;  %v5828_v33 = vld [vmem:[%s7977_s1 + $0x440] sm:$0xff] }
 0x2ad   : > { %3639 = vmatprep.mubr.f32.mxu1 %v5765_v34  ;;  %2923 = vmatprep.mubr.f32.mxu0 %v5765_v34  ;;  %v5829_v34 = vld [vmem:[%s7977_s1 + $0x478] sm:$0xff] }
 0x2b0   : > { %3640 = vmatmul.mubr.f32.gmra.mrb[110].mxu1 %v5766_v35  ;;  %2924 = vmatmul.mubr.f32.gmra.mrb[110].mxu0 %v5766_v35  ;;  %v5830_v35 = vld [vmem:[%s7977_s1 + $0x470] sm:$0xff] }
 0x2b1   : > { %3644 = vmatprep.mubr.f32.mxu1 %v5767_v36  ;;  %2929 = vmatprep.mubr.f32.mxu0 %v5767_v36  ;;  %v5831_v36 = vld [vmem:[%s7977_s1 + $0x4a8] sm:$0xff] }
 0x2b4   : > { %3645 = vmatmul.mubr.f32.gmra.mrb[112].mxu1 %v5768_v37  ;;  %2930 = vmatmul.mubr.f32.gmra.mrb[112].mxu0 %v5768_v37  ;;  %v5832_v37 = vld [vmem:[%s7977_s1 + $0x4a0] sm:$0xff] }
 0x2b5   : > { %3649 = vmatprep.mubr.f32.mxu1 %v5769_v38  ;;  %2935 = vmatprep.mubr.f32.mxu0 %v5769_v38  ;;  %v5833_v38 = vld [vmem:[%s7977_s1 + $0x4d8] sm:$0xff] }
 0x2b8   : > { %3650 = vmatmul.mubr.f32.gmra.mrb[114].mxu1 %v5770_v39  ;;  %2936 = vmatmul.mubr.f32.gmra.mrb[114].mxu0 %v5770_v39  ;;  %v5834_v39 = vld [vmem:[%s7977_s1 + $0x4d0] sm:$0xff] }
 0x2b9   : > { %3654 = vmatprep.mubr.f32.mxu1 %v5771_v40  ;;  %2941 = vmatprep.mubr.f32.mxu0 %v5771_v40  ;;  %v5835_v40 = vld [vmem:[%s7977_s1 + $0x508] sm:$0xff] }
 0x2bc   : > { %3655 = vmatmul.mubr.f32.gmra.mrb[116].mxu1 %v5772_v41  ;;  %2942 = vmatmul.mubr.f32.gmra.mrb[116].mxu0 %v5772_v41  ;;  %v5836_v41 = vld [vmem:[%s7977_s1 + $0x500] sm:$0xff] }
 0x2bd   : > { %3659 = vmatprep.mubr.f32.mxu1 %v5773_v42  ;;  %2947 = vmatprep.mubr.f32.mxu0 %v5773_v42  ;;  %v5837_v42 = vld [vmem:[%s7977_s1 + $0x538] sm:$0xff] }
 0x2c0   : > { %3660 = vmatmul.mubr.f32.gmra.mrb[118].mxu1 %v5774_v43  ;;  %2948 = vmatmul.mubr.f32.gmra.mrb[118].mxu0 %v5774_v43  ;;  %v5838_v43 = vld [vmem:[%s7977_s1 + $0x530] sm:$0xff] }
 0x2c1   : > { %3664 = vmatprep.mubr.f32.mxu1 %v5775_v44  ;;  %2953 = vmatprep.mubr.f32.mxu0 %v5775_v44  ;;  %v5839_v44 = vld [vmem:[%s7977_s1 + $0x568] sm:$0xff] }
 0x2c4   : > { %3665 = vmatmul.mubr.f32.gmra.mrb[120].mxu1 %v5776_v45  ;;  %2954 = vmatmul.mubr.f32.gmra.mrb[120].mxu0 %v5776_v45  ;;  %v5840_v45 = vld [vmem:[%s7977_s1 + $0x560] sm:$0xff] }
 0x2c5   : > { %3669 = vmatprep.mubr.f32.mxu1 %v5777_v46  ;;  %2959 = vmatprep.mubr.f32.mxu0 %v5777_v46  ;;  %v5841_v46 = vld [vmem:[%s7977_s1 + $0x598] sm:$0xff] }
 0x2c8   : > { %3670 = vmatmul.mubr.f32.gmra.mrb[122].mxu1 %v5778_v47  ;;  %2960 = vmatmul.mubr.f32.gmra.mrb[122].mxu0 %v5778_v47  ;;  %v5842_v47 = vld [vmem:[%s7977_s1 + $0x590] sm:$0xff] }
 0x2c9   : > { %3674 = vmatprep.mubr.f32.mxu1 %v5779_v48  ;;  %2965 = vmatprep.mubr.f32.mxu0 %v5779_v48  ;;  %v5843_v48 = vld [vmem:[%s7977_s1 + $0x5c8] sm:$0xff] }
 0x2cc   : > { %3675 = vmatmul.mubr.f32.gmra.mrb[124].mxu1 %v5780_v49  ;;  %2966 = vmatmul.mubr.f32.gmra.mrb[124].mxu0 %v5780_v49  ;;  %v5844_v49 = vld [vmem:[%s7977_s1 + $0x5c0] sm:$0xff] }
 0x2cd   : > { %3679 = vmatprep.mubr.f32.mxu1 %v5781_v50  ;;  %2971 = vmatprep.mubr.f32.mxu0 %v5781_v50  ;;  %v5845_v50 = vld [vmem:[%s7977_s1 + $0x5f8] sm:$0xff] }
 0x2d0   : > { %3680 = vmatmul.mubr.f32.gmra.mrb[126].mxu1 %v5782_v51  ;;  %2972 = vmatmul.mubr.f32.gmra.mrb[126].mxu0 %v5782_v51  ;;  %v5846_v51 = vld [vmem:[%s7977_s1 + $0x5f0] sm:$0xff] }
 0x2d1   : > { %3749 = vmatprep.mubr.f32.mxu1 %v5783_v52  ;;  %3042 = vmatprep.mubr.f32.mxu0 %v5783_v52 }
 0x2d4   : > { %3750 = vmatmul.mubr.f32.vlgmr.msra.gmra.mrb[64].mxu1 %v5784_v53  ;;  %3043 = vmatmul.mubr.f32.vlgmr.msra.gmra.mrb[64].mxu0 %v5784_v53 }
 0x2d5   : > { %3754 = vmatprep.mubr.f32.mxu1 %v5785_v54  ;;  %3048 = vmatprep.mubr.f32.mxu0 %v5785_v54 }
 0x2d8   : > { %3755 = vmatmul.mubr.f32.gmra.mrb[66].mxu1 %v5786_v55  ;;  %3049 = vmatmul.mubr.f32.gmra.mrb[66].mxu0 %v5786_v55 }
 0x2d9   : > { %3759 = vmatprep.mubr.f32.mxu1 %v5787_v56  ;;  %3054 = vmatprep.mubr.f32.mxu0 %v5787_v56 }
 0x2dc   : > { %3760 = vmatmul.mubr.f32.gmra.mrb[68].mxu1 %v5788_v57  ;;  %3055 = vmatmul.mubr.f32.gmra.mrb[68].mxu0 %v5788_v57 }
 0x2dd   : > { %3764 = vmatprep.mubr.f32.mxu1 %v5789_v58  ;;  %3060 = vmatprep.mubr.f32.mxu0 %v5789_v58 }
 0x2e0   : > { %3765 = vmatmul.mubr.f32.gmra.mrb[70].mxu1 %v5790_v59  ;;  %3061 = vmatmul.mubr.f32.gmra.mrb[70].mxu0 %v5790_v59 }
 0x2e1   : > { %3769 = vmatprep.mubr.f32.mxu1 %v5791_v60  ;;  %3066 = vmatprep.mubr.f32.mxu0 %v5791_v60 }
 0x2e4   : > { %3770 = vmatmul.mubr.f32.gmra.mrb[72].mxu1 %v5792_v61  ;;  %3067 = vmatmul.mubr.f32.gmra.mrb[72].mxu0 %v5792_v61 }
 0x2e5   : > { %3774 = vmatprep.mubr.f32.mxu1 %v5793_v62  ;;  %3072 = vmatprep.mubr.f32.mxu0 %v5793_v62 }
 0x2e8   : > { %3775 = vmatmul.mubr.f32.gmra.mrb[74].mxu1 %v5794_v63  ;;  %3073 = vmatmul.mubr.f32.gmra.mrb[74].mxu0 %v5794_v63 }
 0x2e9   : > { %3779 = vmatprep.mubr.f32.mxu1 %v5795_v0  ;;  %3078 = vmatprep.mubr.f32.mxu0 %v5795_v0 }
 0x2ec   : > { %3780 = vmatmul.mubr.f32.gmra.mrb[76].mxu1 %v5796_v1  ;;  %3079 = vmatmul.mubr.f32.gmra.mrb[76].mxu0 %v5796_v1 }
 0x2ed   : > { %3784 = vmatprep.mubr.f32.mxu1 %v5797_v2  ;;  %3084 = vmatprep.mubr.f32.mxu0 %v5797_v2 }
 0x2f0   : > { %3785 = vmatmul.mubr.f32.gmra.mrb[78].mxu1 %v5798_v3  ;;  %3085 = vmatmul.mubr.f32.gmra.mrb[78].mxu0 %v5798_v3 }
 0x2f1   : > { %3789 = vmatprep.mubr.f32.mxu1 %v5799_v4  ;;  %3090 = vmatprep.mubr.f32.mxu0 %v5799_v4 }
 0x2f4   : > { %3790 = vmatmul.mubr.f32.gmra.mrb[80].mxu1 %v5800_v5  ;;  %3091 = vmatmul.mubr.f32.gmra.mrb[80].mxu0 %v5800_v5 }
 0x2f5   : > { %3794 = vmatprep.mubr.f32.mxu1 %v5801_v6  ;;  %3096 = vmatprep.mubr.f32.mxu0 %v5801_v6 }
 0x2f8   : > { %3795 = vmatmul.mubr.f32.gmra.mrb[82].mxu1 %v5802_v7  ;;  %3097 = vmatmul.mubr.f32.gmra.mrb[82].mxu0 %v5802_v7 }
 0x2f9   : > { %3799 = vmatprep.mubr.f32.mxu1 %v5803_v8  ;;  %3102 = vmatprep.mubr.f32.mxu0 %v5803_v8 }
 0x2fc   : > { %3800 = vmatmul.mubr.f32.gmra.mrb[84].mxu1 %v5804_v9  ;;  %3103 = vmatmul.mubr.f32.gmra.mrb[84].mxu0 %v5804_v9 }
 0x2fd   : > { %3804 = vmatprep.mubr.f32.mxu1 %v5805_v10  ;;  %3108 = vmatprep.mubr.f32.mxu0 %v5805_v10 }
 0x300   : > { %3805 = vmatmul.mubr.f32.gmra.mrb[86].mxu1 %v5806_v11  ;;  %3109 = vmatmul.mubr.f32.gmra.mrb[86].mxu0 %v5806_v11 }
 0x301   : > { %3809 = vmatprep.mubr.f32.mxu1 %v5807_v12  ;;  %3114 = vmatprep.mubr.f32.mxu0 %v5807_v12 }
 0x304   : > { %3810 = vmatmul.mubr.f32.gmra.mrb[88].mxu1 %v5808_v13  ;;  %3115 = vmatmul.mubr.f32.gmra.mrb[88].mxu0 %v5808_v13 }
 0x305   : > { %3814 = vmatprep.mubr.f32.mxu1 %v5809_v14  ;;  %3120 = vmatprep.mubr.f32.mxu0 %v5809_v14 }
 0x308   : > { %3815 = vmatmul.mubr.f32.gmra.mrb[90].mxu1 %v5810_v15  ;;  %3121 = vmatmul.mubr.f32.gmra.mrb[90].mxu0 %v5810_v15 }
 0x309   : > { %3819 = vmatprep.mubr.f32.mxu1 %v5811_v16  ;;  %3126 = vmatprep.mubr.f32.mxu0 %v5811_v16 }
 0x30c   : > { %3820 = vmatmul.mubr.f32.gmra.mrb[92].mxu1 %v5812_v17  ;;  %3127 = vmatmul.mubr.f32.gmra.mrb[92].mxu0 %v5812_v17 }
 0x30d   : > { %3824 = vmatprep.mubr.f32.mxu1 %v5813_v18  ;;  %3132 = vmatprep.mubr.f32.mxu0 %v5813_v18 }
 0x310   : > { %3825 = vmatmul.mubr.f32.gmra.mrb[94].mxu1 %v5814_v19  ;;  %3133 = vmatmul.mubr.f32.gmra.mrb[94].mxu0 %v5814_v19 }
 0x311   : > { %3829 = vmatprep.mubr.f32.mxu1 %v5815_v20  ;;  %3138 = vmatprep.mubr.f32.mxu0 %v5815_v20 }
 0x314   : > { %3830 = vmatmul.mubr.f32.gmra.mrb[96].mxu1 %v5816_v21  ;;  %3139 = vmatmul.mubr.f32.gmra.mrb[96].mxu0 %v5816_v21 }
 0x315   : > { %3834 = vmatprep.mubr.f32.mxu1 %v5817_v22  ;;  %3144 = vmatprep.mubr.f32.mxu0 %v5817_v22 }
 0x318   : > { %3835 = vmatmul.mubr.f32.gmra.mrb[98].mxu1 %v5818_v23  ;;  %3145 = vmatmul.mubr.f32.gmra.mrb[98].mxu0 %v5818_v23 }
 0x319   : > { %3839 = vmatprep.mubr.f32.mxu1 %v5819_v24  ;;  %3150 = vmatprep.mubr.f32.mxu0 %v5819_v24 }
 0x31c   : > { %3840 = vmatmul.mubr.f32.gmra.mrb[100].mxu1 %v5820_v25  ;;  %3151 = vmatmul.mubr.f32.gmra.mrb[100].mxu0 %v5820_v25 }
 0x31d   : > { %3844 = vmatprep.mubr.f32.mxu1 %v5821_v26  ;;  %3156 = vmatprep.mubr.f32.mxu0 %v5821_v26 }
 0x320   : > { %3845 = vmatmul.mubr.f32.gmra.mrb[102].mxu1 %v5822_v27  ;;  %3157 = vmatmul.mubr.f32.gmra.mrb[102].mxu0 %v5822_v27 }
 0x321   : > { %3849 = vmatprep.mubr.f32.mxu1 %v5823_v28  ;;  %3162 = vmatprep.mubr.f32.mxu0 %v5823_v28 }
 0x324   : > { %3850 = vmatmul.mubr.f32.gmra.mrb[104].mxu1 %v5824_v29  ;;  %3163 = vmatmul.mubr.f32.gmra.mrb[104].mxu0 %v5824_v29 }
 0x325   : > { %3854 = vmatprep.mubr.f32.mxu1 %v5825_v30  ;;  %3168 = vmatprep.mubr.f32.mxu0 %v5825_v30 }
 0x328   : > { %3855 = vmatmul.mubr.f32.gmra.mrb[106].mxu1 %v5826_v31  ;;  %3169 = vmatmul.mubr.f32.gmra.mrb[106].mxu0 %v5826_v31 }
 0x329   : > { %3859 = vmatprep.mubr.f32.mxu1 %v5827_v32  ;;  %3174 = vmatprep.mubr.f32.mxu0 %v5827_v32 }
 0x32c   : > { %3860 = vmatmul.mubr.f32.gmra.mrb[108].mxu1 %v5828_v33  ;;  %3175 = vmatmul.mubr.f32.gmra.mrb[108].mxu0 %v5828_v33 }
 0x32d   : > { %3864 = vmatprep.mubr.f32.mxu1 %v5829_v34  ;;  %3180 = vmatprep.mubr.f32.mxu0 %v5829_v34 }
 0x330   : > { %3865 = vmatmul.mubr.f32.gmra.mrb[110].mxu1 %v5830_v35  ;;  %3181 = vmatmul.mubr.f32.gmra.mrb[110].mxu0 %v5830_v35 }
 0x331   : > { %3869 = vmatprep.mubr.f32.mxu1 %v5831_v36  ;;  %3186 = vmatprep.mubr.f32.mxu0 %v5831_v36 }
 0x334   : > { %3870 = vmatmul.mubr.f32.gmra.mrb[112].mxu1 %v5832_v37  ;;  %3187 = vmatmul.mubr.f32.gmra.mrb[112].mxu0 %v5832_v37 }
 0x335   : > { %3874 = vmatprep.mubr.f32.mxu1 %v5833_v38  ;;  %3192 = vmatprep.mubr.f32.mxu0 %v5833_v38 }
 0x338   : > { %3875 = vmatmul.mubr.f32.gmra.mrb[114].mxu1 %v5834_v39  ;;  %3193 = vmatmul.mubr.f32.gmra.mrb[114].mxu0 %v5834_v39 }
 0x339   : > { %3879 = vmatprep.mubr.f32.mxu1 %v5835_v40  ;;  %3198 = vmatprep.mubr.f32.mxu0 %v5835_v40 }
 0x33c   : > { %3880 = vmatmul.mubr.f32.gmra.mrb[116].mxu1 %v5836_v41  ;;  %3199 = vmatmul.mubr.f32.gmra.mrb[116].mxu0 %v5836_v41 }
 0x33d   : > { %3884 = vmatprep.mubr.f32.mxu1 %v5837_v42  ;;  %3204 = vmatprep.mubr.f32.mxu0 %v5837_v42 }
 0x340   : > { %3885 = vmatmul.mubr.f32.gmra.mrb[118].mxu1 %v5838_v43  ;;  %3205 = vmatmul.mubr.f32.gmra.mrb[118].mxu0 %v5838_v43 }
 0x341   : > { %3889 = vmatprep.mubr.f32.mxu1 %v5839_v44  ;;  %3210 = vmatprep.mubr.f32.mxu0 %v5839_v44 }
 0x344   : > { %3890 = vmatmul.mubr.f32.gmra.mrb[120].mxu1 %v5840_v45  ;;  %3211 = vmatmul.mubr.f32.gmra.mrb[120].mxu0 %v5840_v45 }
 0x345   : > { %3894 = vmatprep.mubr.f32.mxu1 %v5841_v46  ;;  %3216 = vmatprep.mubr.f32.mxu0 %v5841_v46 }
 0x348   : > { %3895 = vmatmul.mubr.f32.gmra.mrb[122].mxu1 %v5842_v47  ;;  %3217 = vmatmul.mubr.f32.gmra.mrb[122].mxu0 %v5842_v47 }
 0x349   : > { %3899 = vmatprep.mubr.f32.mxu1 %v5843_v48  ;;  %3222 = vmatprep.mubr.f32.mxu0 %v5843_v48 }
 0x34c   : > { %3900 = vmatmul.mubr.f32.gmra.mrb[124].mxu1 %v5844_v49  ;;  %3223 = vmatmul.mubr.f32.gmra.mrb[124].mxu0 %v5844_v49 }
 0x34d   : > { %3904 = vmatprep.mubr.f32.mxu1 %v5845_v50  ;;  %3228 = vmatprep.mubr.f32.mxu0 %v5845_v50 }
 0x350   : > { %3905 = vmatmul.mubr.f32.gmra.mrb[126].mxu1 %v5846_v51  ;;  %3229 = vmatmul.mubr.f32.gmra.mrb[126].mxu0 %v5846_v51 }
 0x3a7   : > { %v3751_v52 = vpop.f32.mrb[64].mxu1  ;;  %v3044_v53 = vpop.f32.mrb[64].mxu0 }
 0x3a8   : > { %4364 = vst.msk [vmem:[%s7156_s10 + $0x310] sm:$0xff] %vm2080_vm0, %v3751_v52  ;;  %4362 = vst [vmem:[%s7156_s10 + $0x300] sm:$0xff] %v3044_v53  ;;  %v3753_v54 = vpop.f32.mrb[65].mxu1  ;;  %v3046_v55 = vpop.f32.mrb[65].mxu0 }
 0x3a9   : > { %4363 = vst [vmem:[%s7156_s10 + $0x308] sm:$0xff] %v3046_v55 }
 0x3ab   : > { %v3756_v56 = vpop.f32.mrb[66].mxu1  ;;  %v3050_v57 = vpop.f32.mrb[66].mxu0 }
 0x3ac   : > { %4367 = vst.msk [vmem:[%s7156_s10 + $0x328] sm:$0xff] %vm2080_vm0, %v3756_v56  ;;  %4365 = vst [vmem:[%s7156_s10 + $0x318] sm:$0xff] %v3050_v57  ;;  %v3758_v58 = vpop.f32.mrb[67].mxu1  ;;  %v3052_v59 = vpop.f32.mrb[67].mxu0 }
 0x3ad   : > { %4366 = vst [vmem:[%s7156_s10 + $0x320] sm:$0xff] %v3052_v59 }
 0x3af   : > { %v3761_v60 = vpop.f32.mrb[68].mxu1  ;;  %v3056_v61 = vpop.f32.mrb[68].mxu0 }
 0x3b0   : > { %4370 = vst.msk [vmem:[%s7156_s10 + $0x340] sm:$0xff] %vm2080_vm0, %v3761_v60  ;;  %4368 = vst [vmem:[%s7156_s10 + $0x330] sm:$0xff] %v3056_v61  ;;  %v3763_v62 = vpop.f32.mrb[69].mxu1  ;;  %v3058_v63 = vpop.f32.mrb[69].mxu0 }
 0x3b1   : > { %4369 = vst [vmem:[%s7156_s10 + $0x338] sm:$0xff] %v3058_v63 }
 0x3b3   : > { %v3766_v0 = vpop.f32.mrb[70].mxu1  ;;  %v3062_v1 = vpop.f32.mrb[70].mxu0 }
 0x3b4   : > { %4373 = vst.msk [vmem:[%s7156_s10 + $0x358] sm:$0xff] %vm2080_vm0, %v3766_v0  ;;  %4371 = vst [vmem:[%s7156_s10 + $0x348] sm:$0xff] %v3062_v1  ;;  %v3768_v2 = vpop.f32.mrb[71].mxu1  ;;  %v3064_v3 = vpop.f32.mrb[71].mxu0 }
 0x3b5   : > { %4372 = vst [vmem:[%s7156_s10 + $0x350] sm:$0xff] %v3064_v3 }
 0x3b7   : > { %v3771_v4 = vpop.f32.mrb[72].mxu1  ;;  %v3068_v5 = vpop.f32.mrb[72].mxu0 }
 0x3b8   : > { %4376 = vst.msk [vmem:[%s7156_s10 + $0x370] sm:$0xff] %vm2080_vm0, %v3771_v4  ;;  %4374 = vst [vmem:[%s7156_s10 + $0x360] sm:$0xff] %v3068_v5  ;;  %v3773_v6 = vpop.f32.mrb[73].mxu1  ;;  %v3070_v7 = vpop.f32.mrb[73].mxu0 }
 0x3b9   : > { %4375 = vst [vmem:[%s7156_s10 + $0x368] sm:$0xff] %v3070_v7 }
 0x3bb   : > { %v3776_v8 = vpop.f32.mrb[74].mxu1  ;;  %v3074_v9 = vpop.f32.mrb[74].mxu0 }
 0x3bc   : > { %4379 = vst.msk [vmem:[%s7156_s10 + $0x388] sm:$0xff] %vm2080_vm0, %v3776_v8  ;;  %4377 = vst [vmem:[%s7156_s10 + $0x378] sm:$0xff] %v3074_v9  ;;  %v3778_v10 = vpop.f32.mrb[75].mxu1  ;;  %v3076_v11 = vpop.f32.mrb[75].mxu0 }
 0x3bd   : > { %4378 = vst [vmem:[%s7156_s10 + $0x380] sm:$0xff] %v3076_v11 }
 0x3bf   : > { %v3781_v12 = vpop.f32.mrb[76].mxu1  ;;  %v3080_v13 = vpop.f32.mrb[76].mxu0 }
 0x3c0   : > { %4382 = vst.msk [vmem:[%s7156_s10 + $0x3a0] sm:$0xff] %vm2080_vm0, %v3781_v12  ;;  %4380 = vst [vmem:[%s7156_s10 + $0x390] sm:$0xff] %v3080_v13  ;;  %v3783_v14 = vpop.f32.mrb[77].mxu1  ;;  %v3082_v15 = vpop.f32.mrb[77].mxu0 }
 0x3c1   : > { %4381 = vst [vmem:[%s7156_s10 + $0x398] sm:$0xff] %v3082_v15 }
 0x3c3   : > { %v3786_v16 = vpop.f32.mrb[78].mxu1  ;;  %v3086_v17 = vpop.f32.mrb[78].mxu0 }
 0x3c4   : > { %4385 = vst.msk [vmem:[%s7156_s10 + $0x3b8] sm:$0xff] %vm2080_vm0, %v3786_v16  ;;  %4383 = vst [vmem:[%s7156_s10 + $0x3a8] sm:$0xff] %v3086_v17  ;;  %v3788_v18 = vpop.f32.mrb[79].mxu1  ;;  %v3088_v19 = vpop.f32.mrb[79].mxu0 }
 0x3c5   : > { %4384 = vst [vmem:[%s7156_s10 + $0x3b0] sm:$0xff] %v3088_v19 }
 0x3c7   : > { %v3791_v20 = vpop.f32.mrb[80].mxu1  ;;  %v3092_v21 = vpop.f32.mrb[80].mxu0 }
 0x3c8   : > { %4388 = vst.msk [vmem:[%s7156_s10 + $0x3d0] sm:$0xff] %vm2080_vm0, %v3791_v20  ;;  %4386 = vst [vmem:[%s7156_s10 + $0x3c0] sm:$0xff] %v3092_v21  ;;  %v3793_v22 = vpop.f32.mrb[81].mxu1  ;;  %v3094_v23 = vpop.f32.mrb[81].mxu0 }
 0x3c9   : > { %4387 = vst [vmem:[%s7156_s10 + $0x3c8] sm:$0xff] %v3094_v23 }
 0x3cb   : > { %v3796_v24 = vpop.f32.mrb[82].mxu1  ;;  %v3098_v25 = vpop.f32.mrb[82].mxu0 }
 0x3cc   : > { %4391 = vst.msk [vmem:[%s7156_s10 + $0x3e8] sm:$0xff] %vm2080_vm0, %v3796_v24  ;;  %4389 = vst [vmem:[%s7156_s10 + $0x3d8] sm:$0xff] %v3098_v25  ;;  %v3798_v26 = vpop.f32.mrb[83].mxu1  ;;  %v3100_v27 = vpop.f32.mrb[83].mxu0 }
 0x3cd   : > { %4390 = vst [vmem:[%s7156_s10 + $0x3e0] sm:$0xff] %v3100_v27 }
 0x3cf   : > { %v3801_v28 = vpop.f32.mrb[84].mxu1  ;;  %v3104_v29 = vpop.f32.mrb[84].mxu0 }
 0x3d0   : > { %4394 = vst.msk [vmem:[%s7156_s10 + $0x400] sm:$0xff] %vm2080_vm0, %v3801_v28  ;;  %4392 = vst [vmem:[%s7156_s10 + $0x3f0] sm:$0xff] %v3104_v29  ;;  %v3803_v30 = vpop.f32.mrb[85].mxu1  ;;  %v3106_v31 = vpop.f32.mrb[85].mxu0 }
 0x3d1   : > { %4393 = vst [vmem:[%s7156_s10 + $0x3f8] sm:$0xff] %v3106_v31 }
 0x3d3   : > { %v3806_v32 = vpop.f32.mrb[86].mxu1  ;;  %v3110_v33 = vpop.f32.mrb[86].mxu0 }
 0x3d4   : > { %4397 = vst.msk [vmem:[%s7156_s10 + $0x418] sm:$0xff] %vm2080_vm0, %v3806_v32  ;;  %4395 = vst [vmem:[%s7156_s10 + $0x408] sm:$0xff] %v3110_v33  ;;  %v3808_v34 = vpop.f32.mrb[87].mxu1  ;;  %v3112_v35 = vpop.f32.mrb[87].mxu0 }
 0x3d5   : > { %4396 = vst [vmem:[%s7156_s10 + $0x410] sm:$0xff] %v3112_v35 }
 0x3d7   : > { %v3811_v36 = vpop.f32.mrb[88].mxu1  ;;  %v3116_v37 = vpop.f32.mrb[88].mxu0 }
 0x3d8   : > { %4400 = vst.msk [vmem:[%s7156_s10 + $0x430] sm:$0xff] %vm2080_vm0, %v3811_v36  ;;  %4398 = vst [vmem:[%s7156_s10 + $0x420] sm:$0xff] %v3116_v37  ;;  %v3813_v38 = vpop.f32.mrb[89].mxu1  ;;  %v3118_v39 = vpop.f32.mrb[89].mxu0 }
 0x3d9   : > { %4399 = vst [vmem:[%s7156_s10 + $0x428] sm:$0xff] %v3118_v39 }
 0x3db   : > { %v3816_v40 = vpop.f32.mrb[90].mxu1  ;;  %v3122_v41 = vpop.f32.mrb[90].mxu0 }
 0x3dc   : > { %4403 = vst.msk [vmem:[%s7156_s10 + $0x448] sm:$0xff] %vm2080_vm0, %v3816_v40  ;;  %4401 = vst [vmem:[%s7156_s10 + $0x438] sm:$0xff] %v3122_v41  ;;  %v3818_v42 = vpop.f32.mrb[91].mxu1  ;;  %v3124_v43 = vpop.f32.mrb[91].mxu0 }
 0x3dd   : > { %4402 = vst [vmem:[%s7156_s10 + $0x440] sm:$0xff] %v3124_v43 }
 0x3df   : > { %v3821_v44 = vpop.f32.mrb[92].mxu1  ;;  %v3128_v45 = vpop.f32.mrb[92].mxu0 }
 0x3e0   : > { %4406 = vst.msk [vmem:[%s7156_s10 + $0x460] sm:$0xff] %vm2080_vm0, %v3821_v44  ;;  %4404 = vst [vmem:[%s7156_s10 + $0x450] sm:$0xff] %v3128_v45  ;;  %v3823_v46 = vpop.f32.mrb[93].mxu1  ;;  %v3130_v47 = vpop.f32.mrb[93].mxu0 }
 0x3e1   : > { %4405 = vst [vmem:[%s7156_s10 + $0x458] sm:$0xff] %v3130_v47 }
 0x3e3   : > { %v3826_v48 = vpop.f32.mrb[94].mxu1  ;;  %v3134_v49 = vpop.f32.mrb[94].mxu0 }
 0x3e4   : > { %4409 = vst.msk [vmem:[%s7156_s10 + $0x478] sm:$0xff] %vm2080_vm0, %v3826_v48  ;;  %4407 = vst [vmem:[%s7156_s10 + $0x468] sm:$0xff] %v3134_v49  ;;  %v3828_v50 = vpop.f32.mrb[95].mxu1  ;;  %v3136_v51 = vpop.f32.mrb[95].mxu0 }
 0x3e5   : > { %4408 = vst [vmem:[%s7156_s10 + $0x470] sm:$0xff] %v3136_v51 }
 0x3e7   : > { %v3831_v52 = vpop.f32.mrb[96].mxu1  ;;  %v3140_v53 = vpop.f32.mrb[96].mxu0 }
 0x3e8   : > { %4412 = vst.msk [vmem:[%s7156_s10 + $0x490] sm:$0xff] %vm2080_vm0, %v3831_v52  ;;  %4410 = vst [vmem:[%s7156_s10 + $0x480] sm:$0xff] %v3140_v53  ;;  %v3833_v54 = vpop.f32.mrb[97].mxu1  ;;  %v3142_v55 = vpop.f32.mrb[97].mxu0 }
 0x3e9   : > { %4411 = vst [vmem:[%s7156_s10 + $0x488] sm:$0xff] %v3142_v55 }
 0x3eb   : > { %v3836_v56 = vpop.f32.mrb[98].mxu1  ;;  %v3146_v57 = vpop.f32.mrb[98].mxu0 }
 0x3ec   : > { %4415 = vst.msk [vmem:[%s7156_s10 + $0x4a8] sm:$0xff] %vm2080_vm0, %v3836_v56  ;;  %4413 = vst [vmem:[%s7156_s10 + $0x498] sm:$0xff] %v3146_v57  ;;  %v3838_v58 = vpop.f32.mrb[99].mxu1  ;;  %v3148_v59 = vpop.f32.mrb[99].mxu0 }
 0x3ed   : > { %4414 = vst [vmem:[%s7156_s10 + $0x4a0] sm:$0xff] %v3148_v59 }
 0x3ef   : > { %v3841_v60 = vpop.f32.mrb[100].mxu1  ;;  %v3152_v61 = vpop.f32.mrb[100].mxu0 }
 0x3f0   : > { %4418 = vst.msk [vmem:[%s7156_s10 + $0x4c0] sm:$0xff] %vm2080_vm0, %v3841_v60  ;;  %4416 = vst [vmem:[%s7156_s10 + $0x4b0] sm:$0xff] %v3152_v61  ;;  %v3843_v62 = vpop.f32.mrb[101].mxu1  ;;  %v3154_v63 = vpop.f32.mrb[101].mxu0 }
 0x3f1   : > { %4417 = vst [vmem:[%s7156_s10 + $0x4b8] sm:$0xff] %v3154_v63 }
 0x3f3   : > { %v3846_v0 = vpop.f32.mrb[102].mxu1  ;;  %v3158_v1 = vpop.f32.mrb[102].mxu0 }
 0x3f4   : > { %4421 = vst.msk [vmem:[%s7156_s10 + $0x4d8] sm:$0xff] %vm2080_vm0, %v3846_v0  ;;  %4419 = vst [vmem:[%s7156_s10 + $0x4c8] sm:$0xff] %v3158_v1  ;;  %v3848_v2 = vpop.f32.mrb[103].mxu1  ;;  %v3160_v3 = vpop.f32.mrb[103].mxu0 }
 0x3f5   : > { %4420 = vst [vmem:[%s7156_s10 + $0x4d0] sm:$0xff] %v3160_v3 }
 0x3f7   : > { %v3851_v4 = vpop.f32.mrb[104].mxu1  ;;  %v3164_v5 = vpop.f32.mrb[104].mxu0 }
 0x3f8   : > { %4424 = vst.msk [vmem:[%s7156_s10 + $0x4f0] sm:$0xff] %vm2080_vm0, %v3851_v4  ;;  %4422 = vst [vmem:[%s7156_s10 + $0x4e0] sm:$0xff] %v3164_v5  ;;  %v3853_v6 = vpop.f32.mrb[105].mxu1  ;;  %v3166_v7 = vpop.f32.mrb[105].mxu0 }
 0x3f9   : > { %4423 = vst [vmem:[%s7156_s10 + $0x4e8] sm:$0xff] %v3166_v7 }
 0x3fb   : > { %v3856_v8 = vpop.f32.mrb[106].mxu1  ;;  %v3170_v9 = vpop.f32.mrb[106].mxu0 }
 0x3fc   : > { %4427 = vst.msk [vmem:[%s7156_s10 + $0x508] sm:$0xff] %vm2080_vm0, %v3856_v8  ;;  %4425 = vst [vmem:[%s7156_s10 + $0x4f8] sm:$0xff] %v3170_v9  ;;  %v3858_v10 = vpop.f32.mrb[107].mxu1  ;;  %v3172_v11 = vpop.f32.mrb[107].mxu0 }
 0x3fd   : > { %4426 = vst [vmem:[%s7156_s10 + $0x500] sm:$0xff] %v3172_v11 }
 0x3ff   : > { %v3861_v12 = vpop.f32.mrb[108].mxu1  ;;  %v3176_v13 = vpop.f32.mrb[108].mxu0 }
 0x400   : > { %4430 = vst.msk [vmem:[%s7156_s10 + $0x520] sm:$0xff] %vm2080_vm0, %v3861_v12  ;;  %4428 = vst [vmem:[%s7156_s10 + $0x510] sm:$0xff] %v3176_v13  ;;  %v3863_v14 = vpop.f32.mrb[109].mxu1  ;;  %v3178_v15 = vpop.f32.mrb[109].mxu0 }
 0x401   : > { %4429 = vst [vmem:[%s7156_s10 + $0x518] sm:$0xff] %v3178_v15 }
 0x403   : > { %v3866_v16 = vpop.f32.mrb[110].mxu1  ;;  %v3182_v17 = vpop.f32.mrb[110].mxu0 }
 0x404   : > { %4433 = vst.msk [vmem:[%s7156_s10 + $0x538] sm:$0xff] %vm2080_vm0, %v3866_v16  ;;  %4431 = vst [vmem:[%s7156_s10 + $0x528] sm:$0xff] %v3182_v17  ;;  %v3868_v18 = vpop.f32.mrb[111].mxu1  ;;  %v3184_v19 = vpop.f32.mrb[111].mxu0 }
 0x405   : > { %4432 = vst [vmem:[%s7156_s10 + $0x530] sm:$0xff] %v3184_v19 }
 0x407   : > { %v3871_v20 = vpop.f32.mrb[112].mxu1  ;;  %v3188_v21 = vpop.f32.mrb[112].mxu0 }
 0x408   : > { %4436 = vst.msk [vmem:[%s7156_s10 + $0x550] sm:$0xff] %vm2080_vm0, %v3871_v20  ;;  %4434 = vst [vmem:[%s7156_s10 + $0x540] sm:$0xff] %v3188_v21  ;;  %v3873_v22 = vpop.f32.mrb[113].mxu1  ;;  %v3190_v23 = vpop.f32.mrb[113].mxu0 }
 0x409   : > { %4435 = vst [vmem:[%s7156_s10 + $0x548] sm:$0xff] %v3190_v23 }
 0x40b   : > { %v3876_v24 = vpop.f32.mrb[114].mxu1  ;;  %v3194_v25 = vpop.f32.mrb[114].mxu0 }
 0x40c   : > { %4439 = vst.msk [vmem:[%s7156_s10 + $0x568] sm:$0xff] %vm2080_vm0, %v3876_v24  ;;  %4437 = vst [vmem:[%s7156_s10 + $0x558] sm:$0xff] %v3194_v25  ;;  %v3878_v26 = vpop.f32.mrb[115].mxu1  ;;  %v3196_v27 = vpop.f32.mrb[115].mxu0 }
 0x40d   : > { %4438 = vst [vmem:[%s7156_s10 + $0x560] sm:$0xff] %v3196_v27 }
 0x40f   : > { %v3881_v28 = vpop.f32.mrb[116].mxu1  ;;  %v3200_v29 = vpop.f32.mrb[116].mxu0 }
 0x410   : > { %4442 = vst.msk [vmem:[%s7156_s10 + $0x580] sm:$0xff] %vm2080_vm0, %v3881_v28  ;;  %4440 = vst [vmem:[%s7156_s10 + $0x570] sm:$0xff] %v3200_v29  ;;  %v3883_v30 = vpop.f32.mrb[117].mxu1  ;;  %v3202_v31 = vpop.f32.mrb[117].mxu0 }
 0x411   : > { %4441 = vst [vmem:[%s7156_s10 + $0x578] sm:$0xff] %v3202_v31 }
 0x413   : > { %v3886_v32 = vpop.f32.mrb[118].mxu1  ;;  %v3206_v33 = vpop.f32.mrb[118].mxu0 }
 0x414   : > { %4445 = vst.msk [vmem:[%s7156_s10 + $0x598] sm:$0xff] %vm2080_vm0, %v3886_v32  ;;  %4443 = vst [vmem:[%s7156_s10 + $0x588] sm:$0xff] %v3206_v33  ;;  %v3888_v34 = vpop.f32.mrb[119].mxu1  ;;  %v3208_v35 = vpop.f32.mrb[119].mxu0 }
 0x415   : > { %4444 = vst [vmem:[%s7156_s10 + $0x590] sm:$0xff] %v3208_v35 }
 0x417   : > { %v3891_v36 = vpop.f32.mrb[120].mxu1  ;;  %v3212_v37 = vpop.f32.mrb[120].mxu0 }
 0x418   : > { %4448 = vst.msk [vmem:[%s7156_s10 + $0x5b0] sm:$0xff] %vm2080_vm0, %v3891_v36  ;;  %4446 = vst [vmem:[%s7156_s10 + $0x5a0] sm:$0xff] %v3212_v37  ;;  %v3893_v38 = vpop.f32.mrb[121].mxu1  ;;  %v3214_v39 = vpop.f32.mrb[121].mxu0 }
 0x419   : > { %4447 = vst [vmem:[%s7156_s10 + $0x5a8] sm:$0xff] %v3214_v39 }
 0x41b   : > { %v3896_v40 = vpop.f32.mrb[122].mxu1  ;;  %v3218_v41 = vpop.f32.mrb[122].mxu0 }
 0x41c   : > { %4451 = vst.msk [vmem:[%s7156_s10 + $0x5c8] sm:$0xff] %vm2080_vm0, %v3896_v40  ;;  %4449 = vst [vmem:[%s7156_s10 + $0x5b8] sm:$0xff] %v3218_v41  ;;  %v3898_v42 = vpop.f32.mrb[123].mxu1  ;;  %v3220_v43 = vpop.f32.mrb[123].mxu0 }
 0x41d   : > { %4450 = vst [vmem:[%s7156_s10 + $0x5c0] sm:$0xff] %v3220_v43 }
 0x41f   : > { %v3901_v44 = vpop.f32.mrb[124].mxu1  ;;  %v3224_v45 = vpop.f32.mrb[124].mxu0 }
 0x420   : > { %4454 = vst.msk [vmem:[%s7156_s10 + $0x5e0] sm:$0xff] %vm2080_vm0, %v3901_v44  ;;  %4452 = vst [vmem:[%s7156_s10 + $0x5d0] sm:$0xff] %v3224_v45  ;;  %v3903_v46 = vpop.f32.mrb[125].mxu1  ;;  %v3226_v47 = vpop.f32.mrb[125].mxu0 }
 0x421   : > { %4453 = vst [vmem:[%s7156_s10 + $0x5d8] sm:$0xff] %v3226_v47 }
 0x423   : > { %v3906_v48 = vpop.f32.mrb[126].mxu1  ;;  %v3230_v49 = vpop.f32.mrb[126].mxu0 }
 0x424   : > { %4457 = vst.msk [vmem:[%s7156_s10 + $0x5f8] sm:$0xff] %vm2080_vm0, %v3906_v48  ;;  %4455 = vst [vmem:[%s7156_s10 + $0x5e8] sm:$0xff] %v3230_v49  ;;  %v3908_v50 = vpop.f32.mrb[127].mxu1  ;;  %v3232_v51 = vpop.f32.mrb[127].mxu0 }
 0x425   : > { %4456 = vst [vmem:[%s7156_s10 + $0x5f0] sm:$0xff] %v3232_v51 }
 0x426 PF: > { %s12_s9 = sadd.s32 1, %s5853_s9  }
 0x427   : > { %p9_p4 = scmp.ge.s32.totalorder %s12_s9, 6  }
 0x429   :  { %11 = sbr.rel (!%p9_p4) target bundleno = 1 (0x1), region = 60 }

</bundles_post_ra>
